<compile_context>
chip_gen: v7x
topology: tpu7x:2x2x1
jax: 0.10.0
libtpu: 0.0.40
codegen_flags: <defaults>
</compile_context>

<pallas_src>
import functools
import math

import jax
import jax.numpy as jnp
from jax.experimental import pallas as pl
from jax.experimental.pallas import tpu as pltpu

_LEAKY_SLOPE = 0.01      # PyTorch nn.LeakyReLU default
_BN_EPS = 1e-5           # PyTorch nn.BatchNorm2d default
_PAD = 8                 # sublane-aligned W offset of the image in the scratch
_VMEM_LIMIT = 64 << 20   # raised scoped-VMEM limit (<= physical on v5e/v6e/v7x)


# ----------------------------------------------------------------------------
# Fused kernel: [optional folded-BN + LeakyReLU on the input rows]
#               -> 3x3 "same" conv as ONE fat MXU matmul (im2col, K = 9*Cin)
#               -> per-tile partial BN statistics of the conv output.
# One (image, row-tile) per grid step; halo rows arrive as 1-row input blocks.
# ----------------------------------------------------------------------------
def _fused_conv_kernel(xb_ref, xt_ref, xbt_ref, w_ref, scale_ref, shift_ref,
                       y_ref, psum_ref, pcss_ref, xpad_ref, col_ref,
                       *, Ht, W, Cin, Cout, apply_input_act):
    h = pl.program_id(1)
    nh = pl.num_programs(1)

    body = xb_ref[0]            # (Ht, W, Cin) f32
    top = xt_ref[0]             # (1,  W, Cin) row above the tile (clamped)
    bot = xbt_ref[0]            # (1,  W, Cin) row below the tile (clamped)

    if apply_input_act:
        # Previous stage's BatchNorm folded into scale/shift, then LeakyReLU.
        scale = scale_ref[...]  # (1, 1, Cin)
        shift = shift_ref[...]

        def act(v):
            z = v * scale + shift
            return jnp.where(z >= 0, z, _LEAKY_SLOPE * z)

        body, top, bot = act(body), act(top), act(bot)

    # Rows outside the image are zero padding of the conv INPUT (i.e. applied
    # AFTER the activation), so zero the halo rows at the image boundary.
    top = top * (h > 0).astype(jnp.float32)
    bot = bot * (h < nh - 1).astype(jnp.float32)

    # Padded slab (Ht+2, W+_PAD+1, Cin): interior at sublane offset _PAD
    # (aligned stores); ONLY the two 1-pixel halo columns are zeroed per step.
    xpad_ref[0:1, _PAD:_PAD + W, :] = top
    xpad_ref[1:Ht + 1, _PAD:_PAD + W, :] = body
    xpad_ref[Ht + 1:Ht + 2, _PAD:_PAD + W, :] = bot
    zcol = jnp.zeros((Ht + 2, 1, Cin), jnp.float32)
    xpad_ref[:, _PAD - 1:_PAD, :] = zcol
    xpad_ref[:, _PAD + W:_PAD + W + 1, :] = zcol

    # im2col: pack the 9 shifted (Ht*W, Cin) taps side by side -> one fat
    # (Ht*W, 9*Cin) x (9*Cin, Cout) MXU matmul instead of 9 K=Cin matmuls.
    for dy in range(3):
        for dx in range(3):
            k = dy * 3 + dx
            patch = xpad_ref[dy:dy + Ht, _PAD - 1 + dx:_PAD - 1 + dx + W, :]
            col_ref[:, k * Cin:(k + 1) * Cin] = patch.reshape(Ht * W, Cin)

    # bf16 operands (native MXU path on v5e/v6e/v7x), f32 accumulation.
    acc = jnp.dot(col_ref[...].astype(jnp.bfloat16), w_ref[...],
                  preferred_element_type=jnp.float32)        # (Ht*W, Cout)

    # No conv bias: exactly cancelled by the training-mode BatchNorm that
    # always follows this conv (mean subtraction; variance shift-invariant).
    y_ref[0] = acc.reshape(Ht, W, Cout)

    # Per-tile partial BN statistics: sum and CENTERED sum of squares.
    # (Welford-style combine in the wrapper avoids E[x^2]-E[x]^2 cancellation.)
    tsum = jnp.sum(acc, axis=0, keepdims=True)               # (1, Cout)
    tmu = tsum * (1.0 / float(Ht * W))
    d = acc - tmu
    tcss = jnp.sum(d * d, axis=0, keepdims=True)             # (1, Cout)
    psum_ref[...] = tsum.reshape(1, 1, 1, Cout)
    pcss_ref[...] = tcss.reshape(1, 1, 1, Cout)


def fused_conv3x3(x_nhwc, w_flat, ht, in_scale=None, in_shift=None):
    """y = conv3x3(act(x)); act = LeakyReLU(x*in_scale + in_shift) if given.

    w_flat: (9*Cin, Cout) bf16, tap-major / channel-minor (k = kh*3 + kw).
    Returns (y, partial_sum, partial_centered_sq) with partials shaped
    (N, H//ht, 1, Cout) -- per (image, row-tile) BN statistics of y.
    """
    N, H, W, Cin = x_nhwc.shape
    Cout = w_flat.shape[-1]
    assert w_flat.shape[0] == 9 * Cin and H % ht == 0
    nh = H // ht
    apply_act = in_scale is not None
    if not apply_act:  # dummies; never read inside the kernel
        in_scale = jnp.ones((1, 1, Cin), jnp.float32)
        in_shift = jnp.zeros((1, 1, Cin), jnp.float32)

    kernel = functools.partial(_fused_conv_kernel, Ht=ht, W=W, Cin=Cin,
                               Cout=Cout, apply_input_act=apply_act)
    flops = 2 * N * H * W * 9 * Cin * Cout
    bytes_accessed = (4 * N * (H + 2 * nh) * W * Cin       # body + halo rows
                      + 2 * 9 * Cin * Cout                 # bf16 weights
                      + 4 * N * H * W * Cout               # y
                      + 8 * N * nh * Cout + 8 * Cin)       # stats, scale/shift

    return pl.pallas_call(
        kernel,
        out_shape=(
            jax.ShapeDtypeStruct((N, H, W, Cout), jnp.float32),
            jax.ShapeDtypeStruct((N, nh, 1, Cout), jnp.float32),
            jax.ShapeDtypeStruct((N, nh, 1, Cout), jnp.float32),
        ),
        grid=(N, nh),
        in_specs=[
            pl.BlockSpec((1, ht, W, Cin), lambda n, h: (n, h, 0, 0)),
            # 1-row halo blocks: block size 1 => block index == row index;
            # clamped at the image boundary (zeroed inside the kernel).
            pl.BlockSpec((1, 1, W, Cin),
                         lambda n, h: (n, jnp.maximum(h * ht - 1, 0), 0, 0)),
            pl.BlockSpec((1, 1, W, Cin),
                         lambda n, h: (n, jnp.minimum(h * ht + ht, H - 1), 0, 0)),
            pl.BlockSpec((9 * Cin, Cout), lambda n, h: (0, 0)),
            pl.BlockSpec((1, 1, Cin), lambda n, h: (0, 0, 0)),
            pl.BlockSpec((1, 1, Cin), lambda n, h: (0, 0, 0)),
        ],
        out_specs=(
            pl.BlockSpec((1, ht, W, Cout), lambda n, h: (n, h, 0, 0)),
            pl.BlockSpec((1, 1, 1, Cout), lambda n, h: (n, h, 0, 0)),
            pl.BlockSpec((1, 1, 1, Cout), lambda n, h: (n, h, 0, 0)),
        ),
        scratch_shapes=[
            pltpu.VMEM((ht + 2, W + _PAD + 1, Cin), jnp.float32),  # padded slab
            pltpu.VMEM((ht * W, 9 * Cin), jnp.float32),            # im2col
        ],
        compiler_params=pltpu.CompilerParams(
            dimension_semantics=("parallel", "parallel"),
            vmem_limit_bytes=_VMEM_LIMIT),
        cost_estimate=pl.CostEstimate(flops=int(flops), transcendentals=0,
                                      bytes_accessed=int(bytes_accessed)),
    )(x_nhwc, x_nhwc, x_nhwc, w_flat, in_scale, in_shift)


# ----------------------------------------------------------------------------
# Final folded BatchNorm + LeakyReLU (elementwise, HBM-bound): large row tiles.
# ----------------------------------------------------------------------------
def _bn_act_kernel(y_ref, scale_ref, shift_ref, o_ref):
    z = y_ref[...] * scale_ref[...] + shift_ref[...]
    o_ref[...] = jnp.where(z >= 0, z, _LEAKY_SLOPE * z)


def bn_leakyrelu(y, scale, shift, target_block_bytes=4 << 20):
    N, H, W, C = y.shape
    row_bytes = W * C * 4
    ht = 1
    for d in range(1, H + 1):                 # largest divisor fitting budget
        if H % d == 0 and d * row_bytes <= target_block_bytes:
            ht = d
    scale4 = scale.reshape(1, 1, 1, C).astype(jnp.float32)
    shift4 = shift.reshape(1, 1, 1, C).astype(jnp.float32)
    return pl.pallas_call(
        _bn_act_kernel,
        out_shape=jax.ShapeDtypeStruct(y.shape, jnp.float32),
        grid=(N, H // ht),
        in_specs=[
            pl.BlockSpec((1, ht, W, C), lambda n, h: (n, h, 0, 0)),
            pl.BlockSpec((1, 1, 1, C), lambda n, h: (0, 0, 0, 0)),
            pl.BlockSpec((1, 1, 1, C), lambda n, h: (0, 0, 0, 0)),
        ],
        out_specs=pl.BlockSpec((1, ht, W, C), lambda n, h: (n, h, 0, 0)),
        compiler_params=pltpu.CompilerParams(
            dimension_semantics=("parallel", "parallel"),
            vmem_limit_bytes=_VMEM_LIMIT),
    )(y, scale4, shift4)


# ----------------------------------------------------------------------------
# Wrapper-level glue (tiny (N*tiles, C)-sized math only).
# ----------------------------------------------------------------------------
def _pick_conv_ht(H, W, cmax, target_block_bytes=2 << 20):
    """Largest divisor of H whose (ht, W, cmax) f32 block fits the target,
    capped at H//2 (when H allows) so there are >=2 row tiles per image."""
    row_bytes = W * cmax * 4
    cap = H // 2 if H >= 16 else H
    best = 1
    for d in range(1, H + 1):
        if H % d == 0 and d <= cap and d * row_bytes <= target_block_bytes:
            best = d
    return best


def _fold_bn(psum, pcss, gamma, beta, tile_count, total_count):
    """Welford-style combine of per-tile (sum, centered-SS) -> BN scale/shift."""
    c = psum.shape[-1]
    tsum = psum.reshape(-1, c)
    tcss = pcss.reshape(-1, c)
    mean = jnp.sum(tsum, axis=0) / total_count
    tmu = tsum / tile_count
    var = (jnp.sum(tcss, axis=0)
           + tile_count * jnp.sum((tmu - mean) ** 2, axis=0)) / total_count
    var = jnp.maximum(var, 0.0)
    scale = gamma / jnp.sqrt(var + _BN_EPS)
    shift = beta - mean * scale
    return scale, shift


def double_conv_forward_nhwc(x_nhwc, params):
    """double_conv on NHWC activations (no layout transposes on this path)."""
    N, H, W, Cin = x_nhwc.shape
    Cout = params["gamma1"].shape[0]
    count = float(N * H * W)

    w1 = params["w1"].reshape(9 * Cin, Cout).astype(jnp.bfloat16)
    w2 = params["w2"].reshape(9 * Cout, Cout).astype(jnp.bfloat16)

    ht1 = _pick_conv_ht(H, W, max(Cin, Cout))
    ht2 = _pick_conv_ht(H, W, Cout)

    # stage 1: conv (+ fused partial BN statistics of the conv output)
    y1, s1, q1 = fused_conv3x3(x_nhwc, w1, ht1)
    scale1, shift1 = _fold_bn(s1, q1, params["gamma1"], params["beta1"],
                              float(ht1 * W), count)

    # stage 2: conv with stage-1's folded BN + LeakyReLU fused into its input
    # path (no separate elementwise pass / HBM round trip for act(y1)).
    y2, s2, q2 = fused_conv3x3(y1, w2, ht2,
                               scale1.reshape(1, 1, Cout),
                               shift1.reshape(1, 1, Cout))
    scale2, shift2 = _fold_bn(s2, q2, params["gamma2"], params["beta2"],
                              float(ht2 * W), count)

    # final folded BN + LeakyReLU
    return bn_leakyrelu(y2, scale2, shift2)


def double_conv_forward(x_nchw, params):
    # NCHW boundary adapter for parity with the PyTorch module.  A full NHWC
    # model should call double_conv_forward_nhwc directly and drop both
    # transposes (each is an extra full-tensor HBM read+write).
    x = jnp.transpose(x_nchw, (0, 2, 3, 1))
    y = double_conv_forward_nhwc(x, params)
    return jnp.transpose(y, (0, 3, 1, 2))


def init_params(key, in_ch, out_ch):
    """PyTorch-default init (uniform conv weights/bias, BN gamma=1, beta=0).

    Biases are only consumed by the pure-JAX reference: the Pallas path omits
    them because training-mode BatchNorm cancels a per-channel bias exactly.
    """
    k = jax.random.split(key, 4)

    def conv_init(kw, kb, cin, cout):
        bound = 1.0 / math.sqrt(cin * 9)
        w = jax.random.uniform(kw, (cout, cin, 3, 3), jnp.float32, -bound, bound)
        b = jax.random.uniform(kb, (cout,), jnp.float32, -bound, bound)
        # (Cout, Cin, kh, kw) -> (kh, kw, Cin, Cout) -> (9, Cin, Cout)
        w9 = jnp.transpose(w, (2, 3, 1, 0)).reshape(9, cin, cout)
        return w9, b

    w1, b1 = conv_init(k[0], k[1], in_ch, out_ch)
    w2, b2 = conv_init(k[2], k[3], out_ch, out_ch)
    return {
        "w1": w1, "b1": b1,
        "gamma1": jnp.ones((out_ch,), jnp.float32),
        "beta1": jnp.zeros((out_ch,), jnp.float32),
        "w2": w2, "b2": b2,
        "gamma2": jnp.ones((out_ch,), jnp.float32),
        "beta2": jnp.zeros((out_ch,), jnp.float32),
    }


# ----------------------------------------------------------------------------
# Pure-JAX reference (WITH conv bias) for correctness checking.
# quantize_bf16=True mimics the kernel's bf16 MXU operands (f32 accumulate).
# ----------------------------------------------------------------------------
def _reference(x_nchw, params, *, quantize_bf16=False,
               eps=_BN_EPS, slope=_LEAKY_SLOPE):
    def conv(x, w9, b):
        cin, cout = w9.shape[1], w9.shape[2]
        w = w9.reshape(3, 3, cin, cout)  # HWIO
        prec = (jax.lax.Precision.DEFAULT if quantize_bf16
                else jax.lax.Precision.HIGHEST)
        if quantize_bf16:
            x = x.astype(jnp.bfloat16)
            w = w.astype(jnp.bfloat16)
        y = jax.lax.conv_general_dilated(
            x, w, window_strides=(1, 1), padding="SAME",
            dimension_numbers=("NHWC", "HWIO", "NHWC"),
            preferred_element_type=jnp.float32, precision=prec)
        return y + b.reshape(1, 1, 1, cout)

    def bn_act(y, gamma, beta):
        y = y.astype(jnp.float32)
        mean = jnp.mean(y, axis=(0, 1, 2))
        var = jnp.var(y, axis=(0, 1, 2))
        z = (y - mean) / jnp.sqrt(var + eps) * gamma + beta
        return jnp.where(z >= 0, z, slope * z)

    x = jnp.transpose(x_nchw, (0, 2, 3, 1))
    y1 = bn_act(conv(x, params["w1"], params["b1"]),
                params["gamma1"], params["beta1"])
    y2 = bn_act(conv(y1, params["w2"], params["b2"]),
                params["gamma2"], params["beta2"])
    return jnp.transpose(y2, (0, 3, 1, 2))


if __name__ == "__main__":
    in_ch, out_ch = 4, 8
    N, H, W = 2, 16, 16

    key = jax.random.PRNGKey(0)
    kx, kp = jax.random.split(key)
    x = jax.random.normal(kx, (N, in_ch, H, W), jnp.float32)  # NCHW like PyTorch
    params = init_params(kp, in_ch, out_ch)

    fwd = jax.jit(double_conv_forward)
    out = jax.block_until_ready(fwd(x, params))
    assert out.shape == (N, out_ch, H, W), out.shape

    # Tight check vs a reference that quantizes conv operands to bf16 exactly
    # like the kernel (f32 accumulate, f32 BN statistics).
    ref_q = _reference(x, params, quantize_bf16=True)
    err_q = float(jnp.max(jnp.abs(out - ref_q)))
    assert jnp.allclose(out, ref_q, atol=1e-2, rtol=1e-2), err_q

    # Sanity check vs the full-f32 PyTorch-equivalent reference; the residual
    # is just bf16 MXU operand rounding through the two conv+BN stages.
    ref = _reference(x, params)
    err = float(jnp.max(jnp.abs(out - ref)))
    assert jnp.allclose(out, ref, atol=5e-2, rtol=5e-2), err

    print("KERNEL_OK")
</pallas_src>

<mosaic_0001>
module attributes {stable_mosaic.version = 11 : i64} {
  func.func @_fused_conv_kernel(%arg0: i32, %arg1: i32, %arg2: memref<1x8x16x4xf32, #tpu.memory_space<vmem>>, %arg3: memref<1x1x16x4xf32, #tpu.memory_space<vmem>>, %arg4: memref<1x1x16x4xf32, #tpu.memory_space<vmem>>, %arg5: memref<36x8xbf16, #tpu.memory_space<vmem>>, %arg6: memref<1x1x4xf32, #tpu.memory_space<vmem>>, %arg7: memref<1x1x4xf32, #tpu.memory_space<vmem>>, %arg8: memref<1x8x16x8xf32, #tpu.memory_space<vmem>>, %arg9: memref<1x1x1x8xf32, #tpu.memory_space<vmem>>, %arg10: memref<1x1x1x8xf32, #tpu.memory_space<vmem>>, %arg11: memref<10x25x4xf32, #tpu.memory_space<vmem>>, %arg12: memref<128x36xf32, #tpu.memory_space<vmem>>) attributes {dimension_semantics = [#tpu.dimension_semantics<parallel>, #tpu.dimension_semantics<parallel>], iteration_bounds = array<i64: 2, 2>, scalar_prefetch = 0 : i64, scratch_operands = 2 : i64, tpu.core_type = #tpu.core_type<tc>, window_params = [{transform_indices = @transform_0, window_bounds = array<i64: 1, 8, 16, 4>}, {transform_indices = @transform_1, window_bounds = array<i64: 1, 1, 16, 4>}, {transform_indices = @transform_2, window_bounds = array<i64: 1, 1, 16, 4>}, {pipeline_mode = #tpu.pipeline_mode<synchronous>, transform_indices = @transform_3, window_bounds = array<i64: 36, 8>}, {pipeline_mode = #tpu.pipeline_mode<synchronous>, transform_indices = @transform_4, window_bounds = array<i64: 1, 1, 4>}, {pipeline_mode = #tpu.pipeline_mode<synchronous>, transform_indices = @transform_5, window_bounds = array<i64: 1, 1, 4>}, {transform_indices = @transform_6, window_bounds = array<i64: 1, 8, 16, 8>}, {transform_indices = @transform_7, window_bounds = array<i64: 1, 1, 1, 8>}, {transform_indices = @transform_8, window_bounds = array<i64: 1, 1, 1, 8>}]} {
    %c0 = arith.constant 0 : index
    %c0_0 = arith.constant 0 : index
    %c0_1 = arith.constant 0 : index
    %c0_2 = arith.constant 0 : index
    %0 = vector.load %arg2[%c0, %c0_0, %c0_1, %c0_2] : memref<1x8x16x4xf32, #tpu.memory_space<vmem>>, vector<1x8x16x4xf32>
    %1 = vector.shape_cast %0 : vector<1x8x16x4xf32> to vector<8x16x4xf32>
    %c0_3 = arith.constant 0 : index
    %c0_4 = arith.constant 0 : index
    %c0_5 = arith.constant 0 : index
    %c0_6 = arith.constant 0 : index
    %2 = vector.load %arg3[%c0_3, %c0_4, %c0_5, %c0_6] : memref<1x1x16x4xf32, #tpu.memory_space<vmem>>, vector<1x1x16x4xf32>
    %3 = vector.shape_cast %2 : vector<1x1x16x4xf32> to vector<1x16x4xf32>
    %c0_7 = arith.constant 0 : index
    %c0_8 = arith.constant 0 : index
    %c0_9 = arith.constant 0 : index
    %c0_10 = arith.constant 0 : index
    %4 = vector.load %arg4[%c0_7, %c0_8, %c0_9, %c0_10] : memref<1x1x16x4xf32, #tpu.memory_space<vmem>>, vector<1x1x16x4xf32>
    %5 = vector.shape_cast %4 : vector<1x1x16x4xf32> to vector<1x16x4xf32>
    %c0_i32 = arith.constant 0 : i32
    %6 = arith.cmpi sgt, %arg1, %c0_i32 : i32
    %7 = arith.extui %6 : i1 to i32
    %8 = arith.sitofp %7 : i32 to f32
    %9 = vector.broadcast %8 : f32 to vector<1x16x4xf32>
    %10 = arith.mulf %3, %9 : vector<1x16x4xf32>
    %c1_i32 = arith.constant 1 : i32
    %11 = arith.cmpi slt, %arg1, %c1_i32 : i32
    %12 = arith.extui %11 : i1 to i32
    %13 = arith.sitofp %12 : i32 to f32
    %14 = vector.broadcast %13 : f32 to vector<1x16x4xf32>
    %15 = arith.mulf %5, %14 : vector<1x16x4xf32>
    %c0_11 = arith.constant 0 : index
    %c8 = arith.constant 8 : index
    %c0_12 = arith.constant 0 : index
    %16 = vector.load %arg11[%c0_11, %c8, %c0_12] : memref<10x25x4xf32, #tpu.memory_space<vmem>>, vector<1x16x4xf32>
    tpu.vector_store %arg11[%c0_11, %c8, %c0_12], %10 {strides = array<i32>} : memref<10x25x4xf32, #tpu.memory_space<vmem>>, vector<1x16x4xf32>,
    %c1 = arith.constant 1 : index
    %c8_13 = arith.constant 8 : index
    %c0_14 = arith.constant 0 : index
    %17 = vector.load %arg11[%c1, %c8_13, %c0_14] : memref<10x25x4xf32, #tpu.memory_space<vmem>>, vector<8x16x4xf32>
    tpu.vector_store %arg11[%c1, %c8_13, %c0_14], %1 {strides = array<i32>} : memref<10x25x4xf32, #tpu.memory_space<vmem>>, vector<8x16x4xf32>,
    %c9 = arith.constant 9 : index
    %c8_15 = arith.constant 8 : index
    %c0_16 = arith.constant 0 : index
    %18 = vector.load %arg11[%c9, %c8_15, %c0_16] : memref<10x25x4xf32, #tpu.memory_space<vmem>>, vector<1x16x4xf32>
    tpu.vector_store %arg11[%c9, %c8_15, %c0_16], %15 {strides = array<i32>} : memref<10x25x4xf32, #tpu.memory_space<vmem>>, vector<1x16x4xf32>,
    %cst = arith.constant 0.000000e+00 : f32
    %19 = vector.broadcast %cst : f32 to vector<10x1x4xf32>
    %c0_17 = arith.constant 0 : index
    %c7 = arith.constant 7 : index
    %c0_18 = arith.constant 0 : index
    %20 = vector.load %arg11[%c0_17, %c7, %c0_18] : memref<10x25x4xf32, #tpu.memory_space<vmem>>, vector<10x1x4xf32>
    tpu.vector_store %arg11[%c0_17, %c7, %c0_18], %19 {strides = array<i32>} : memref<10x25x4xf32, #tpu.memory_space<vmem>>, vector<10x1x4xf32>,
    %c0_19 = arith.constant 0 : index
    %c24 = arith.constant 24 : index
    %c0_20 = arith.constant 0 : index
    %21 = vector.load %arg11[%c0_19, %c24, %c0_20] : memref<10x25x4xf32, #tpu.memory_space<vmem>>, vector<10x1x4xf32>
    tpu.vector_store %arg11[%c0_19, %c24, %c0_20], %19 {strides = array<i32>} : memref<10x25x4xf32, #tpu.memory_space<vmem>>, vector<10x1x4xf32>,
    %c0_21 = arith.constant 0 : index
    %c7_22 = arith.constant 7 : index
    %c0_23 = arith.constant 0 : index
    %22 = vector.load %arg11[%c0_21, %c7_22, %c0_23] : memref<10x25x4xf32, #tpu.memory_space<vmem>>, vector<8x16x4xf32>
    %23 = vector.shape_cast %22 : vector<8x16x4xf32> to vector<128x4xf32>
    %c0_24 = arith.constant 0 : index
    %c0_25 = arith.constant 0 : index
    %24 = vector.load %arg12[%c0_24, %c0_25] : memref<128x36xf32, #tpu.memory_space<vmem>>, vector<128x4xf32>
    tpu.vector_store %arg12[%c0_24, %c0_25], %23 {strides = array<i32>} : memref<128x36xf32, #tpu.memory_space<vmem>>, vector<128x4xf32>,
    %c0_26 = arith.constant 0 : index
    %c8_27 = arith.constant 8 : index
    %c0_28 = arith.constant 0 : index
    %25 = vector.load %arg11[%c0_26, %c8_27, %c0_28] : memref<10x25x4xf32, #tpu.memory_space<vmem>>, vector<8x16x4xf32>
    %26 = vector.shape_cast %25 : vector<8x16x4xf32> to vector<128x4xf32>
    %c0_29 = arith.constant 0 : index
    %c4 = arith.constant 4 : index
    %27 = vector.load %arg12[%c0_29, %c4] : memref<128x36xf32, #tpu.memory_space<vmem>>, vector<128x4xf32>
    tpu.vector_store %arg12[%c0_29, %c4], %26 {strides = array<i32>} : memref<128x36xf32, #tpu.memory_space<vmem>>, vector<128x4xf32>,
    %c0_30 = arith.constant 0 : index
    %c9_31 = arith.constant 9 : index
    %c0_32 = arith.constant 0 : index
    %28 = vector.load %arg11[%c0_30, %c9_31, %c0_32] : memref<10x25x4xf32, #tpu.memory_space<vmem>>, vector<8x16x4xf32>
    %29 = vector.shape_cast %28 : vector<8x16x4xf32> to vector<128x4xf32>
    %c0_33 = arith.constant 0 : index
    %c8_34 = arith.constant 8 : index
    %30 = vector.load %arg12[%c0_33, %c8_34] : memref<128x36xf32, #tpu.memory_space<vmem>>, vector<128x4xf32>
    tpu.vector_store %arg12[%c0_33, %c8_34], %29 {strides = array<i32>} : memref<128x36xf32, #tpu.memory_space<vmem>>, vector<128x4xf32>,
    %c1_35 = arith.constant 1 : index
    %c7_36 = arith.constant 7 : index
    %c0_37 = arith.constant 0 : index
    %31 = vector.load %arg11[%c1_35, %c7_36, %c0_37] : memref<10x25x4xf32, #tpu.memory_space<vmem>>, vector<8x16x4xf32>
    %32 = vector.shape_cast %31 : vector<8x16x4xf32> to vector<128x4xf32>
    %c0_38 = arith.constant 0 : index
    %c12 = arith.constant 12 : index
    %33 = vector.load %arg12[%c0_38, %c12] : memref<128x36xf32, #tpu.memory_space<vmem>>, vector<128x4xf32>
    tpu.vector_store %arg12[%c0_38, %c12], %32 {strides = array<i32>} : memref<128x36xf32, #tpu.memory_space<vmem>>, vector<128x4xf32>,
    %c1_39 = arith.constant 1 : index
    %c8_40 = arith.constant 8 : index
    %c0_41 = arith.constant 0 : index
    %34 = vector.load %arg11[%c1_39, %c8_40, %c0_41] : memref<10x25x4xf32, #tpu.memory_space<vmem>>, vector<8x16x4xf32>
    %35 = vector.shape_cast %34 : vector<8x16x4xf32> to vector<128x4xf32>
    %c0_42 = arith.constant 0 : index
    %c16 = arith.constant 16 : index
    %36 = vector.load %arg12[%c0_42, %c16] : memref<128x36xf32, #tpu.memory_space<vmem>>, vector<128x4xf32>
    tpu.vector_store %arg12[%c0_42, %c16], %35 {strides = array<i32>} : memref<128x36xf32, #tpu.memory_space<vmem>>, vector<128x4xf32>,
    %c1_43 = arith.constant 1 : index
    %c9_44 = arith.constant 9 : index
    %c0_45 = arith.constant 0 : index
    %37 = vector.load %arg11[%c1_43, %c9_44, %c0_45] : memref<10x25x4xf32, #tpu.memory_space<vmem>>, vector<8x16x4xf32>
    %38 = vector.shape_cast %37 : vector<8x16x4xf32> to vector<128x4xf32>
    %c0_46 = arith.constant 0 : index
    %c20 = arith.constant 20 : index
    %39 = vector.load %arg12[%c0_46, %c20] : memref<128x36xf32, #tpu.memory_space<vmem>>, vector<128x4xf32>
    tpu.vector_store %arg12[%c0_46, %c20], %38 {strides = array<i32>} : memref<128x36xf32, #tpu.memory_space<vmem>>, vector<128x4xf32>,
    %c2 = arith.constant 2 : index
    %c7_47 = arith.constant 7 : index
    %c0_48 = arith.constant 0 : index
    %40 = vector.load %arg11[%c2, %c7_47, %c0_48] : memref<10x25x4xf32, #tpu.memory_space<vmem>>, vector<8x16x4xf32>
    %41 = vector.shape_cast %40 : vector<8x16x4xf32> to vector<128x4xf32>
    %c0_49 = arith.constant 0 : index
    %c24_50 = arith.constant 24 : index
    %42 = vector.load %arg12[%c0_49, %c24_50] : memref<128x36xf32, #tpu.memory_space<vmem>>, vector<128x4xf32>
    tpu.vector_store %arg12[%c0_49, %c24_50], %41 {strides = array<i32>} : memref<128x36xf32, #tpu.memory_space<vmem>>, vector<128x4xf32>,
    %c2_51 = arith.constant 2 : index
    %c8_52 = arith.constant 8 : index
    %c0_53 = arith.constant 0 : index
    %43 = vector.load %arg11[%c2_51, %c8_52, %c0_53] : memref<10x25x4xf32, #tpu.memory_space<vmem>>, vector<8x16x4xf32>
    %44 = vector.shape_cast %43 : vector<8x16x4xf32> to vector<128x4xf32>
    %c0_54 = arith.constant 0 : index
    %c28 = arith.constant 28 : index
    %45 = vector.load %arg12[%c0_54, %c28] : memref<128x36xf32, #tpu.memory_space<vmem>>, vector<128x4xf32>
    tpu.vector_store %arg12[%c0_54, %c28], %44 {strides = array<i32>} : memref<128x36xf32, #tpu.memory_space<vmem>>, vector<128x4xf32>,
    %c2_55 = arith.constant 2 : index
    %c9_56 = arith.constant 9 : index
    %c0_57 = arith.constant 0 : index
    %46 = vector.load %arg11[%c2_55, %c9_56, %c0_57] : memref<10x25x4xf32, #tpu.memory_space<vmem>>, vector<8x16x4xf32>
    %47 = vector.shape_cast %46 : vector<8x16x4xf32> to vector<128x4xf32>
    %c0_58 = arith.constant 0 : index
    %c32 = arith.constant 32 : index
    %48 = vector.load %arg12[%c0_58, %c32] : memref<128x36xf32, #tpu.memory_space<vmem>>, vector<128x4xf32>
    tpu.vector_store %arg12[%c0_58, %c32], %47 {strides = array<i32>} : memref<128x36xf32, #tpu.memory_space<vmem>>, vector<128x4xf32>,
    %c0_59 = arith.constant 0 : index
    %c0_60 = arith.constant 0 : index
    %49 = vector.load %arg12[%c0_59, %c0_60] : memref<128x36xf32, #tpu.memory_space<vmem>>, vector<128x36xf32>
    %50 = arith.truncf %49 : vector<128x36xf32> to vector<128x36xbf16>
    %c0_61 = arith.constant 0 : index
    %c0_62 = arith.constant 0 : index
    %51 = vector.load %arg5[%c0_61, %c0_62] : memref<36x8xbf16, #tpu.memory_space<vmem>>, vector<36x8xbf16>
    %cst_63 = arith.constant dense<0.000000e+00> : vector<128x8xf32>
    %52 = tpu.matmul %50, %51, %cst_63 {dimension_numbers = #tpu.dot_dimension_numbers<[1], [0], [0], [1], [0, 0, 1, 1], [], []>} : vector<128x36xbf16>, vector<36x8xbf16>, vector<128x8xf32> -> vector<128x8xf32>
    %53 = vector.shape_cast %52 : vector<128x8xf32> to vector<8x16x8xf32>
    %c0_64 = arith.constant 0 : index
    %c0_65 = arith.constant 0 : index
    %c0_66 = arith.constant 0 : index
    %c0_67 = arith.constant 0 : index
    %54 = vector.load %arg8[%c0_64, %c0_65, %c0_66, %c0_67] : memref<1x8x16x8xf32, #tpu.memory_space<vmem>>, vector<1x8x16x8xf32>
    %55 = vector.shape_cast %54 : vector<1x8x16x8xf32> to vector<8x16x8xf32>
    %56 = vector.shape_cast %53 : vector<8x16x8xf32> to vector<1x8x16x8xf32>
    tpu.vector_store %arg8[%c0_64, %c0_65, %c0_66, %c0_67], %56 {strides = array<i32>} : memref<1x8x16x8xf32, #tpu.memory_space<vmem>>, vector<1x8x16x8xf32>,
    %cst_68 = arith.constant dense<0.000000e+00> : vector<8xf32>
    %57 = vector.multi_reduction <add>, %52, %cst_68 [0] : vector<128x8xf32> to vector<8xf32>
    %58 = vector.shape_cast %57 : vector<8xf32> to vector<1x8xf32>
    %cst_69 = arith.constant 7.812500e-03 : f32
    %59 = vector.broadcast %cst_69 : f32 to vector<1x8xf32>
    %60 = arith.mulf %58, %59 : vector<1x8xf32>
    %61 = vector.broadcast %60 : vector<1x8xf32> to vector<128x8xf32>
    %62 = arith.subf %52, %61 : vector<128x8xf32>
    %63 = arith.mulf %62, %62 : vector<128x8xf32>
    %cst_70 = arith.constant dense<0.000000e+00> : vector<8xf32>
    %64 = vector.multi_reduction <add>, %63, %cst_70 [0] : vector<128x8xf32> to vector<8xf32>
    %65 = vector.shape_cast %64 : vector<8xf32> to vector<1x8xf32>
    %66 = vector.shape_cast %58 : vector<1x8xf32> to vector<1x1x1x8xf32>
    %c0_71 = arith.constant 0 : index
    %c0_72 = arith.constant 0 : index
    %c0_73 = arith.constant 0 : index
    %c0_74 = arith.constant 0 : index
    %67 = vector.load %arg9[%c0_71, %c0_72, %c0_73, %c0_74] : memref<1x1x1x8xf32, #tpu.memory_space<vmem>>, vector<1x1x1x8xf32>
    tpu.vector_store %arg9[%c0_71, %c0_72, %c0_73, %c0_74], %66 {strides = array<i32>} : memref<1x1x1x8xf32, #tpu.memory_space<vmem>>, vector<1x1x1x8xf32>,
    %68 = vector.shape_cast %65 : vector<1x8xf32> to vector<1x1x1x8xf32>
    %c0_75 = arith.constant 0 : index
    %c0_76 = arith.constant 0 : index
    %c0_77 = arith.constant 0 : index
    %c0_78 = arith.constant 0 : index
    %69 = vector.load %arg10[%c0_75, %c0_76, %c0_77, %c0_78] : memref<1x1x1x8xf32, #tpu.memory_space<vmem>>, vector<1x1x1x8xf32>
    tpu.vector_store %arg10[%c0_75, %c0_76, %c0_77, %c0_78], %68 {strides = array<i32>} : memref<1x1x1x8xf32, #tpu.memory_space<vmem>>, vector<1x1x1x8xf32>,
    return
  }
  func.func @transform_0(%arg0: i32, %arg1: i32) -> (i32, i32, i32, i32) {
    %c0_i32 = arith.constant 0 : i32
    %c0_i32_0 = arith.constant 0 : i32
    %c0_i32_1 = arith.constant 0 : i32
    return %arg0, %arg1, %c0_i32, %c0_i32_0 : i32, i32, i32, i32
  }
  func.func @transform_1(%arg0: i32, %arg1: i32) -> (i32, i32, i32, i32) {
    %c8_i32 = arith.constant 8 : i32
    %0 = arith.muli %arg1, %c8_i32 : i32
    %c1_i32 = arith.constant 1 : i32
    %1 = arith.subi %0, %c1_i32 : i32
    %c0_i32 = arith.constant 0 : i32
    %2 = arith.maxsi %1, %c0_i32 : i32
    %c0_i32_0 = arith.constant 0 : i32
    %c0_i32_1 = arith.constant 0 : i32
    %c0_i32_2 = arith.constant 0 : i32
    return %arg0, %2, %c0_i32_0, %c0_i32_1 : i32, i32, i32, i32
  }
  func.func @transform_2(%arg0: i32, %arg1: i32) -> (i32, i32, i32, i32) {
    %c8_i32 = arith.constant 8 : i32
    %0 = arith.muli %arg1, %c8_i32 : i32
    %c8_i32_0 = arith.constant 8 : i32
    %1 = arith.addi %0, %c8_i32_0 : i32
    %c15_i32 = arith.constant 15 : i32
    %2 = arith.minsi %1, %c15_i32 : i32
    %c0_i32 = arith.constant 0 : i32
    %c0_i32_1 = arith.constant 0 : i32
    %c0_i32_2 = arith.constant 0 : i32
    return %arg0, %2, %c0_i32, %c0_i32_1 : i32, i32, i32, i32
  }
  func.func @transform_3(%arg0: i32, %arg1: i32) -> (i32, i32) {
    %c0_i32 = arith.constant 0 : i32
    %c0_i32_0 = arith.constant 0 : i32
    %c0_i32_1 = arith.constant 0 : i32
    return %c0_i32, %c0_i32_0 : i32, i32
  }
  func.func @transform_4(%arg0: i32, %arg1: i32) -> (i32, i32, i32) {
    %c0_i32 = arith.constant 0 : i32
    %c0_i32_0 = arith.constant 0 : i32
    %c0_i32_1 = arith.constant 0 : i32
    %c0_i32_2 = arith.constant 0 : i32
    return %c0_i32, %c0_i32_0, %c0_i32_1 : i32, i32, i32
  }
  func.func @transform_5(%arg0: i32, %arg1: i32) -> (i32, i32, i32) {
    %c0_i32 = arith.constant 0 : i32
    %c0_i32_0 = arith.constant 0 : i32
    %c0_i32_1 = arith.constant 0 : i32
    %c0_i32_2 = arith.constant 0 : i32
    return %c0_i32, %c0_i32_0, %c0_i32_1 : i32, i32, i32
  }
  func.func @transform_6(%arg0: i32, %arg1: i32) -> (i32, i32, i32, i32) {
    %c0_i32 = arith.constant 0 : i32
    %c0_i32_0 = arith.constant 0 : i32
    %c0_i32_1 = arith.constant 0 : i32
    return %arg0, %arg1, %c0_i32, %c0_i32_0 : i32, i32, i32, i32
  }
  func.func @transform_7(%arg0: i32, %arg1: i32) -> (i32, i32, i32, i32) {
    %c0_i32 = arith.constant 0 : i32
    %c0_i32_0 = arith.constant 0 : i32
    %c0_i32_1 = arith.constant 0 : i32
    return %arg0, %arg1, %c0_i32, %c0_i32_0 : i32, i32, i32, i32
  }
  func.func @transform_8(%arg0: i32, %arg1: i32) -> (i32, i32, i32, i32) {
    %c0_i32 = arith.constant 0 : i32
    %c0_i32_0 = arith.constant 0 : i32
    %c0_i32_1 = arith.constant 0 : i32
    return %arg0, %arg1, %c0_i32, %c0_i32_0 : i32, i32, i32, i32
  }
}

module attributes {stable_mosaic.version = 11 : i64} {
  func.func @_fused_conv_kernel(%arg0: i32, %arg1: i32, %arg2: memref<1x8x16x8xf32, #tpu.memory_space<vmem>>, %arg3: memref<1x1x16x8xf32, #tpu.memory_space<vmem>>, %arg4: memref<1x1x16x8xf32, #tpu.memory_space<vmem>>, %arg5: memref<72x8xbf16, #tpu.memory_space<vmem>>, %arg6: memref<1x1x8xf32, #tpu.memory_space<vmem>>, %arg7: memref<1x1x8xf32, #tpu.memory_space<vmem>>, %arg8: memref<1x8x16x8xf32, #tpu.memory_space<vmem>>, %arg9: memref<1x1x1x8xf32, #tpu.memory_space<vmem>>, %arg10: memref<1x1x1x8xf32, #tpu.memory_space<vmem>>, %arg11: memref<10x25x8xf32, #tpu.memory_space<vmem>>, %arg12: memref<128x72xf32, #tpu.memory_space<vmem>>) attributes {dimension_semantics = [#tpu.dimension_semantics<parallel>, #tpu.dimension_semantics<parallel>], iteration_bounds = array<i64: 2, 2>, scalar_prefetch = 0 : i64, scratch_operands = 2 : i64, tpu.core_type = #tpu.core_type<tc>, window_params = [{transform_indices = @transform_0, window_bounds = array<i64: 1, 8, 16, 8>}, {transform_indices = @transform_1, window_bounds = array<i64: 1, 1, 16, 8>}, {transform_indices = @transform_2, window_bounds = array<i64: 1, 1, 16, 8>}, {pipeline_mode = #tpu.pipeline_mode<synchronous>, transform_indices = @transform_3, window_bounds = array<i64: 72, 8>}, {pipeline_mode = #tpu.pipeline_mode<synchronous>, transform_indices = @transform_4, window_bounds = array<i64: 1, 1, 8>}, {pipeline_mode = #tpu.pipeline_mode<synchronous>, transform_indices = @transform_5, window_bounds = array<i64: 1, 1, 8>}, {transform_indices = @transform_6, window_bounds = array<i64: 1, 8, 16, 8>}, {transform_indices = @transform_7, window_bounds = array<i64: 1, 1, 1, 8>}, {transform_indices = @transform_8, window_bounds = array<i64: 1, 1, 1, 8>}]} {
    %c0 = arith.constant 0 : index
    %c0_0 = arith.constant 0 : index
    %c0_1 = arith.constant 0 : index
    %c0_2 = arith.constant 0 : index
    %0 = vector.load %arg2[%c0, %c0_0, %c0_1, %c0_2] : memref<1x8x16x8xf32, #tpu.memory_space<vmem>>, vector<1x8x16x8xf32>
    %1 = vector.shape_cast %0 : vector<1x8x16x8xf32> to vector<8x16x8xf32>
    %c0_3 = arith.constant 0 : index
    %c0_4 = arith.constant 0 : index
    %c0_5 = arith.constant 0 : index
    %c0_6 = arith.constant 0 : index
    %2 = vector.load %arg3[%c0_3, %c0_4, %c0_5, %c0_6] : memref<1x1x16x8xf32, #tpu.memory_space<vmem>>, vector<1x1x16x8xf32>
    %3 = vector.shape_cast %2 : vector<1x1x16x8xf32> to vector<1x16x8xf32>
    %c0_7 = arith.constant 0 : index
    %c0_8 = arith.constant 0 : index
    %c0_9 = arith.constant 0 : index
    %c0_10 = arith.constant 0 : index
    %4 = vector.load %arg4[%c0_7, %c0_8, %c0_9, %c0_10] : memref<1x1x16x8xf32, #tpu.memory_space<vmem>>, vector<1x1x16x8xf32>
    %5 = vector.shape_cast %4 : vector<1x1x16x8xf32> to vector<1x16x8xf32>
    %c0_11 = arith.constant 0 : index
    %c0_12 = arith.constant 0 : index
    %c0_13 = arith.constant 0 : index
    %6 = vector.load %arg6[%c0_11, %c0_12, %c0_13] : memref<1x1x8xf32, #tpu.memory_space<vmem>>, vector<1x1x8xf32>
    %c0_14 = arith.constant 0 : index
    %c0_15 = arith.constant 0 : index
    %c0_16 = arith.constant 0 : index
    %7 = vector.load %arg7[%c0_14, %c0_15, %c0_16] : memref<1x1x8xf32, #tpu.memory_space<vmem>>, vector<1x1x8xf32>
    %8 = vector.broadcast %6 : vector<1x1x8xf32> to vector<8x16x8xf32>
    %9 = arith.mulf %1, %8 : vector<8x16x8xf32>
    %10 = vector.broadcast %7 : vector<1x1x8xf32> to vector<8x16x8xf32>
    %11 = arith.addf %9, %10 : vector<8x16x8xf32>
    %cst = arith.constant 0.000000e+00 : f32
    %12 = vector.broadcast %cst : f32 to vector<8x16x8xf32>
    %13 = arith.cmpf oge, %11, %12 : vector<8x16x8xf32>
    %cst_17 = arith.constant 0.00999999977 : f32
    %14 = vector.broadcast %cst_17 : f32 to vector<8x16x8xf32>
    %15 = arith.mulf %14, %11 : vector<8x16x8xf32>
    %16 = arith.select %13, %11, %15 : vector<8x16x8xi1>, vector<8x16x8xf32>
    %17 = vector.broadcast %6 : vector<1x1x8xf32> to vector<1x16x8xf32>
    %18 = arith.mulf %3, %17 : vector<1x16x8xf32>
    %19 = vector.broadcast %7 : vector<1x1x8xf32> to vector<1x16x8xf32>
    %20 = arith.addf %18, %19 : vector<1x16x8xf32>
    %cst_18 = arith.constant 0.000000e+00 : f32
    %21 = vector.broadcast %cst_18 : f32 to vector<1x16x8xf32>
    %22 = arith.cmpf oge, %20, %21 : vector<1x16x8xf32>
    %cst_19 = arith.constant 0.00999999977 : f32
    %23 = vector.broadcast %cst_19 : f32 to vector<1x16x8xf32>
    %24 = arith.mulf %23, %20 : vector<1x16x8xf32>
    %25 = arith.select %22, %20, %24 : vector<1x16x8xi1>, vector<1x16x8xf32>
    %26 = vector.broadcast %6 : vector<1x1x8xf32> to vector<1x16x8xf32>
    %27 = arith.mulf %5, %26 : vector<1x16x8xf32>
    %28 = vector.broadcast %7 : vector<1x1x8xf32> to vector<1x16x8xf32>
    %29 = arith.addf %27, %28 : vector<1x16x8xf32>
    %cst_20 = arith.constant 0.000000e+00 : f32
    %30 = vector.broadcast %cst_20 : f32 to vector<1x16x8xf32>
    %31 = arith.cmpf oge, %29, %30 : vector<1x16x8xf32>
    %cst_21 = arith.constant 0.00999999977 : f32
    %32 = vector.broadcast %cst_21 : f32 to vector<1x16x8xf32>
    %33 = arith.mulf %32, %29 : vector<1x16x8xf32>
    %34 = arith.select %31, %29, %33 : vector<1x16x8xi1>, vector<1x16x8xf32>
    %c0_i32 = arith.constant 0 : i32
    %35 = arith.cmpi sgt, %arg1, %c0_i32 : i32
    %36 = arith.extui %35 : i1 to i32
    %37 = arith.sitofp %36 : i32 to f32
    %38 = vector.broadcast %37 : f32 to vector<1x16x8xf32>
    %39 = arith.mulf %25, %38 : vector<1x16x8xf32>
    %c1_i32 = arith.constant 1 : i32
    %40 = arith.cmpi slt, %arg1, %c1_i32 : i32
    %41 = arith.extui %40 : i1 to i32
    %42 = arith.sitofp %41 : i32 to f32
    %43 = vector.broadcast %42 : f32 to vector<1x16x8xf32>
    %44 = arith.mulf %34, %43 : vector<1x16x8xf32>
    %c0_22 = arith.constant 0 : index
    %c8 = arith.constant 8 : index
    %c0_23 = arith.constant 0 : index
    %45 = vector.load %arg11[%c0_22, %c8, %c0_23] : memref<10x25x8xf32, #tpu.memory_space<vmem>>, vector<1x16x8xf32>
    tpu.vector_store %arg11[%c0_22, %c8, %c0_23], %39 {strides = array<i32>} : memref<10x25x8xf32, #tpu.memory_space<vmem>>, vector<1x16x8xf32>,
    %c1 = arith.constant 1 : index
    %c8_24 = arith.constant 8 : index
    %c0_25 = arith.constant 0 : index
    %46 = vector.load %arg11[%c1, %c8_24, %c0_25] : memref<10x25x8xf32, #tpu.memory_space<vmem>>, vector<8x16x8xf32>
    tpu.vector_store %arg11[%c1, %c8_24, %c0_25], %16 {strides = array<i32>} : memref<10x25x8xf32, #tpu.memory_space<vmem>>, vector<8x16x8xf32>,
    %c9 = arith.constant 9 : index
    %c8_26 = arith.constant 8 : index
    %c0_27 = arith.constant 0 : index
    %47 = vector.load %arg11[%c9, %c8_26, %c0_27] : memref<10x25x8xf32, #tpu.memory_space<vmem>>, vector<1x16x8xf32>
    tpu.vector_store %arg11[%c9, %c8_26, %c0_27], %44 {strides = array<i32>} : memref<10x25x8xf32, #tpu.memory_space<vmem>>, vector<1x16x8xf32>,
    %cst_28 = arith.constant 0.000000e+00 : f32
    %48 = vector.broadcast %cst_28 : f32 to vector<10x1x8xf32>
    %c0_29 = arith.constant 0 : index
    %c7 = arith.constant 7 : index
    %c0_30 = arith.constant 0 : index
    %49 = vector.load %arg11[%c0_29, %c7, %c0_30] : memref<10x25x8xf32, #tpu.memory_space<vmem>>, vector<10x1x8xf32>
    tpu.vector_store %arg11[%c0_29, %c7, %c0_30], %48 {strides = array<i32>} : memref<10x25x8xf32, #tpu.memory_space<vmem>>, vector<10x1x8xf32>,
    %c0_31 = arith.constant 0 : index
    %c24 = arith.constant 24 : index
    %c0_32 = arith.constant 0 : index
    %50 = vector.load %arg11[%c0_31, %c24, %c0_32] : memref<10x25x8xf32, #tpu.memory_space<vmem>>, vector<10x1x8xf32>
    tpu.vector_store %arg11[%c0_31, %c24, %c0_32], %48 {strides = array<i32>} : memref<10x25x8xf32, #tpu.memory_space<vmem>>, vector<10x1x8xf32>,
    %c0_33 = arith.constant 0 : index
    %c7_34 = arith.constant 7 : index
    %c0_35 = arith.constant 0 : index
    %51 = vector.load %arg11[%c0_33, %c7_34, %c0_35] : memref<10x25x8xf32, #tpu.memory_space<vmem>>, vector<8x16x8xf32>
    %52 = vector.shape_cast %51 : vector<8x16x8xf32> to vector<128x8xf32>
    %c0_36 = arith.constant 0 : index
    %c0_37 = arith.constant 0 : index
    %53 = vector.load %arg12[%c0_36, %c0_37] : memref<128x72xf32, #tpu.memory_space<vmem>>, vector<128x8xf32>
    tpu.vector_store %arg12[%c0_36, %c0_37], %52 {strides = array<i32>} : memref<128x72xf32, #tpu.memory_space<vmem>>, vector<128x8xf32>,
    %c0_38 = arith.constant 0 : index
    %c8_39 = arith.constant 8 : index
    %c0_40 = arith.constant 0 : index
    %54 = vector.load %arg11[%c0_38, %c8_39, %c0_40] : memref<10x25x8xf32, #tpu.memory_space<vmem>>, vector<8x16x8xf32>
    %55 = vector.shape_cast %54 : vector<8x16x8xf32> to vector<128x8xf32>
    %c0_41 = arith.constant 0 : index
    %c8_42 = arith.constant 8 : index
    %56 = vector.load %arg12[%c0_41, %c8_42] : memref<128x72xf32, #tpu.memory_space<vmem>>, vector<128x8xf32>
    tpu.vector_store %arg12[%c0_41, %c8_42], %55 {strides = array<i32>} : memref<128x72xf32, #tpu.memory_space<vmem>>, vector<128x8xf32>,
    %c0_43 = arith.constant 0 : index
    %c9_44 = arith.constant 9 : index
    %c0_45 = arith.constant 0 : index
    %57 = vector.load %arg11[%c0_43, %c9_44, %c0_45] : memref<10x25x8xf32, #tpu.memory_space<vmem>>, vector<8x16x8xf32>
    %58 = vector.shape_cast %57 : vector<8x16x8xf32> to vector<128x8xf32>
    %c0_46 = arith.constant 0 : index
    %c16 = arith.constant 16 : index
    %59 = vector.load %arg12[%c0_46, %c16] : memref<128x72xf32, #tpu.memory_space<vmem>>, vector<128x8xf32>
    tpu.vector_store %arg12[%c0_46, %c16], %58 {strides = array<i32>} : memref<128x72xf32, #tpu.memory_space<vmem>>, vector<128x8xf32>,
    %c1_47 = arith.constant 1 : index
    %c7_48 = arith.constant 7 : index
    %c0_49 = arith.constant 0 : index
    %60 = vector.load %arg11[%c1_47, %c7_48, %c0_49] : memref<10x25x8xf32, #tpu.memory_space<vmem>>, vector<8x16x8xf32>
    %61 = vector.shape_cast %60 : vector<8x16x8xf32> to vector<128x8xf32>
    %c0_50 = arith.constant 0 : index
    %c24_51 = arith.constant 24 : index
    %62 = vector.load %arg12[%c0_50, %c24_51] : memref<128x72xf32, #tpu.memory_space<vmem>>, vector<128x8xf32>
    tpu.vector_store %arg12[%c0_50, %c24_51], %61 {strides = array<i32>} : memref<128x72xf32, #tpu.memory_space<vmem>>, vector<128x8xf32>,
    %c1_52 = arith.constant 1 : index
    %c8_53 = arith.constant 8 : index
    %c0_54 = arith.constant 0 : index
    %63 = vector.load %arg11[%c1_52, %c8_53, %c0_54] : memref<10x25x8xf32, #tpu.memory_space<vmem>>, vector<8x16x8xf32>
    %64 = vector.shape_cast %63 : vector<8x16x8xf32> to vector<128x8xf32>
    %c0_55 = arith.constant 0 : index
    %c32 = arith.constant 32 : index
    %65 = vector.load %arg12[%c0_55, %c32] : memref<128x72xf32, #tpu.memory_space<vmem>>, vector<128x8xf32>
    tpu.vector_store %arg12[%c0_55, %c32], %64 {strides = array<i32>} : memref<128x72xf32, #tpu.memory_space<vmem>>, vector<128x8xf32>,
    %c1_56 = arith.constant 1 : index
    %c9_57 = arith.constant 9 : index
    %c0_58 = arith.constant 0 : index
    %66 = vector.load %arg11[%c1_56, %c9_57, %c0_58] : memref<10x25x8xf32, #tpu.memory_space<vmem>>, vector<8x16x8xf32>
    %67 = vector.shape_cast %66 : vector<8x16x8xf32> to vector<128x8xf32>
    %c0_59 = arith.constant 0 : index
    %c40 = arith.constant 40 : index
    %68 = vector.load %arg12[%c0_59, %c40] : memref<128x72xf32, #tpu.memory_space<vmem>>, vector<128x8xf32>
    tpu.vector_store %arg12[%c0_59, %c40], %67 {strides = array<i32>} : memref<128x72xf32, #tpu.memory_space<vmem>>, vector<128x8xf32>,
    %c2 = arith.constant 2 : index
    %c7_60 = arith.constant 7 : index
    %c0_61 = arith.constant 0 : index
    %69 = vector.load %arg11[%c2, %c7_60, %c0_61] : memref<10x25x8xf32, #tpu.memory_space<vmem>>, vector<8x16x8xf32>
    %70 = vector.shape_cast %69 : vector<8x16x8xf32> to vector<128x8xf32>
    %c0_62 = arith.constant 0 : index
    %c48 = arith.constant 48 : index
    %71 = vector.load %arg12[%c0_62, %c48] : memref<128x72xf32, #tpu.memory_space<vmem>>, vector<128x8xf32>
    tpu.vector_store %arg12[%c0_62, %c48], %70 {strides = array<i32>} : memref<128x72xf32, #tpu.memory_space<vmem>>, vector<128x8xf32>,
    %c2_63 = arith.constant 2 : index
    %c8_64 = arith.constant 8 : index
    %c0_65 = arith.constant 0 : index
    %72 = vector.load %arg11[%c2_63, %c8_64, %c0_65] : memref<10x25x8xf32, #tpu.memory_space<vmem>>, vector<8x16x8xf32>
    %73 = vector.shape_cast %72 : vector<8x16x8xf32> to vector<128x8xf32>
    %c0_66 = arith.constant 0 : index
    %c56 = arith.constant 56 : index
    %74 = vector.load %arg12[%c0_66, %c56] : memref<128x72xf32, #tpu.memory_space<vmem>>, vector<128x8xf32>
    tpu.vector_store %arg12[%c0_66, %c56], %73 {strides = array<i32>} : memref<128x72xf32, #tpu.memory_space<vmem>>, vector<128x8xf32>,
    %c2_67 = arith.constant 2 : index
    %c9_68 = arith.constant 9 : index
    %c0_69 = arith.constant 0 : index
    %75 = vector.load %arg11[%c2_67, %c9_68, %c0_69] : memref<10x25x8xf32, #tpu.memory_space<vmem>>, vector<8x16x8xf32>
    %76 = vector.shape_cast %75 : vector<8x16x8xf32> to vector<128x8xf32>
    %c0_70 = arith.constant 0 : index
    %c64 = arith.constant 64 : index
    %77 = vector.load %arg12[%c0_70, %c64] : memref<128x72xf32, #tpu.memory_space<vmem>>, vector<128x8xf32>
    tpu.vector_store %arg12[%c0_70, %c64], %76 {strides = array<i32>} : memref<128x72xf32, #tpu.memory_space<vmem>>, vector<128x8xf32>,
    %c0_71 = arith.constant 0 : index
    %c0_72 = arith.constant 0 : index
    %78 = vector.load %arg12[%c0_71, %c0_72] : memref<128x72xf32, #tpu.memory_space<vmem>>, vector<128x72xf32>
    %79 = arith.truncf %78 : vector<128x72xf32> to vector<128x72xbf16>
    %c0_73 = arith.constant 0 : index
    %c0_74 = arith.constant 0 : index
    %80 = vector.load %arg5[%c0_73, %c0_74] : memref<72x8xbf16, #tpu.memory_space<vmem>>, vector<72x8xbf16>
    %cst_75 = arith.constant dense<0.000000e+00> : vector<128x8xf32>
    %81 = tpu.matmul %79, %80, %cst_75 {dimension_numbers = #tpu.dot_dimension_numbers<[1], [0], [0], [1], [0, 0, 1, 1], [], []>} : vector<128x72xbf16>, vector<72x8xbf16>, vector<128x8xf32> -> vector<128x8xf32>
    %82 = vector.shape_cast %81 : vector<128x8xf32> to vector<8x16x8xf32>
    %c0_76 = arith.constant 0 : index
    %c0_77 = arith.constant 0 : index
    %c0_78 = arith.constant 0 : index
    %c0_79 = arith.constant 0 : index
    %83 = vector.load %arg8[%c0_76, %c0_77, %c0_78, %c0_79] : memref<1x8x16x8xf32, #tpu.memory_space<vmem>>, vector<1x8x16x8xf32>
    %84 = vector.shape_cast %83 : vector<1x8x16x8xf32> to vector<8x16x8xf32>
    %85 = vector.shape_cast %82 : vector<8x16x8xf32> to vector<1x8x16x8xf32>
    tpu.vector_store %arg8[%c0_76, %c0_77, %c0_78, %c0_79], %85 {strides = array<i32>} : memref<1x8x16x8xf32, #tpu.memory_space<vmem>>, vector<1x8x16x8xf32>,
    %cst_80 = arith.constant dense<0.000000e+00> : vector<8xf32>
    %86 = vector.multi_reduction <add>, %81, %cst_80 [0] : vector<128x8xf32> to vector<8xf32>
    %87 = vector.shape_cast %86 : vector<8xf32> to vector<1x8xf32>
    %cst_81 = arith.constant 7.812500e-03 : f32
    %88 = vector.broadcast %cst_81 : f32 to vector<1x8xf32>
    %89 = arith.mulf %87, %88 : vector<1x8xf32>
    %90 = vector.broadcast %89 : vector<1x8xf32> to vector<128x8xf32>
    %91 = arith.subf %81, %90 : vector<128x8xf32>
    %92 = arith.mulf %91, %91 : vector<128x8xf32>
    %cst_82 = arith.constant dense<0.000000e+00> : vector<8xf32>
    %93 = vector.multi_reduction <add>, %92, %cst_82 [0] : vector<128x8xf32> to vector<8xf32>
    %94 = vector.shape_cast %93 : vector<8xf32> to vector<1x8xf32>
    %95 = vector.shape_cast %87 : vector<1x8xf32> to vector<1x1x1x8xf32>
    %c0_83 = arith.constant 0 : index
    %c0_84 = arith.constant 0 : index
    %c0_85 = arith.constant 0 : index
    %c0_86 = arith.constant 0 : index
    %96 = vector.load %arg9[%c0_83, %c0_84, %c0_85, %c0_86] : memref<1x1x1x8xf32, #tpu.memory_space<vmem>>, vector<1x1x1x8xf32>
    tpu.vector_store %arg9[%c0_83, %c0_84, %c0_85, %c0_86], %95 {strides = array<i32>} : memref<1x1x1x8xf32, #tpu.memory_space<vmem>>, vector<1x1x1x8xf32>,
    %97 = vector.shape_cast %94 : vector<1x8xf32> to vector<1x1x1x8xf32>
    %c0_87 = arith.constant 0 : index
    %c0_88 = arith.constant 0 : index
    %c0_89 = arith.constant 0 : index
    %c0_90 = arith.constant 0 : index
    %98 = vector.load %arg10[%c0_87, %c0_88, %c0_89, %c0_90] : memref<1x1x1x8xf32, #tpu.memory_space<vmem>>, vector<1x1x1x8xf32>
    tpu.vector_store %arg10[%c0_87, %c0_88, %c0_89, %c0_90], %97 {strides = array<i32>} : memref<1x1x1x8xf32, #tpu.memory_space<vmem>>, vector<1x1x1x8xf32>,
    return
  }
  func.func @transform_0(%arg0: i32, %arg1: i32) -> (i32, i32, i32, i32) {
    %c0_i32 = arith.constant 0 : i32
    %c0_i32_0 = arith.constant 0 : i32
    %c0_i32_1 = arith.constant 0 : i32
    return %arg0, %arg1, %c0_i32, %c0_i32_0 : i32, i32, i32, i32
  }
  func.func @transform_1(%arg0: i32, %arg1: i32) -> (i32, i32, i32, i32) {
    %c8_i32 = arith.constant 8 : i32
    %0 = arith.muli %arg1, %c8_i32 : i32
    %c1_i32 = arith.constant 1 : i32
    %1 = arith.subi %0, %c1_i32 : i32
    %c0_i32 = arith.constant 0 : i32
    %2 = arith.maxsi %1, %c0_i32 : i32
    %c0_i32_0 = arith.constant 0 : i32
    %c0_i32_1 = arith.constant 0 : i32
    %c0_i32_2 = arith.constant 0 : i32
    return %arg0, %2, %c0_i32_0, %c0_i32_1 : i32, i32, i32, i32
  }
  func.func @transform_2(%arg0: i32, %arg1: i32) -> (i32, i32, i32, i32) {
    %c8_i32 = arith.constant 8 : i32
    %0 = arith.muli %arg1, %c8_i32 : i32
    %c8_i32_0 = arith.constant 8 : i32
    %1 = arith.addi %0, %c8_i32_0 : i32
    %c15_i32 = arith.constant 15 : i32
    %2 = arith.minsi %1, %c15_i32 : i32
    %c0_i32 = arith.constant 0 : i32
    %c0_i32_1 = arith.constant 0 : i32
    %c0_i32_2 = arith.constant 0 : i32
    return %arg0, %2, %c0_i32, %c0_i32_1 : i32, i32, i32, i32
  }
  func.func @transform_3(%arg0: i32, %arg1: i32) -> (i32, i32) {
    %c0_i32 = arith.constant 0 : i32
    %c0_i32_0 = arith.constant 0 : i32
    %c0_i32_1 = arith.constant 0 : i32
    return %c0_i32, %c0_i32_0 : i32, i32
  }
  func.func @transform_4(%arg0: i32, %arg1: i32) -> (i32, i32, i32) {
    %c0_i32 = arith.constant 0 : i32
    %c0_i32_0 = arith.constant 0 : i32
    %c0_i32_1 = arith.constant 0 : i32
    %c0_i32_2 = arith.constant 0 : i32
    return %c0_i32, %c0_i32_0, %c0_i32_1 : i32, i32, i32
  }
  func.func @transform_5(%arg0: i32, %arg1: i32) -> (i32, i32, i32) {
    %c0_i32 = arith.constant 0 : i32
    %c0_i32_0 = arith.constant 0 : i32
    %c0_i32_1 = arith.constant 0 : i32
    %c0_i32_2 = arith.constant 0 : i32
    return %c0_i32, %c0_i32_0, %c0_i32_1 : i32, i32, i32
  }
  func.func @transform_6(%arg0: i32, %arg1: i32) -> (i32, i32, i32, i32) {
    %c0_i32 = arith.constant 0 : i32
    %c0_i32_0 = arith.constant 0 : i32
    %c0_i32_1 = arith.constant 0 : i32
    return %arg0, %arg1, %c0_i32, %c0_i32_0 : i32, i32, i32, i32
  }
  func.func @transform_7(%arg0: i32, %arg1: i32) -> (i32, i32, i32, i32) {
    %c0_i32 = arith.constant 0 : i32
    %c0_i32_0 = arith.constant 0 : i32
    %c0_i32_1 = arith.constant 0 : i32
    return %arg0, %arg1, %c0_i32, %c0_i32_0 : i32, i32, i32, i32
  }
  func.func @transform_8(%arg0: i32, %arg1: i32) -> (i32, i32, i32, i32) {
    %c0_i32 = arith.constant 0 : i32
    %c0_i32_0 = arith.constant 0 : i32
    %c0_i32_1 = arith.constant 0 : i32
    return %arg0, %arg1, %c0_i32, %c0_i32_0 : i32, i32, i32, i32
  }
}

module attributes {stable_mosaic.version = 11 : i64} {
  func.func @_bn_act_kernel(%arg0: i32, %arg1: i32, %arg2: memref<1x16x16x8xf32, #tpu.memory_space<vmem>>, %arg3: memref<1x1x1x8xf32, #tpu.memory_space<vmem>>, %arg4: memref<1x1x1x8xf32, #tpu.memory_space<vmem>>, %arg5: memref<1x16x16x8xf32, #tpu.memory_space<vmem>>) attributes {dimension_semantics = [#tpu.dimension_semantics<parallel>, #tpu.dimension_semantics<parallel>], iteration_bounds = array<i64: 2, 1>, scalar_prefetch = 0 : i64, scratch_operands = 0 : i64, tpu.core_type = #tpu.core_type<tc>, window_params = [{transform_indices = @transform_0, window_bounds = array<i64: 1, 16, 16, 8>}, {pipeline_mode = #tpu.pipeline_mode<synchronous>, transform_indices = @transform_1, window_bounds = array<i64: 1, 1, 1, 8>}, {pipeline_mode = #tpu.pipeline_mode<synchronous>, transform_indices = @transform_2, window_bounds = array<i64: 1, 1, 1, 8>}, {transform_indices = @transform_3, window_bounds = array<i64: 1, 16, 16, 8>}]} {
    %c0 = arith.constant 0 : index
    %c0_0 = arith.constant 0 : index
    %c0_1 = arith.constant 0 : index
    %c0_2 = arith.constant 0 : index
    %0 = vector.load %arg2[%c0, %c0_0, %c0_1, %c0_2] : memref<1x16x16x8xf32, #tpu.memory_space<vmem>>, vector<1x16x16x8xf32>
    %c0_3 = arith.constant 0 : index
    %c0_4 = arith.constant 0 : index
    %c0_5 = arith.constant 0 : index
    %c0_6 = arith.constant 0 : index
    %1 = vector.load %arg3[%c0_3, %c0_4, %c0_5, %c0_6] : memref<1x1x1x8xf32, #tpu.memory_space<vmem>>, vector<1x1x1x8xf32>
    %2 = vector.broadcast %1 : vector<1x1x1x8xf32> to vector<1x16x16x8xf32>
    %3 = arith.mulf %0, %2 : vector<1x16x16x8xf32>
    %c0_7 = arith.constant 0 : index
    %c0_8 = arith.constant 0 : index
    %c0_9 = arith.constant 0 : index
    %c0_10 = arith.constant 0 : index
    %4 = vector.load %arg4[%c0_7, %c0_8, %c0_9, %c0_10] : memref<1x1x1x8xf32, #tpu.memory_space<vmem>>, vector<1x1x1x8xf32>
    %5 = vector.broadcast %4 : vector<1x1x1x8xf32> to vector<1x16x16x8xf32>
    %6 = arith.addf %3, %5 : vector<1x16x16x8xf32>
    %cst = arith.constant 0.000000e+00 : f32
    %7 = vector.broadcast %cst : f32 to vector<1x16x16x8xf32>
    %8 = arith.cmpf oge, %6, %7 : vector<1x16x16x8xf32>
    %cst_11 = arith.constant 0.00999999977 : f32
    %9 = vector.broadcast %cst_11 : f32 to vector<1x16x16x8xf32>
    %10 = arith.mulf %9, %6 : vector<1x16x16x8xf32>
    %11 = arith.select %8, %6, %10 : vector<1x16x16x8xi1>, vector<1x16x16x8xf32>
    %c0_12 = arith.constant 0 : index
    %c0_13 = arith.constant 0 : index
    %c0_14 = arith.constant 0 : index
    %c0_15 = arith.constant 0 : index
    %12 = vector.load %arg5[%c0_12, %c0_13, %c0_14, %c0_15] : memref<1x16x16x8xf32, #tpu.memory_space<vmem>>, vector<1x16x16x8xf32>
    tpu.vector_store %arg5[%c0_12, %c0_13, %c0_14, %c0_15], %11 {strides = array<i32>} : memref<1x16x16x8xf32, #tpu.memory_space<vmem>>, vector<1x16x16x8xf32>,
    return
  }
  func.func @transform_0(%arg0: i32, %arg1: i32) -> (i32, i32, i32, i32) {
    %c0_i32 = arith.constant 0 : i32
    %c0_i32_0 = arith.constant 0 : i32
    %c0_i32_1 = arith.constant 0 : i32
    return %arg0, %arg1, %c0_i32, %c0_i32_0 : i32, i32, i32, i32
  }
  func.func @transform_1(%arg0: i32, %arg1: i32) -> (i32, i32, i32, i32) {
    %c0_i32 = arith.constant 0 : i32
    %c0_i32_0 = arith.constant 0 : i32
    %c0_i32_1 = arith.constant 0 : i32
    %c0_i32_2 = arith.constant 0 : i32
    %c0_i32_3 = arith.constant 0 : i32
    return %c0_i32, %c0_i32_0, %c0_i32_1, %c0_i32_2 : i32, i32, i32, i32
  }
  func.func @transform_2(%arg0: i32, %arg1: i32) -> (i32, i32, i32, i32) {
    %c0_i32 = arith.constant 0 : i32
    %c0_i32_0 = arith.constant 0 : i32
    %c0_i32_1 = arith.constant 0 : i32
    %c0_i32_2 = arith.constant 0 : i32
    %c0_i32_3 = arith.constant 0 : i32
    return %c0_i32, %c0_i32_0, %c0_i32_1, %c0_i32_2 : i32, i32, i32, i32
  }
  func.func @transform_3(%arg0: i32, %arg1: i32) -> (i32, i32, i32, i32) {
    %c0_i32 = arith.constant 0 : i32
    %c0_i32_0 = arith.constant 0 : i32
    %c0_i32_1 = arith.constant 0 : i32
    return %arg0, %arg1, %c0_i32, %c0_i32_0 : i32, i32, i32, i32
  }
}

</mosaic_0001>

<bundles_post_ra>
// kernel: double_conv_forward.5
= control target key start
LH: loop header
LB: loop body
LE: loop exit
PB: predicated region body
PF: predicated region fallthrough
CT: control target
= control target key end

     0   :  { %8 = vsyncpa [#allocation3], 0  ;;  %s1334_s0 = inlined_call_operand.hbm [shape: f32[2,16,16,8], index: 0, kind: input, shape index: {}]   ;;  %s1335_s1 = inlined_call_operand.hbm [shape: f32[1,1,1,8], index: 1, kind: input, shape index: {}]   ;;  %s1336_s2 = inlined_call_operand.hbm [shape: f32[1,1,1,8], index: 2, kind: input, shape index: {}]   ;;  %s1337_s3 = inlined_call_operand.hbm [shape: f32[2,16,16,8], index: 3, kind: output, shape index: {}]  }
   0x1   :  { %10 = vsyncpa [#allocation3 + $0x1], 0 }
   0x2   :  { %11 = vsyncpa [#allocation6], 0 }
   0x3   :  { %12 = vsyncpa [#allocation4], 0 }
   0x4   :  { %14 = vsyncpa [#allocation4 + $0x1], 0  ;;  %s909_s12 = smov 0   ;;  %s911_s13 = smov 0  }
   0x5   :  { %s913_s14 = smov 0   ;;  %s915_s15 = smov 0  }
   0x6   :  { %s917_s16 = smov 0   ;;  %s919_s17 = smov 0  }
   0x7 LB: > { %s597_s18 = sadd.s32 4294967295, %s879_s17   ;;  %s598_s19 = sadd.s32 4294967294, %s879_s17   ;;  %s879_s17 = sphi %s919_s17, %s20_s17   ;;  %s875_s16 = sphi %s917_s16, %s1363_s16   ;;  %s871_s15 = sphi %s915_s15, %s1362_s15   ;;  %s867_s14 = sphi %s913_s14, %s1361_s14   ;;  %s863_s13 = sphi %s911_s13, %s1360_s13   ;;  %s859_s12 = sphi %s909_s12, %s1359_s12  }
   0x8   : > { %s41_s20 = sadd.s32 1, %s867_s14  ;;  %p48_p0 = scmp.ne.s32.totalorder %s867_s14, %s863_s13 }
   0x9   : > { %p49_p1 = scmp.eq.s32.totalorder %s879_s17, 0  ;;  %p54_p2 = scmp.ne.s32.totalorder %s863_s13, %s859_s12 }
   0xa   : > { %p947_p3 = scmp.eq.s32.totalorder %s597_s18, 0  ;;  %p122_p4 = scmp.eq.s32.totalorder %s597_s18, 1 }
   0xb   : > { %p951_p5 = por %p49_p1, %p48_p0  ;;  %p128_p6 = scmp.eq.s32.totalorder %s598_s19, 1 }
   0xc   : > { %s1344_s21 = scalar_select %p947_p3, 1, 0 }
   0xd   : > { %p957_p7 = por %p947_p3, %p54_p2  ;;  %p961_p8 = por %p122_p4, %p48_p0 }
   0xe   : > { %p965_p9 = por %p128_p6, %p54_p2  ;;  %p599_p10 = scmp.ge.s32.totalorder %s879_s17, 1 }
   0xf   : > { %s1346_s23 = scalar_select %p957_p7, 1, 0 }
  0x10   : > { %s1347_s24 = scalar_select %p961_p8, 1, 0 }
  0x11   : > { %s1348_s25 = scalar_select %p965_p9, 1, 0 }
  0x12   : > { %p135_p11 = scmp.lt.s32.totalorder %s879_s17, 3  ;;  %s881_s27 = smov [#allocation5]  }
  0x13   : > { %s148_s28 = sshll.u32 %s881_s27, 4  ;;  %p649_p1 = scmp.lt.s32.totalorder %s879_s17, 2  ;;  %s149_s28 = int_to_ptr.vmem [resolvable:$true] %s148_s28 }
  0x14   : > { %p972_p13 = pnand %p599_p10, %p135_p11  ;;  %s882_s30 = smov [#allocation7]  }
  0x15   : > { %p981_p4 = pnand %p649_p1, %p951_p5  ;;  %s159_s4 = sshll.u32 %s882_s30, 4  ;;  %s991_s4 = int_to_ptr.vmem [resolvable:$true] %s159_s4 }
  0x16   : > { %s1349_s26 = scalar_select %p972_p13, 1, 0 }
  0x17   : > { %p632_p0 = pneg %p972_p13  ;;  %s707_s8 = scalar_lea.hbm %s1335_s1, 16 }
  0x18   : > { %s1350_s29 = scalar_select %p981_p4, 1, 0 }
  0x19   : > { %p987_p2 = pnand %p632_p0, %p947_p3  ;;  %p708_p5 = scmp.ne.s32.totalorder %s1335_s1, %s707_s8 }
  0x1a   : > { %p714_p1 = scmp.lt.u32.totalorder %s707_s8, %s1335_s1 }
  0x1b   : > { %p709_p6 = pneg %p987_p2 }
  0x1d   : > { %p710_p10 = pnand %p709_p6, %p708_p5 }
  0x1f   : > { %p711_p11 = pneg %p710_p10 }
  0x21   : > { %p716_p0 = pnand %p714_p1, %p711_p11 }
  0x23   : > { %719 = shalt.err (!%p716_p0)
}
  0x24   : > { %s720_s19 = scalar_lea.vmem %s149_s28, 16  ;;  %s727_s22 = scalar_lea.vmem %s149_s28, 32 }
  0x25   : > { %p721_p12 = scmp.ne.s32.totalorder %s149_s28, %s720_s19  ;;  %p728_p3 = scmp.lt.s32.totalorder %s149_s28, %s149_s28 }
  0x26   : > { %p729_p7 = scmp.lt.s32.totalorder %s727_s22, %s720_s19 }
  0x27   : > { %p723_p9 = pnand %p721_p12, %p709_p6 }
  0x28   : > { %p730_p13 = por %p729_p7, %p728_p3 }
  0x29   : > { %p724_p8 = pneg %p723_p9 }
  0x2b   : > { %p731_p4 = pnand %p730_p13, %p724_p8 }
  0x2d   : > { %734 = shalt.err (!%p731_p4)
}
  0x2e   : > { %635 = dma.hbm_to_vmem [thread:$0]  (!%p987_p2), %s1335_s1, 16, %s149_s28, [#allocation6]  }
  0x2f   : > { %s735_s8 = scalar_lea.hbm %s1336_s2, 16 }
  0x30   : > { %p736_p9 = scmp.ne.s32.totalorder %s1336_s2, %s735_s8  ;;  %p742_p8 = scmp.lt.u32.totalorder %s735_s8, %s1336_s2 }
  0x32   : > { %p738_p3 = pnand %p736_p9, %p709_p6 }
  0x34   : > { %p739_p7 = pneg %p738_p3 }
  0x36   : > { %p744_p12 = pnand %p742_p8, %p739_p7 }
  0x38   : > { %747 = shalt.err (!%p744_p12)
}
  0x39   : > { %s748_s28 = scalar_lea.vmem %s991_s4, 16  ;;  %s755_s19 = scalar_lea.vmem %s991_s4, 32 }
  0x3a   : > { %p749_p13 = scmp.ne.s32.totalorder %s991_s4, %s748_s28  ;;  %p756_p10 = scmp.lt.s32.totalorder %s991_s4, %s991_s4 }
  0x3b   : > { %p757_p11 = scmp.lt.s32.totalorder %s755_s19, %s748_s28 }
  0x3c   : > { %p751_p4 = pnand %p749_p13, %p709_p6 }
  0x3d   : > { %p758_p1 = por %p757_p11, %p756_p10 }
  0x3e   : > { %p752_p5 = pneg %p751_p4 }
  0x40   : > { %p759_p0 = pnand %p758_p1, %p752_p5 }
  0x42   : > { %762 = shalt.err (!%p759_p0)
}
  0x43   : > { %638 = dma.hbm_to_vmem [thread:$0]  (!%p987_p2), %s1336_s2, 16, %s991_s4, [#allocation6]  }
  0x44   : > { %s32_s30 = sadd.s32 1, %s875_s16  ;;  %s170_s6 = sand.u32 1, %s867_s14  }
  0x45   : > { %p34_p6 = scmp.ge.s32.totalorder %s32_s30, 2  ;;  %s603_s7 = sshll.u32 %s170_s6, 8 }
  0x46   : > { %s618_s8 = sshll.u32 %s875_s16, 12  ;;  %s174_s4 = scalar_lea.vmem [#allocation2], %s603_s7 }
  0x47   : > { %s1365_s30 = smov (%p34_p6, %s32_s30), 0  ;;  %s1049_s10 = scalar_lea.hbm %s1334_s0, %s618_s8 }
  0x48   : > { %s36_s11 = ssub.s32 %s875_s16, %s1365_s30  ;;  %s184_s18 = sshll.u32 %s174_s4, 4  ;;  %s1053_s18 = int_to_ptr.vmem [resolvable:$true] %s184_s18 }
  0x49   : > { %p39_p2 = scmp.eq.s32.totalorder %s36_s11, 0  ;;  %s1060_s19 = scalar_lea.sflag [#allocation3], %s170_s6 }
  0x4a   : > { %s763_s22 = scalar_lea.hbm %s1049_s10, 4096  ;;  %p1352_p3 = scmp.ne.s32.totalorder %s1350_s29, 0 }
  0x4b   : > { %s1058_s28 = scalar_select %p39_p2, %s867_s14, %s41_s20  }
  0x4c   : > { %p764_p9 = scmp.ne.s32.totalorder %s1049_s10, %s763_s22  ;;  %p765_p7 = pneg %p1352_p3 }
  0x4d   : > { %s768_s7 = scalar_lea.hbm %s1334_s0, 8192  ;;  %p769_p13 = scmp.lt.u32.totalorder %s1049_s10, %s1334_s0 }
  0x4e   : > { %p766_p8 = pnand %p765_p7, %p764_p9  ;;  %p770_p4 = scmp.lt.u32.totalorder %s768_s7, %s763_s22 }
  0x4f   : > { %p772_p10 = scmp.lt.u32.totalorder %s763_s22, %s1049_s10 }
  0x50   : > { %p767_p12 = pneg %p766_p8  ;;  %p771_p5 = por %p770_p4, %p769_p13 }
  0x52   : > { %p773_p11 = por %p772_p10, %p771_p5 }
  0x54   : > { %p774_p1 = pnand %p773_p11, %p767_p12 }
  0x56   : > { %777 = shalt.err (!%p774_p1)
}
  0x57   : > { %s778_s20 = scalar_lea.vmem %s1053_s18, 4096  ;;  %s883_s6 = smov [#allocation2]  }
  0x58   : > { %p779_p0 = scmp.ne.s32.totalorder %s1053_s18, %s778_s20  ;;  %s783_s11 = sshll.u32 %s883_s6, 4  ;;  %s784_s11 = int_to_ptr.vmem [resolvable:$false] %s783_s11 }
  0x59   : > { %s785_s4 = scalar_lea.vmem %s784_s11, 8192  ;;  %p786_p9 = scmp.lt.s32.totalorder %s1053_s18, %s784_s11 }
  0x5a   : > { %p781_p6 = pnand %p779_p0, %p765_p7  ;;  %p787_p8 = scmp.lt.s32.totalorder %s785_s4, %s778_s20 }
  0x5c   : > { %p782_p2 = pneg %p781_p6  ;;  %p788_p13 = por %p787_p8, %p786_p9 }
  0x5e   : > { %p789_p4 = pnand %p788_p13, %p782_p2 }
  0x60   : > { %792 = shalt.err (!%p789_p4)
}
  0x61   : > { %s884_s22 = smov 128   ;;  %s885_s27 = smov 8  }
  0x62   : > { %642 = dma.hbm_to_vmem [thread:$0]  (!%p1352_p3), %s1049_s10, 4096, %s1053_s18, %s1060_s19, %s884_s22, %s884_s22, %s885_s27  }
  0x63   : > { %p1353_p7 = scmp.ne.s32.totalorder %s1349_s26, 0 }
  0x64   : > { %s1091_s8 = sand.u32 (!%p1353_p7), 1, %s863_s13   ;;  %p1354_p12 = scmp.ne.s32.totalorder (!%p1353_p7), %s1346_s23, 0 }
  0x65   : > { %196 = sbr.rel (%p1353_p7) target bundleno = 173 (0xad), region = 32  ;;  %s607_s7 = sshll.u32 (!%p1353_p7), %s1091_s8, 8 }
  0x66   : > { %s199_s5 = scalar_lea.sflag (!%p1353_p7), [#allocation3], %s1091_s8  ;;  %s1097_s9 = scalar_lea.vmem (!%p1353_p7), [#allocation2], %s607_s7 }
  0x6c   : > { %846 = dma.done.wait (%p1354_p12), %s199_s5, 4096  }
  0x6d   : > { %848 = vsyncadd (%p1354_p12), %s199_s5, 4294963200  ;;  %p1355_p3 = scmp.ne.s32.totalorder %s1344_s21, 0 }
  0x6f   : > { %850 = dma.done.wait (%p1355_p3), [#allocation6], 32  }
  0x70   : > { %852 = vsyncadd (%p1355_p3), [#allocation6], 4294967264  ;;  %v235_v0 = vld [vmem:[%s1097_s9] sm:$0xff]  ;;  %v236_v4 = vld [vmem:[%s1097_s9 + $0x8] sm:$0xff]  ;;  %vm441_vm0 = vcmask 64512   ;;  %s1138_s21 = scalar_lea.vmem [#allocation8], %s607_s7 }
  0x71   : > { %v1108_v1 = vld [vmem:[#allocation5] ss:$0 sm:$0xff]  ;;  %v1110_v2 = vld [vmem:[#allocation7] ss:$0 sm:$0xff]  ;;  %v237_v5 = vld [vmem:[%s1097_s9 + $0x10] sm:$0xff]  ;;  %s619_s23 = sshll.u32 %s871_s15, 12 }
  0x72   : > { %v274_v3 = vmul.f32 %v1108_v1, %v235_v0  ;;  %v238_v6 = vld [vmem:[%s1097_s9 + $0x18] sm:$0xff]  ;;  %v275_v7 = vmul.f32 %v1108_v1, %v236_v4  ;;  %v276_v8 = vmul.f32 %v1108_v1, %v237_v5  ;;  %v239_v10 = vld [vmem:[%s1097_s9 + $0x20] sm:$0xff]  ;;  %v240_v11 = vld [vmem:[%s1097_s9 + $0x28] sm:$0xff]  ;;  %s491_s26 = sshll.u32 %s1138_s21, 4  ;;  %s1279_s18 = scalar_lea.hbm %s1337_s3, %s619_s23  ;;  %s1281_s26 = int_to_ptr.vmem [resolvable:$true] %s491_s26 }
  0x73   : > { %v277_v9 = vmul.f32 %v1108_v1, %v238_v6  ;;  %v241_v12 = vld [vmem:[%s1097_s9 + $0x30] sm:$0xff]  ;;  %v278_v14 = vmul.f32 %v1108_v1, %v239_v10  ;;  %v279_v15 = vmul.f32 %v1108_v1, %v240_v11  ;;  %v242_v17 = vld [vmem:[%s1097_s9 + $0x38] sm:$0xff]  ;;  %v243_v25 = vld [vmem:[%s1097_s9 + $0x40] sm:$0xff]  ;;  %s475_s15 = scalar_lea.sflag [#allocation4], %s1091_s8  ;;  %s793_s19 = scalar_lea.vmem %s1281_s26, 4096 }
  0x74   : > { %v313_v13 = vadd.f32 %v1110_v2, %v274_v3  ;;  %v280_v16 = vmul.f32 %v1108_v1, %v241_v12  ;;  %v314_v18 = vadd.f32 %v1110_v2, %v275_v7  ;;  %v315_v19 = vadd.f32 %v1110_v2, %v276_v8  ;;  %v244_v30 = vld [vmem:[%s1097_s9 + $0x48] sm:$0xff]  ;;  %v245_v31 = vld [vmem:[%s1097_s9 + $0x50] sm:$0xff]  ;;  %v246_v43 = vld [vmem:[%s1097_s9 + $0x58] sm:$0xff]  ;;  %p794_p5 = scmp.ne.s32.totalorder %s1281_s26, %s793_s19  ;;  %p1356_p10 = scmp.ne.s32.totalorder %s1347_s24, 0 }
  0x75   : > { %v316_v20 = vadd.f32 %v1110_v2, %v277_v9  ;;  %v281_v21 = vmul.f32 %v1108_v1, %v242_v17  ;;  %v317_v23 = vadd.f32 %v1110_v2, %v278_v14  ;;  %v318_v24 = vadd.f32 %v1110_v2, %v279_v15  ;;  %v247_v44 = vld [vmem:[%s1097_s9 + $0x60] sm:$0xff]  ;;  %v248_v45 = vld [vmem:[%s1097_s9 + $0x68] sm:$0xff]  ;;  %v249_v56 = vld [vmem:[%s1097_s9 + $0x70] sm:$0xff]  ;;  %s886_s20 = smov [#allocation8]  }
  0x76   : > { %vm345_vm1 = vcmp.ge.f32.partialorder %v313_v13, 0.0  ;;  %v377_v22 = vmul.f32 0.01, %v313_v13  ;;  %vm346_vm2 = vcmp.ge.f32.partialorder %v314_v18, 0.0  ;;  %v378_v26 = vmul.f32 0.01, %v314_v18  ;;  %p795_p11 = pnand %p794_p5, %p1356_p10 }
  0x77   : > { %vm347_vm3 = vcmp.ge.f32.partialorder %v315_v19, 0.0  ;;  %v379_v27 = vmul.f32 0.01, %v315_v19  ;;  %vm348_vm4 = vcmp.ge.f32.partialorder %v316_v20, 0.0  ;;  %v380_v29 = vmul.f32 0.01, %v316_v20 }
  0x78   : > { %v409_v28 = vsel %vm345_vm1, %v313_v13, %v377_v22  ;;  %vm349_vm5 = vcmp.ge.f32.partialorder %v317_v23, 0.0  ;;  %v410_v32 = vsel %vm346_vm2, %v314_v18, %v378_v26  ;;  %v381_v34 = vmul.f32 0.01, %v317_v23  ;;  %v250_v4 = vld [vmem:[%s1097_s9 + $0x78] sm:$0xff]  ;;  %v251_v5 = vld [vmem:[%s1097_s9 + $0x80] sm:$0xff]  ;;  %v252_v9 = vld [vmem:[%s1097_s9 + $0x88] sm:$0xff]  ;;  %p796_p1 = pneg %p795_p11 }
  0x79   : > { %442 = vst.msk [vmem:[%s1138_s21] sm:$0xff] %vm441_vm0, %v409_v28  ;;  %v411_v33 = vsel %vm347_vm3, %v315_v19, %v379_v27  ;;  %vm350_vm6 = vcmp.ge.f32.partialorder %v318_v24, 0.0  ;;  %443 = vst.msk [vmem:[%s1138_s21 + $0x8] sm:$0xff] %vm441_vm0, %v410_v32  ;;  %v412_v35 = vsel %vm348_vm4, %v316_v20, %v380_v29  ;;  %v382_v36 = vmul.f32 0.01, %v318_v24  ;;  %v253_v10 = vld [vmem:[%s1097_s9 + $0x90] sm:$0xff] }
  0x7a   : > { %444 = vst.msk [vmem:[%s1138_s21 + $0x10] sm:$0xff] %vm441_vm0, %v411_v33  ;;  %v319_v37 = vadd.f32 %v1110_v2, %v280_v16  ;;  %v320_v38 = vadd.f32 %v1110_v2, %v281_v21  ;;  %445 = vst.msk [vmem:[%s1138_s21 + $0x18] sm:$0xff] %vm441_vm0, %v412_v35  ;;  %v413_v39 = vsel %vm349_vm5, %v317_v23, %v381_v34  ;;  %v254_v17 = vld [vmem:[%s1097_s9 + $0x98] sm:$0xff]  ;;  %v255_v18 = vld [vmem:[%s1097_s9 + $0xa0] sm:$0xff]  ;;  %s797_s6 = sshll.u32 %s886_s20, 4  ;;  %s798_s6 = int_to_ptr.vmem [resolvable:$false] %s797_s6 }
  0x7b   : > { %v282_v40 = vmul.f32 %v1108_v1, %v243_v25  ;;  %v283_v41 = vmul.f32 %v1108_v1, %v244_v30  ;;  %v284_v42 = vmul.f32 %v1108_v1, %v245_v31  ;;  %446 = vst.msk [vmem:[%s1138_s21 + $0x20] sm:$0xff] %vm441_vm0, %v413_v39  ;;  %v414_v46 = vsel %vm350_vm6, %v318_v24, %v382_v36  ;;  %v256_v32 = vld [vmem:[%s1097_s9 + $0xa8] sm:$0xff]  ;;  %v257_v33 = vld [vmem:[%s1097_s9 + $0xb0] sm:$0xff]  ;;  %s799_s11 = scalar_lea.vmem %s798_s6, 8192  ;;  %p800_p0 = scmp.lt.s32.totalorder %s1281_s26, %s798_s6 }
  0x7c   : > { %vm351_vm7 = vcmp.ge.f32.partialorder %v319_v37, 0.0  ;;  %v383_v47 = vmul.f32 0.01, %v319_v37  ;;  %vm352_vm8 = vcmp.ge.f32.partialorder %v320_v38, 0.0  ;;  %447 = vst.msk [vmem:[%s1138_s21 + $0x28] sm:$0xff] %vm441_vm0, %v414_v46  ;;  %v285_v53 = vmul.f32 %v1108_v1, %v246_v43  ;;  %v260_v46 = vld [vmem:[%s1097_s9 + $0xc8] sm:$0xff]  ;;  %p801_p6 = scmp.lt.s32.totalorder %s799_s11, %s793_s19 }
  0x7d   : > { %v384_v48 = vmul.f32 0.01, %v320_v38  ;;  %v321_v49 = vadd.f32 %v1110_v2, %v282_v40  ;;  %v322_v50 = vadd.f32 %v1110_v2, %v283_v41  ;;  %v323_v51 = vadd.f32 %v1110_v2, %v284_v42  ;;  %v258_v40 = vld [vmem:[%s1097_s9 + $0xb8] sm:$0xff] }
  0x7e   : > { %v415_v52 = vsel %vm351_vm7, %v319_v37, %v383_v47  ;;  %v286_v54 = vmul.f32 %v1108_v1, %v247_v44  ;;  %v287_v55 = vmul.f32 %v1108_v1, %v248_v45  ;;  %v324_v61 = vadd.f32 %v1110_v2, %v285_v53  ;;  %v259_v45 = vld [vmem:[%s1097_s9 + $0xc0] sm:$0xff]  ;;  %v261_v47 = vld [vmem:[%s1097_s9 + $0xd0] sm:$0xff]  ;;  %p802_p2 = por %p801_p6, %p800_p0 }
  0x7f   : > { %448 = vst.msk [vmem:[%s1138_s21 + $0x30] sm:$0xff] %vm441_vm0, %v415_v52  ;;  %v416_v57 = vsel %vm352_vm8, %v320_v38, %v384_v48  ;;  %vm353_vm9 = vcmp.ge.f32.partialorder %v321_v49, 0.0  ;;  %v385_v58 = vmul.f32 0.01, %v321_v49  ;;  %vm354_vm10 = vcmp.ge.f32.partialorder %v322_v50, 0.0 }
  0x80   : > { %449 = vst.msk [vmem:[%s1138_s21 + $0x38] sm:$0xff] %vm441_vm0, %v416_v57  ;;  %v386_v59 = vmul.f32 0.01, %v322_v50  ;;  %vm355_vm11 = vcmp.ge.f32.partialorder %v323_v51, 0.0  ;;  %v387_v60 = vmul.f32 0.01, %v323_v51  ;;  %v325_v63 = vadd.f32 %v1110_v2, %v286_v54  ;;  %p803_p9 = pnand %p802_p2, %p796_p1 }
  0x81   : > { %v417_v62 = vsel %vm353_vm9, %v321_v49, %v385_v58  ;;  %v326_v0 = vadd.f32 %v1110_v2, %v287_v55  ;;  %v288_v3 = vmul.f32 %v1108_v1, %v249_v56  ;;  %vm356_vm12 = vcmp.ge.f32.partialorder %v324_v61, 0.0  ;;  %v262_v58 = vld [vmem:[%s1097_s9 + $0xd8] sm:$0xff] }
  0x82   : > { %450 = vst.msk [vmem:[%s1138_s21 + $0x40] sm:$0xff] %vm441_vm0, %v417_v62  ;;  %v418_v6 = vsel %vm354_vm10, %v322_v50, %v386_v59  ;;  %v419_v7 = vsel %vm355_vm11, %v323_v51, %v387_v60  ;;  %v388_v8 = vmul.f32 0.01, %v324_v61  ;;  %vm357_vm13 = vcmp.ge.f32.partialorder %v325_v63, 0.0  ;;  %v263_v59 = vld [vmem:[%s1097_s9 + $0xe0] sm:$0xff] }
  0x83   : > { %451 = vst.msk [vmem:[%s1138_s21 + $0x48] sm:$0xff] %vm441_vm0, %v418_v6  ;;  %452 = vst.msk [vmem:[%s1138_s21 + $0x50] sm:$0xff] %vm441_vm0, %v419_v7  ;;  %v389_v11 = vmul.f32 0.01, %v325_v63  ;;  %vm358_vm14 = vcmp.ge.f32.partialorder %v326_v0, 0.0  ;;  %v327_v14 = vadd.f32 %v1110_v2, %v288_v3  ;;  %v289_v15 = vmul.f32 %v1108_v1, %v250_v4 }
  0x84   : > { %v390_v12 = vmul.f32 0.01, %v326_v0  ;;  %v420_v13 = vsel %vm356_vm12, %v324_v61, %v388_v8  ;;  %v290_v16 = vmul.f32 %v1108_v1, %v251_v5  ;;  %v291_v21 = vmul.f32 %v1108_v1, %v252_v9 }
  0x85   : > { %453 = vst.msk [vmem:[%s1138_s21 + $0x58] sm:$0xff] %vm441_vm0, %v420_v13  ;;  %v421_v19 = vsel %vm357_vm13, %v325_v63, %v389_v11  ;;  %v292_v22 = vmul.f32 %v1108_v1, %v253_v10  ;;  %vm359_vm15 = vcmp.ge.f32.partialorder %v327_v14, 0.0  ;;  %v391_v23 = vmul.f32 0.01, %v327_v14  ;;  %v264_v10 = vld [vmem:[%s1097_s9 + $0xe8] sm:$0xff]  ;;  %v265_v11 = vld [vmem:[%s1097_s9 + $0xf0] sm:$0xff] }
  0x86   : > { %v422_v20 = vsel %vm358_vm14, %v326_v0, %v390_v12  ;;  %454 = vst.msk [vmem:[%s1138_s21 + $0x60] sm:$0xff] %vm441_vm0, %v421_v19  ;;  %v328_v24 = vadd.f32 %v1110_v2, %v289_v15  ;;  %v329_v25 = vadd.f32 %v1110_v2, %v290_v16  ;;  %v330_v26 = vadd.f32 %v1110_v2, %v291_v21 }
  0x87   : > { %455 = vst.msk [vmem:[%s1138_s21 + $0x68] sm:$0xff] %vm441_vm0, %v422_v20  ;;  %v331_v27 = vadd.f32 %v1110_v2, %v292_v22  ;;  %v293_v28 = vmul.f32 %v1108_v1, %v254_v17  ;;  %v294_v29 = vmul.f32 %v1108_v1, %v255_v18  ;;  %v423_v30 = vsel %vm359_vm15, %v327_v14, %v391_v23  ;;  %v266_v18 = vld [vmem:[%s1097_s9 + $0xf8] sm:$0xff] }
  0x88   : > { %vm360_vm1 = vcmp.ge.f32.partialorder %v328_v24, 0.0  ;;  %v392_v31 = vmul.f32 0.01, %v328_v24  ;;  %vm361_vm2 = vcmp.ge.f32.partialorder %v329_v25, 0.0  ;;  %456 = vst.msk [vmem:[%s1138_s21 + $0x70] sm:$0xff] %vm441_vm0, %v423_v30  ;;  %vm362_vm3 = vcmp.ge.f32.partialorder %v330_v26, 0.0 }
  0x89   : > { %v393_v34 = vmul.f32 0.01, %v329_v25  ;;  %v394_v35 = vmul.f32 0.01, %v330_v26  ;;  %vm363_vm4 = vcmp.ge.f32.partialorder %v331_v27, 0.0  ;;  %v332_v38 = vadd.f32 %v1110_v2, %v293_v28 }
  0x8a   : > { %v424_v36 = vsel %vm360_vm1, %v328_v24, %v392_v31  ;;  %v395_v37 = vmul.f32 0.01, %v331_v27  ;;  %v333_v39 = vadd.f32 %v1110_v2, %v294_v29  ;;  %v295_v43 = vmul.f32 %v1108_v1, %v256_v32 }
  0x8b   : > { %457 = vst.msk [vmem:[%s1138_s21 + $0x78] sm:$0xff] %vm441_vm0, %v424_v36  ;;  %v425_v41 = vsel %vm361_vm2, %v329_v25, %v393_v34  ;;  %v426_v42 = vsel %vm362_vm3, %v330_v26, %v394_v35  ;;  %v296_v44 = vmul.f32 %v1108_v1, %v257_v33  ;;  %vm364_vm5 = vcmp.ge.f32.partialorder %v332_v38, 0.0 }
  0x8c   : > { %458 = vst.msk [vmem:[%s1138_s21 + $0x80] sm:$0xff] %vm441_vm0, %v425_v41  ;;  %459 = vst.msk [vmem:[%s1138_s21 + $0x88] sm:$0xff] %vm441_vm0, %v426_v42  ;;  %v427_v48 = vsel %vm363_vm4, %v331_v27, %v395_v37  ;;  %v396_v49 = vmul.f32 0.01, %v332_v38  ;;  %vm365_vm6 = vcmp.ge.f32.partialorder %v333_v39, 0.0  ;;  %v334_v51 = vadd.f32 %v1110_v2, %v295_v43 }
  0x8d   : > { %460 = vst.msk [vmem:[%s1138_s21 + $0x90] sm:$0xff] %vm441_vm0, %v427_v48  ;;  %v397_v50 = vmul.f32 0.01, %v333_v39  ;;  %v335_v52 = vadd.f32 %v1110_v2, %v296_v44  ;;  %v297_v53 = vmul.f32 %v1108_v1, %v258_v40  ;;  %v298_v55 = vmul.f32 %v1108_v1, %v259_v45 }
  0x8e   : > { %v428_v54 = vsel %vm364_vm5, %v332_v38, %v396_v49  ;;  %v299_v56 = vmul.f32 %v1108_v1, %v260_v46  ;;  %v300_v57 = vmul.f32 %v1108_v1, %v261_v47  ;;  %vm366_vm7 = vcmp.ge.f32.partialorder %v334_v51, 0.0 }
  0x8f   : > { %461 = vst.msk [vmem:[%s1138_s21 + $0x98] sm:$0xff] %vm441_vm0, %v428_v54  ;;  %v429_v60 = vsel %vm365_vm6, %v333_v39, %v397_v50  ;;  %v398_v61 = vmul.f32 0.01, %v334_v51  ;;  %vm367_vm8 = vcmp.ge.f32.partialorder %v335_v52, 0.0  ;;  %v399_v62 = vmul.f32 0.01, %v335_v52 }
  0x90   : > { %462 = vst.msk [vmem:[%s1138_s21 + $0xa0] sm:$0xff] %vm441_vm0, %v429_v60  ;;  %v336_v63 = vadd.f32 %v1110_v2, %v297_v53  ;;  %v337_v0 = vadd.f32 %v1110_v2, %v298_v55  ;;  %v338_v3 = vadd.f32 %v1110_v2, %v299_v56  ;;  %v339_v5 = vadd.f32 %v1110_v2, %v300_v57 }
  0x91   : > { %v430_v4 = vsel %vm366_vm7, %v334_v51, %v398_v61  ;;  %v301_v6 = vmul.f32 %v1108_v1, %v262_v58  ;;  %v302_v7 = vmul.f32 %v1108_v1, %v263_v59  ;;  %v431_v8 = vsel %vm367_vm8, %v335_v52, %v399_v62 }
  0x92   : > { %463 = vst.msk [vmem:[%s1138_s21 + $0xa8] sm:$0xff] %vm441_vm0, %v430_v4  ;;  %vm368_vm9 = vcmp.ge.f32.partialorder %v336_v63, 0.0  ;;  %v400_v9 = vmul.f32 0.01, %v336_v63  ;;  %vm369_vm10 = vcmp.ge.f32.partialorder %v337_v0, 0.0  ;;  %464 = vst.msk [vmem:[%s1138_s21 + $0xb0] sm:$0xff] %vm441_vm0, %v431_v8  ;;  %v303_v21 = vmul.f32 %v1108_v1, %v264_v10 }
  0x93   : > { %v401_v12 = vmul.f32 0.01, %v337_v0  ;;  %vm370_vm11 = vcmp.ge.f32.partialorder %v338_v3, 0.0  ;;  %v402_v13 = vmul.f32 0.01, %v338_v3  ;;  %vm371_vm12 = vcmp.ge.f32.partialorder %v339_v5, 0.0 }
  0x94   : > { %v432_v14 = vsel %vm368_vm9, %v336_v63, %v400_v9  ;;  %v403_v15 = vmul.f32 0.01, %v339_v5  ;;  %v340_v16 = vadd.f32 %v1110_v2, %v301_v6  ;;  %v341_v17 = vadd.f32 %v1110_v2, %v302_v7 }
  0x95   : > { %465 = vst.msk [vmem:[%s1138_s21 + $0xb8] sm:$0xff] %vm441_vm0, %v432_v14  ;;  %v433_v19 = vsel %vm369_vm10, %v337_v0, %v401_v12  ;;  %v434_v20 = vsel %vm370_vm11, %v338_v3, %v402_v13  ;;  %v304_v22 = vmul.f32 %v1108_v1, %v265_v11  ;;  %v342_v26 = vadd.f32 %v1110_v2, %v303_v21 }
  0x96   : > { %466 = vst.msk [vmem:[%s1138_s21 + $0xc0] sm:$0xff] %vm441_vm0, %v433_v19  ;;  %467 = vst.msk [vmem:[%s1138_s21 + $0xc8] sm:$0xff] %vm441_vm0, %v434_v20  ;;  %v435_v23 = vsel %vm371_vm12, %v339_v5, %v403_v15  ;;  %vm372_vm13 = vcmp.ge.f32.partialorder %v340_v16, 0.0  ;;  %v404_v24 = vmul.f32 0.01, %v340_v16  ;;  %vm373_vm14 = vcmp.ge.f32.partialorder %v341_v17, 0.0 }
  0x97   : > { %468 = vst.msk [vmem:[%s1138_s21 + $0xd0] sm:$0xff] %vm441_vm0, %v435_v23  ;;  %v405_v25 = vmul.f32 0.01, %v341_v17  ;;  %v343_v27 = vadd.f32 %v1110_v2, %v304_v22  ;;  %v305_v28 = vmul.f32 %v1108_v1, %v266_v18  ;;  %vm374_vm15 = vcmp.ge.f32.partialorder %v342_v26, 0.0 }
  0x98   : > { %v436_v29 = vsel %vm372_vm13, %v340_v16, %v404_v24  ;;  %v406_v31 = vmul.f32 0.01, %v342_v26 }
  0x99   : > { %469 = vst.msk [vmem:[%s1138_s21 + $0xd8] sm:$0xff] %vm441_vm0, %v436_v29  ;;  %v437_v30 = vsel %vm373_vm14, %v341_v17, %v405_v25  ;;  %vm375_vm1 = vcmp.ge.f32.partialorder %v343_v27, 0.0  ;;  %v407_v32 = vmul.f32 0.01, %v343_v27  ;;  %v344_v33 = vadd.f32 %v1110_v2, %v305_v28 }
  0x9a   : > { %470 = vst.msk [vmem:[%s1138_s21 + $0xe0] sm:$0xff] %vm441_vm0, %v437_v30  ;;  %v438_v34 = vsel %vm374_vm15, %v342_v26, %v406_v31 }
  0x9b   : > { %471 = vst.msk [vmem:[%s1138_s21 + $0xe8] sm:$0xff] %vm441_vm0, %v438_v34  ;;  %v439_v1 = vsel %vm375_vm1, %v343_v27, %v407_v32  ;;  %vm376_vm2 = vcmp.ge.f32.partialorder %v344_v33, 0.0  ;;  %v408_v35 = vmul.f32 0.01, %v344_v33 }
  0x9c   : > { %472 = vst.msk [vmem:[%s1138_s21 + $0xf0] sm:$0xff] %vm441_vm0, %v439_v1 }
  0x9d   : > { %v440_v36 = vsel %vm376_vm2, %v344_v33, %v408_v35 }
  0x9e   : > { %473 = vst.msk [vmem:[%s1138_s21 + $0xf8] sm:$0xff] %vm441_vm0, %v440_v36 }
  0x9f   : > { %806 = shalt.err (!%p803_p9)
}
  0xa0   : > { %s807_s4 = scalar_lea.hbm %s1279_s18, 4096  ;;  %s811_s7 = scalar_lea.hbm %s1337_s3, 8192 }
  0xa1   : > { %p808_p8 = scmp.ne.s32.totalorder %s1279_s18, %s807_s4  ;;  %p812_p7 = scmp.lt.u32.totalorder %s1279_s18, %s1337_s3 }
  0xa2   : > { %p813_p12 = scmp.lt.u32.totalorder %s811_s7, %s807_s4  ;;  %p815_p5 = scmp.lt.u32.totalorder %s807_s4, %s1279_s18 }
  0xa3   : > { %p809_p13 = pnand %p808_p8, %p1356_p10 }
  0xa4   : > { %p814_p3 = por %p813_p12, %p812_p7 }
  0xa5   : > { %p810_p4 = pneg %p809_p13 }
  0xa6   : > { %p816_p11 = por %p815_p5, %p814_p3 }
  0xa8   : > { %p817_p1 = pnand %p816_p11, %p810_p4 }
  0xaa   : > { %820 = shalt.err (!%p817_p1)
}
  0xab   : > { %s887_s21 = smov 128   ;;  %s888_s23 = smov 8  }
  0xac   : > { %630 = dma.vmem_to_hbm [thread:$0]  (%p1356_p10), %s1281_s26, 4096, %s1279_s18, %s475_s15, %s887_s21, %s887_s21, %s888_s23  }
  0xad PF: > { %s506_s29 = sand.u32 1, %s859_s12   ;;  %p1357_p0 = scmp.ne.s32.totalorder %s1348_s25, 0 }
  0xae   : > { %p1358_p6 = scmp.ge.s32.totalorder %s879_s17, 2  ;;  %s507_s10 = scalar_lea.sflag [#allocation4], %s506_s29 }
  0xb0   : > { %p644_p2 = pnand %p1358_p6, %p1357_p0 }
  0xb2   : > { %854 = dma.done.wait (!%p644_p2), %s507_s10, 4096  }
  0xb3   : > { %856 = vsyncadd (!%p644_p2), %s507_s10, 4294963200  ;;  %s20_s17 = sadd.s32 1, %s879_s17   ;;  %s1359_s12 = smov %s863_s13 }
  0xb4   : > { %p17_p9 = scmp.ge.s32.totalorder %s20_s17, 4   ;;  %s1360_s13 = smov %s867_s14 }
  0xb5   : > { %s1361_s14 = smov %s1058_s28  ;;  %s1362_s15 = smov %s875_s16 }
  0xb6   : > { %s1363_s16 = smov %s1365_s30  ;;  %19 = sbr.rel (!%p17_p9) target bundleno = 7 (0x7), region = 85 }
  0xbd   :  { %512 = vsyncpa [#allocation3], 1 }
  0xbe   :  { %514 = vsyncpa [#allocation3 + $0x1], 1 }
  0xbf   :  { %515 = vsyncpa [#allocation6], 1 }
  0xc0   :  { %516 = vsyncpa [#allocation4], 1 }
  0xc1   :  { %518 = vsyncpa [#allocation4 + $0x1], 1 }

// kernel: double_conv_forward.3
= control target key start
LH: loop header
LB: loop body
LE: loop exit
PB: predicated region body
PF: predicated region fallthrough
CT: control target
= control target key end

     0   :  { %s3945_s0 = inlined_call_operand.hbm [shape: f32[2,16,16,4], index: 0, kind: input, shape index: {}, may-alias: {0,1,2}]   ;;  %s3946_s1 = inlined_call_operand.hbm [shape: f32[2,16,16,4], index: 1, kind: input, shape index: {}, may-alias: {0,1,2}]   ;;  %s3947_s2 = inlined_call_operand.hbm [shape: f32[2,16,16,4], index: 2, kind: input, shape index: {}, may-alias: {0,1,2}]   ;;  %s3948_s3 = inlined_call_operand.hbm [shape: bf16[36,8], index: 3, kind: input, shape index: {}]   ;;  %s3949_s4 = inlined_call_operand.hbm [shape: f32[1,1,4], index: 4, kind: input, shape index: {}]   ;;  %s3950_s5 = inlined_call_operand.hbm [shape: f32[1,1,4], index: 5, kind: input, shape index: {}]   ;;  %s3951_s6 = inlined_call_operand.hbm [shape: f32[2,16,16,8], index: 6, kind: output, shape index: {0}]   ;;  %s3952_s7 = inlined_call_operand.hbm [shape: f32[2,2,1,8], index: 7, kind: output, shape index: {1}]   ;;  %s3953_s8 = inlined_call_operand.hbm [shape: f32[2,2,1,8], index: 8, kind: output, shape index: {2}]  }
   0x1   :  { %3989 = sst [smem:[#allocation41_spill]] %s3945_s0 }
   0x2   :  { %3990 = sst [smem:[#allocation42_spill]] %s3946_s1 }
   0x3   :  { %3991 = sst [smem:[#allocation43_spill]] %s3947_s2 }
   0x4   :  { %3992 = sst [smem:[#allocation44_spill]] %s3948_s3 }
   0x5   :  { %3993 = sst [smem:[#allocation45_spill]] %s3949_s4 }
   0x6   :  { %3994 = sst [smem:[#allocation46_spill]] %s3950_s5 }
   0x7   :  { %3995 = sst [smem:[#allocation47_spill]] %s3951_s6 }
   0x8   :  { %3996 = sst [smem:[#allocation48_spill]] %s3952_s7 }
   0x9   :  { %3997 = sst [smem:[#allocation49_spill]] %s3953_s8 }
   0xa   :  { %14 = vsyncpa [#allocation5], 0 }
   0xb   :  { %16 = vsyncpa [#allocation5 + $0x1], 0 }
   0xc   :  { %17 = vsyncpa [#allocation8], 0 }
   0xd   :  { %19 = vsyncpa [#allocation8 + $0x1], 0 }
   0xe   :  { %20 = vsyncpa [#allocation11], 0 }
   0xf   :  { %21 = vsyncpa [#allocation14], 0 }
  0x10   :  { %22 = vsyncpa [#allocation6], 0 }
  0x11   :  { %24 = vsyncpa [#allocation6 + $0x1], 0 }
  0x12   :  { %25 = vsyncpa [#allocation17], 0 }
  0x13   :  { %27 = vsyncpa [#allocation17 + $0x1], 0  ;;  %s2747_s27 = smov 0   ;;  %s2749_s28 = smov 0  }
  0x14   :  { %s2751_s29 = smov 0   ;;  %s2753_s30 = smov 0  }
  0x15   :  { %s2755_s9 = smov 0   ;;  %s2757_s10 = smov 0  }
  0x16   :  { %s2759_s11 = smov 0   ;;  %s2761_s12 = smov 0  }
  0x17   :  { %s2763_s13 = smov 0   ;;  %s2765_s14 = smov 0  }
  0x18   :  { %s2767_s15 = smov 0   ;;  %s2769_s16 = smov 0  }
  0x19   :  { %s2771_s17 = smov 0   ;;  %s2773_s18 = smov 0  }
  0x1a LB: > { %3998 = sst [smem:[#allocation26_spill]] %s2625_s27  ;;  %s2818_s19 = sadd.s32 4294967295, %s2677_s18   ;;  %s2677_s18 = sphi %s2773_s18, %s33_s18   ;;  %s2673_s17 = sphi %s2771_s17, %s4079_s17   ;;  %s2669_s16 = sphi %s2769_s16, %s4078_s16   ;;  %s2665_s15 = sphi %s2767_s15, %s4088_s15   ;;  %s2661_s14 = sphi %s2765_s14, %s4076_s14   ;;  %s2657_s13 = sphi %s2763_s13, %s4087_s13   ;;  %s2653_s12 = sphi %s2761_s12, %s4086_s12   ;;  %s2649_s11 = sphi %s2759_s11, %s4085_s11   ;;  %s2645_s10 = sphi %s2757_s10, %s4084_s10   ;;  %s2641_s9 = sphi %s2755_s9, %s4083_s9   ;;  %s2637_s30 = sphi %s2753_s30, %s4082_s30   ;;  %s2633_s29 = sphi %s2751_s29, %s4081_s29   ;;  %s2629_s28 = sphi %s2749_s28, %s4072_s28   ;;  %s2625_s27 = sphi %s2747_s27, %s4071_s27  }
  0x1b   : > { %3999 = sst [smem:[#allocation27_spill]] %s2629_s28  ;;  %p1993_p0 = scmp.ge.s32.totalorder %s2677_s18, 1 }
  0x1c   : > { %4000 = sst [smem:[#allocation28_spill]] %s2633_s29  ;;  %p3958_p1 = scmp.eq.s32.totalorder %s2818_s19, 0 }
  0x1d   : > { %4001 = sst [smem:[#allocation29_spill]] %s2641_s9  ;;  %p297_p3 = scmp.lt.s32.totalorder %s2677_s18, 5 }
  0x1e   : > { %4002 = sst [smem:[#allocation30_spill]] %s2661_s14  ;;  %s2679_s21 = smov [#allocation10]  }
  0x1f   : > { %4003 = sst [smem:[#allocation31_spill]] %s2665_s15  ;;  %p2824_p4 = pnand %p1993_p0, %p297_p3 }
  0x20   : > { %4004 = sst [smem:[#allocation32_spill]] %s2669_s16  ;;  %s309_s22 = sshll.u32 %s2679_s21, 4  ;;  %s310_s22 = int_to_ptr.vmem [resolvable:$true] %s309_s22 }
  0x21   : > { %4005 = sst [smem:[#allocation33_spill]] %s2673_s17  ;;  %p2111_p5 = pneg %p2824_p4 }
  0x22   : > { %s4006_s20 = scalar_select %p2824_p4, 1, 0 }
  0x23   : > { %p2832_p6 = pnand %p2111_p5, %p3958_p1  ;;  %s4009_s3 = sld [smem:[#allocation44_spill]] }
  0x24   : > { %4007 = sst [smem:[#allocation34_spill]] %s4006_s20 }
  0x25   : > { %s4008_s23 = scalar_select %p2832_p6, 1, 0 }
  0x26   : > { %p2844_p8 = pneg %p2832_p6 }
  0x29   : > { %s2281_s26 = scalar_lea.hbm %s4009_s3, 320 }
  0x2a   : > { %p2282_p7 = scmp.ne.s32.totalorder %s4009_s3, %s2281_s26  ;;  %p2288_p11 = scmp.lt.u32.totalorder %s2281_s26, %s4009_s3 }
  0x2c   : > { %p2284_p9 = pnand %p2844_p8, %p2282_p7 }
  0x2e   : > { %p2285_p10 = pneg %p2284_p9 }
  0x30   : > { %p2290_p12 = pnand %p2288_p11, %p2285_p10 }
  0x32   : > { %2293 = shalt.err (!%p2290_p12)
}
  0x33   : > { %s2294_s24 = scalar_lea.vmem %s310_s22, 320  ;;  %p2302_p5 = scmp.lt.s32.totalorder %s310_s22, %s310_s22 }
  0x34   : > { %p2295_p13 = scmp.ne.s32.totalorder %s310_s22, %s2294_s24  ;;  %p2303_p2 = scmp.lt.s32.totalorder %s2294_s24, %s2294_s24 }
  0x36   : > { %p2297_p0 = pnand %p2295_p13, %p2844_p8  ;;  %p2304_p1 = por %p2303_p2, %p2302_p5 }
  0x38   : > { %p2298_p3 = pneg %p2297_p0 }
  0x3a   : > { %p2305_p4 = pnand %p2304_p1, %p2298_p3 }
  0x3c   : > { %2308 = shalt.err (!%p2305_p4)
}
  0x3d   : > { %s2680_s7 = smov 64   ;;  %s2681_s6 = smov 4  }
  0x3e   : > { %2114 = dma.hbm_to_vmem [thread:$0]  (!%p2832_p6), %s4009_s3, 320, %s310_s22, [#allocation11], %s2680_s7, %s2680_s7, %s2681_s6  }
  0x3f   : > { %s42_s25 = sadd.s32 1, %s2669_s16  ;;  %s45_s26 = sadd.s32 1, %s2673_s17 }
  0x40   : > { %p43_p1 = scmp.ge.s32.totalorder %s42_s25, 2  ;;  %p3975_p2 = scmp.eq.s32.totalorder %s2677_s18, 0 }
  0x41   : > { %s1987_s24 = sshll.u32 %s2669_s16, 3  ;;  %s90_s14 = sadd.s32 1, %s2645_s10 }
  0x42   : > { %s4090_s25 = smov (%p43_p1, %s42_s25), 0  ;;  %s4092_s26 = smov (!%p43_p1, %s45_s26), %s2673_s17 }
  0x43   : > { %4011 = sst [smem:[#allocation35_spill]] %s4090_s25  ;;  %s50_s20 = ssub.s32 %s2669_s16, %s4090_s25 }
  0x44   : > { %s1988_s2 = sadd.s32 4294967295, %s1987_s24  ;;  %p47_p4 = scmp.ge.s32.totalorder %s4092_s26, 2 }
  0x45   : > { %p79_p7 = scmp.gt.s32.totalorder %s1988_s2, 0  ;;  %s1989_s22 = sshll.u32 %s4090_s25, 3 }
  0x46   : > { %p97_p9 = scmp.ne.s32.totalorder %s2645_s10, %s2641_s9  ;;  %s4094_s26 = smov (%p47_p4, %s4092_s26), 0 }
  0x47   : > { %4012 = sst [smem:[#allocation36_spill]] %s4094_s26  ;;  %s4096_s2 = smov (!%p79_p7, %s1988_s2), 0 }
  0x48   : > { %s2877_s7 = ssub.s32 %s2673_s17, %s4094_s26  ;;  %s1990_s6 = sadd.s32 4294967295, %s1989_s22 }
  0x49   : > { %4013 = sst [smem:[#allocation37_spill]] %s2877_s7  ;;  %s2880_s8 = sor.u32 %s50_s20, %s2877_s7 }
  0x4a   : > { %p83_p10 = scmp.gt.s32.totalorder %s1990_s6, 0  ;;  %p2885_p12 = por %p97_p9, %p3975_p2 }
  0x4b   : > { %p103_p13 = scmp.ne.s32.totalorder %s2641_s9, %s2637_s30  ;;  %s2891_s3 = sadd.s32 8, %s1987_s24 }
  0x4c   : > { %s4098_s6 = smov (!%p83_p10, %s1990_s6), 0  ;;  %4015 = sst [smem:[#allocation38_spill]] %s2891_s3 }
  0x4d   : > { %s86_s26 = ssub.s32 %s4096_s2, %s4098_s6  ;;  %p4016_p3 = scmp.eq.s32.totalorder %s2818_s19, 0 }
  0x4e   : > { %s87_s20 = sor.u32 %s86_s26, %s2877_s7  ;;  %s2901_s27 = sadd.s32 8, %s1989_s22 }
  0x4f   : > { %p2897_p5 = por %p103_p13, %p4016_p3  ;;  %p88_p1 = scmp.eq.s32.totalorder %s87_s20, 0 }
  0x50   : > { %p3974_p7 = scmp.lt.s32.totalorder %s2677_s18, 4  ;;  %s2909_s24 = sshll.u32 %s2673_s17, 5 }
  0x51   : > { %s4017_s25 = scalar_select %p2897_p5, 1, 0 }
  0x52   : > { %s2906_s30 = scalar_select %p88_p1, %s2645_s10, %s90_s14  }
  0x53   : > { %4018 = sst [smem:[#allocation39_spill]] %s4017_s25  ;;  %s369_s6 = sand.u32 1, %s2677_s18  }
  0x54   : > { %s371_s26 = sand.u32 1, %s2645_s10   ;;  %s2006_s7 = sshll.u32 %s4096_s2, 1 }
  0x55   : > { %s2003_s9 = sshll.u32 %s371_s26, 4  ;;  %s383_s28 = sadd.s32 %s2006_s7, %s2909_s24 }
  0x56   : > { %s2008_s3 = sshll.u32 %s383_s28, 7  ;;  %s373_s25 = scalar_lea.vmem [#allocation7], %s2003_s9 }
  0x57   : > { %s386_s20 = sshll.u32 %s373_s25, 4  ;;  %s4019_s1 = sld [smem:[#allocation42_spill]]  ;;  %s2919_s20 = int_to_ptr.vmem [resolvable:$true] %s386_s20 }
  0x58   : > { %p2925_p9 = pnand %p3974_p7, %p2885_p12  ;;  %s2682_s2 = smov [#allocation12]  }
  0x59   : > { %s323_s28 = sshll.u32 %s2682_s2, 4  ;;  %s2931_s0 = scalar_lea.sflag [#allocation8], %s369_s6  ;;  %s2929_s28 = int_to_ptr.vmem [resolvable:$true] %s323_s28 }
  0x5a   : > { %p2311_p13 = pneg %p2925_p9 }
  0x5d   : > { %s2917_s22 = scalar_lea.hbm %s4019_s1, %s2008_s3  ;;  %s2314_s25 = scalar_lea.hbm %s4019_s1, 8192 }
  0x5e   : > { %s2309_s3 = scalar_lea.hbm %s2917_s22, 256  ;;  %p2315_p12 = scmp.lt.u32.totalorder %s2917_s22, %s4019_s1 }
  0x5f   : > { %p2310_p10 = scmp.ne.s32.totalorder %s2917_s22, %s2309_s3  ;;  %p2316_p4 = scmp.lt.u32.totalorder %s2314_s25, %s2309_s3 }
  0x60   : > { %p2318_p7 = scmp.lt.u32.totalorder %s2309_s3, %s2917_s22 }
  0x61   : > { %p2312_p3 = pnand %p2311_p13, %p2310_p10  ;;  %p2317_p0 = por %p2316_p4, %p2315_p12 }
  0x63   : > { %p2313_p1 = pneg %p2312_p3  ;;  %p2319_p2 = por %p2318_p7, %p2317_p0 }
  0x65   : > { %p2320_p11 = pnand %p2319_p2, %p2313_p1 }
  0x67   : > { %2323 = shalt.err (!%p2320_p11)
}
  0x68   : > { %s2324_s6 = scalar_lea.vmem %s2919_s20, 256  ;;  %s2683_s26 = smov [#allocation7]  }
  0x69   : > { %p2325_p10 = scmp.ne.s32.totalorder %s2919_s20, %s2324_s6  ;;  %s2329_s2 = sshll.u32 %s2683_s26, 4  ;;  %s2330_s2 = int_to_ptr.vmem [resolvable:$false] %s2329_s2 }
  0x6a   : > { %s2331_s29 = scalar_lea.vmem %s2330_s2, 512  ;;  %p2332_p6 = scmp.lt.s32.totalorder %s2919_s20, %s2330_s2 }
  0x6b   : > { %p2327_p3 = pnand %p2325_p10, %p2311_p13  ;;  %p2333_p4 = scmp.lt.s32.totalorder %s2331_s29, %s2324_s6 }
  0x6d   : > { %p2328_p5 = pneg %p2327_p3  ;;  %p2334_p12 = por %p2333_p4, %p2332_p6 }
  0x6f   : > { %p2335_p0 = pnand %p2334_p12, %p2328_p5 }
  0x71   : > { %2338 = shalt.err (!%p2335_p0)
}
  0x72   : > { %s3979_s3 = smov 128   ;;  %s3982_s9 = smov 8  }
  0x73   : > { %2127 = dma.hbm_to_vmem [thread:$0]  (!%p2925_p9), %s2917_s22, 256, %s2919_s20, %s2931_s0, %s3979_s3, %s3979_s3, %s3982_s9  }
  0x74   : > { %s4021_s4 = sld [smem:[#allocation45_spill]] }
  0x7a   : > { %s2339_s15 = scalar_lea.hbm %s4021_s4, 16 }
  0x7b   : > { %p2340_p6 = scmp.ne.s32.totalorder %s4021_s4, %s2339_s15  ;;  %p2346_p5 = scmp.lt.u32.totalorder %s2339_s15, %s4021_s4 }
  0x7d   : > { %p2342_p2 = pnand %p2340_p6, %p2844_p8 }
  0x7f   : > { %p2343_p11 = pneg %p2342_p2 }
  0x81   : > { %p2348_p7 = pnand %p2346_p5, %p2343_p11 }
  0x83   : > { %2351 = shalt.err (!%p2348_p7)
}
  0x84   : > { %s2352_s20 = scalar_lea.vmem %s2929_s28, 16  ;;  %s2359_s22 = scalar_lea.vmem %s2929_s28, 32 }
  0x85   : > { %p2353_p9 = scmp.ne.s32.totalorder %s2929_s28, %s2352_s20  ;;  %p2360_p10 = scmp.lt.s32.totalorder %s2929_s28, %s2929_s28 }
  0x86   : > { %p2361_p3 = scmp.lt.s32.totalorder %s2359_s22, %s2352_s20 }
  0x87   : > { %p2355_p13 = pnand %p2353_p9, %p2844_p8 }
  0x88   : > { %p2362_p4 = por %p2361_p3, %p2360_p10 }
  0x89   : > { %p2356_p1 = pneg %p2355_p13 }
  0x8b   : > { %p2363_p12 = pnand %p2362_p4, %p2356_p1 }
  0x8d   : > { %2366 = shalt.err (!%p2363_p12)
}
  0x8e   : > { %p4022_p0 = scmp.ne.s32.totalorder %s4008_s23, 0  ;;  %s2686_s7 = smov [#allocation13]  }
  0x8f   : > { %s334_s15 = sshll.u32 %s2686_s7, 4  ;;  %s4023_s5 = sld [smem:[#allocation46_spill]]  ;;  %s335_s15 = int_to_ptr.vmem [resolvable:$true] %s334_s15 }
  0x90   : > { %2117 = dma.hbm_to_vmem [thread:$0]  (!%p4022_p0), %s4021_s4, 16, %s2929_s28, [#allocation11]  }
  0x95   : > { %s2367_s2 = scalar_lea.hbm %s4023_s5, 16 }
  0x96   : > { %p2368_p6 = scmp.ne.s32.totalorder %s4023_s5, %s2367_s2  ;;  %p2374_p5 = scmp.lt.u32.totalorder %s2367_s2, %s4023_s5 }
  0x98   : > { %p2370_p2 = pnand %p2368_p6, %p2844_p8 }
  0x9a   : > { %p2371_p11 = pneg %p2370_p2 }
  0x9c   : > { %p2376_p7 = pnand %p2374_p5, %p2371_p11 }
  0x9e   : > { %2379 = shalt.err (!%p2376_p7)
}
  0x9f   : > { %s2380_s28 = scalar_lea.vmem %s335_s15, 16  ;;  %s2387_s14 = scalar_lea.vmem %s335_s15, 32 }
  0xa0   : > { %p2381_p9 = scmp.ne.s32.totalorder %s335_s15, %s2380_s28  ;;  %p2388_p10 = scmp.lt.s32.totalorder %s335_s15, %s335_s15 }
  0xa1   : > { %p2389_p3 = scmp.lt.s32.totalorder %s2387_s14, %s2380_s28 }
  0xa2   : > { %p2383_p13 = pnand %p2381_p9, %p2844_p8 }
  0xa3   : > { %p2390_p4 = por %p2389_p3, %p2388_p10 }
  0xa4   : > { %p2384_p1 = pneg %p2383_p13 }
  0xa6   : > { %p2391_p12 = pnand %p2390_p4, %p2384_p1 }
  0xa8   : > { %2394 = shalt.err (!%p2391_p12)
}
  0xa9   : > { %2120 = dma.hbm_to_vmem [thread:$0]  (!%p4022_p0), %s4023_s5, 16, %s335_s15, [#allocation14]  }
  0xaa   : > { %s3981_s23 = sadd.s32 4294967294, %s2677_s18   ;;  %s54_s21 = sadd.s32 1, %s2657_s13 }
  0xab   : > { %p4024_p8 = scmp.eq.s32.totalorder %s2880_s8, 0  ;;  %p61_p6 = scmp.ne.s32.totalorder %s2657_s13, %s2653_s12 }
  0xac   : > { %p67_p2 = scmp.ne.s32.totalorder %s2653_s12, %s2649_s11  ;;  %p234_p11 = scmp.eq.s32.totalorder %s3981_s23, 3 }
  0xad   : > { %s3009_s3 = scalar_select %p4024_p8, %s2657_s13, %s54_s21  }
  0xae   : > { %s345_s6 = sand.u32 1, %s2657_s13   ;;  %p4026_p5 = scmp.eq.s32.totalorder %s2677_s18, 0 }
  0xaf   : > { %4025 = sst [smem:[#allocation40_spill]] %s3009_s3  ;;  %p4027_p9 = scmp.eq.s32.totalorder %s2818_s19, 0 }
  0xb0   : > { %p63_p7 = por %p4026_p5, %p61_p6  ;;  %p4029_p1 = scmp.eq.s32.totalorder %s2818_s19, 3 }
  0xb1   : > { %p3022_p13 = por %p4027_p9, %p67_p2  ;;  %p3032_p10 = por %p234_p11, %p67_p2 }
  0xb2   : > { %p3028_p0 = por %p4029_p1, %p61_p6  ;;  %s1998_s2 = sshll.u32 %s345_s6, 7 }
  0xb3   : > { %s4031_s8 = scalar_select %p3032_p10, 1, 0 }
  0xb4   : > { %s4030_s15 = scalar_select %p3028_p0, 1, 0 }
  0xb5   : > { %s2044_s29 = sshll.u32 %s2669_s16, 4  ;;  %s349_s22 = scalar_lea.vmem [#allocation4], %s1998_s2 }
  0xb6   : > { %s356_s20 = sadd.s32 %s2044_s29, %s2909_s24  ;;  %s359_s28 = sshll.u32 %s349_s22, 4  ;;  %s3038_s28 = int_to_ptr.vmem [resolvable:$true] %s359_s28 }
  0xb7   : > { %s2002_s14 = sshll.u32 %s356_s20, 7  ;;  %s4032_s21 = sld [smem:[#allocation41_spill]] }
  0xb8   : > { %p4033_p3 = scmp.lt.s32.totalorder %s2677_s18, 4  ;;  %s3051_s2 = scalar_lea.sflag [#allocation5], %s345_s6 }
  0xba   : > { %p3047_p4 = pnand %p4033_p3, %p63_p7 }
  0xbc   : > { %p2397_p8 = pneg %p3047_p4 }
  0xbd   : > { %s3043_s23 = scalar_lea.hbm %s4032_s21, %s2002_s14  ;;  %s2400_s14 = scalar_lea.hbm %s4032_s21, 8192 }
  0xbe   : > { %s2395_s29 = scalar_lea.hbm %s3043_s23, 2048  ;;  %p2401_p11 = scmp.lt.u32.totalorder %s3043_s23, %s4032_s21 }
  0xbf   : > { %p2396_p12 = scmp.ne.s32.totalorder %s3043_s23, %s2395_s29  ;;  %p2402_p5 = scmp.lt.u32.totalorder %s2400_s14, %s2395_s29 }
  0xc0   : > { %p2404_p9 = scmp.lt.u32.totalorder %s2395_s29, %s3043_s23 }
  0xc1   : > { %p2398_p6 = pnand %p2397_p8, %p2396_p12  ;;  %p2403_p7 = por %p2402_p5, %p2401_p11 }
  0xc3   : > { %p2399_p2 = pneg %p2398_p6  ;;  %p2405_p1 = por %p2404_p9, %p2403_p7 }
  0xc5   : > { %p2406_p3 = pnand %p2405_p1, %p2399_p2 }
  0xc7   : > { %2409 = shalt.err (!%p2406_p3)
}
  0xc8   : > { %s2410_s6 = scalar_lea.vmem %s3038_s28, 2048  ;;  %s2687_s20 = smov [#allocation4]  }
  0xc9   : > { %p2411_p12 = scmp.ne.s32.totalorder %s3038_s28, %s2410_s6  ;;  %s2415_s22 = sshll.u32 %s2687_s20, 4  ;;  %s2416_s22 = int_to_ptr.vmem [resolvable:$false] %s2415_s22 }
  0xca   : > { %s2417_s25 = scalar_lea.vmem %s2416_s22, 4096  ;;  %p2418_p0 = scmp.lt.s32.totalorder %s3038_s28, %s2416_s22 }
  0xcb   : > { %p2413_p6 = pnand %p2411_p12, %p2397_p8  ;;  %p2419_p11 = scmp.lt.s32.totalorder %s2417_s25, %s2410_s6 }
  0xcd   : > { %p2414_p10 = pneg %p2413_p6  ;;  %p2420_p5 = por %p2419_p11, %p2418_p0 }
  0xcf   : > { %p2421_p7 = pnand %p2420_p5, %p2414_p10 }
  0xd1   : > { %2424 = shalt.err (!%p2421_p7)
}
  0xd2   : > { %s4035_s29 = smov 8   ;;  %s4036_s14 = smov 128  }
  0xd3   : > { %s4037_s7 = sld [smem:[#allocation28_spill]]  ;;  %s4038_s1 = sld [smem:[#allocation38_spill]] }
  0xd4   : > { %s4039_s20 = sld [smem:[#allocation27_spill]]  ;;  %s4041_s6 = sld [smem:[#allocation37_spill]] }
  0xd5   : > { %s4040_s22 = sld [smem:[#allocation26_spill]]  ;;  %p4043_p10 = scmp.lt.s32.totalorder %s2901_s27, 15 }
  0xd6   : > { %2124 = dma.hbm_to_vmem [thread:$0]  (!%p3047_p4), %s3043_s23, 2048, %s3038_s28, %s3051_s2, %s4036_s14, %s4036_s14, %s4035_s29  }
  0xd7   : > { %s4102_s27 = smov (!%p4043_p10, %s2901_s27), 15  ;;  %p4044_p9 = scmp.eq.s32.totalorder %s2677_s18, 0 }
  0xd8   : > { %p4045_p12 = scmp.eq.s32.totalorder %s2818_s19, 0  ;;  %s4047_s3 = sld [smem:[#allocation43_spill]] }
  0xd9   : > { %s126_s9 = sadd.s32 1, %s4037_s7  ;;  %p4042_p0 = scmp.lt.s32.totalorder %s4038_s1, 15 }
  0xda   : > { %p133_p8 = scmp.ne.s32.totalorder %s4037_s7, %s4039_s20  ;;  %s398_s4 = sand.u32 1, %s4037_s7  }
  0xdb   : > { %s4100_s1 = smov (!%p4042_p0, %s4038_s1), 15  ;;  %p139_p2 = scmp.ne.s32.totalorder %s4039_s20, %s4040_s22 }
  0xdc   : > { %s122_s25 = ssub.s32 %s4100_s1, %s4102_s27  ;;  %p135_p1 = por %p133_p8, %p4044_p9 }
  0xdd   : > { %s123_s5 = sor.u32 %s122_s25, %s4041_s6  ;;  %p3099_p6 = por %p139_p2, %p4045_p12 }
  0xde   : > { %p124_p3 = scmp.eq.s32.totalorder %s123_s5, 0  ;;  %s2009_s23 = sshll.u32 %s398_s4, 4 }
  0xdf   : > { %s4046_s21 = scalar_select %p3099_p6, 1, 0 }
  0xe0   : > { %s2011_s28 = sshll.u32 %s4100_s1, 1  ;;  %s4104_s7 = smov (!%p124_p3, %s4037_s7), %s126_s9 }
  0xe1   : > { %s410_s2 = sadd.s32 %s2011_s28, %s2909_s24  ;;  %s400_s16 = scalar_lea.vmem [#allocation9], %s2009_s23 }
  0xe2   : > { %s2013_s17 = sshll.u32 %s410_s2, 7  ;;  %s413_s20 = sshll.u32 %s400_s16, 4  ;;  %s3112_s20 = int_to_ptr.vmem [resolvable:$true] %s413_s20 }
  0xe3   : > { %s3110_s6 = scalar_lea.hbm %s4047_s3, %s2013_s17  ;;  %p4048_p4 = scmp.lt.s32.totalorder %s2677_s18, 4 }
  0xe4   : > { %s2425_s4 = scalar_lea.hbm %s3110_s6, 256  ;;  %s2430_s17 = scalar_lea.hbm %s4047_s3, 8192 }
  0xe5   : > { %p3116_p11 = pnand %p4048_p4, %p135_p1  ;;  %p2426_p5 = scmp.ne.s32.totalorder %s3110_s6, %s2425_s4 }
  0xe6   : > { %p2431_p8 = scmp.lt.u32.totalorder %s3110_s6, %s4047_s3  ;;  %p2432_p2 = scmp.lt.u32.totalorder %s2430_s17, %s2425_s4 }
  0xe7   : > { %p2427_p7 = pneg %p3116_p11  ;;  %p2434_p1 = scmp.lt.u32.totalorder %s2425_s4, %s3110_s6 }
  0xe8   : > { %p2433_p9 = por %p2432_p2, %p2431_p8 }
  0xe9   : > { %p2428_p0 = pnand %p2427_p7, %p2426_p5 }
  0xea   : > { %p2435_p3 = por %p2434_p1, %p2433_p9 }
  0xeb   : > { %p2429_p10 = pneg %p2428_p0 }
  0xed   : > { %p2436_p12 = pnand %p2435_p3, %p2429_p10 }
  0xef   : > { %2439 = shalt.err (!%p2436_p12)
}
  0xf0   : > { %s2440_s25 = scalar_lea.vmem %s3112_s20, 256  ;;  %s2688_s23 = smov [#allocation9]  }
  0xf1   : > { %p2441_p4 = scmp.ne.s32.totalorder %s3112_s20, %s2440_s25  ;;  %s2445_s28 = sshll.u32 %s2688_s23, 4  ;;  %s2446_s28 = int_to_ptr.vmem [resolvable:$false] %s2445_s28 }
  0xf2   : > { %s2447_s2 = scalar_lea.vmem %s2446_s28, 512  ;;  %p2448_p6 = scmp.lt.s32.totalorder %s3112_s20, %s2446_s28 }
  0xf3   : > { %p2443_p5 = pnand %p2441_p4, %p2427_p7  ;;  %p2449_p8 = scmp.lt.s32.totalorder %s2447_s2, %s2440_s25 }
  0xf5   : > { %p2444_p0 = pneg %p2443_p5  ;;  %p2450_p2 = por %p2449_p8, %p2448_p6 }
  0xf7   : > { %p2451_p9 = pnand %p2450_p2, %p2444_p0 }
  0xf9   : > { %2454 = shalt.err (!%p2451_p9)
}
  0xfa   : > { %2130 = dma.hbm_to_vmem [thread:$0]  (!%p3116_p11), %s3110_s6, 256, %s3112_s20, %s2931_s0, %s4036_s14, %s4036_s14, %s4035_s29  }
  0xfb   : > { %s4050_s22 = sld [smem:[#allocation34_spill]] }
 0x101   : > { %p4051_p7 = scmp.ne.s32.totalorder %s4050_s22, 0 }
 0x102   : > { %s3152_s27 = sand.u32 (!%p4051_p7), 1, %s2653_s12  }
 0x103   : > { %425 = sbr.rel (%p4051_p7) target bundleno = 1014 (0x3f6), region = 44  ;;  %s2015_s4 = sshll.u32 (!%p4051_p7), %s3152_s27, 7 }
 0x104   : > { %s428_s5 = scalar_lea.sflag (!%p4051_p7), [#allocation5], %s3152_s27  ;;  %s3158_s1 = scalar_lea.vmem (!%p4051_p7), [#allocation4], %s2015_s4 }
 0x10a   : > { %2596 = dma.done.wait (%p3022_p13), %s428_s5, 2048  }
 0x10b   : > { %2598 = vsyncadd (%p3022_p13), %s428_s5, 4294965248  ;;  %s4052_s0 = sld [smem:[#allocation29_spill]]  ;;  %s4053_s29 = sld [smem:[#allocation39_spill]] }
 0x10c   : > { %s436_s14 = sand.u32 1, %s2818_s19  }
 0x10d   : > { %s437_s16 = scalar_lea.sflag [#allocation8], %s436_s14 }
 0x111   : > { %s438_s20 = sand.u32 1, %s4052_s0   ;;  %p4054_p6 = scmp.ne.s32.totalorder %s4053_s29, 0 }
 0x112   : > { %s3166_s6 = sshll.u32 %s438_s20, 4 }
 0x113   : > { %s440_s17 = scalar_lea.vmem [#allocation7], %s3166_s6 }
 0x114   : > { %2600 = dma.done.wait (%p4054_p6), %s437_s16, 256  }
 0x115   : > { %2602 = vsyncadd (%p4054_p6), %s437_s16, 4294967040  ;;  %s4055_s24 = sld [smem:[#allocation27_spill]]  ;;  %p4056_p13 = scmp.ne.s32.totalorder %s4046_s21, 0 }
 0x11b   : > { %s447_s26 = sand.u32 1, %s4055_s24  }
 0x11c   : > { %s3176_s9 = sshll.u32 %s447_s26, 4 }
 0x11d   : > { %s449_s25 = scalar_lea.vmem [#allocation9], %s3176_s9 }
 0x11e   : > { %2604 = dma.done.wait (%p4056_p13), %s437_s16, 256  }
 0x11f   : > { %2606 = vsyncadd (%p4056_p13), %s437_s16, 4294967040  ;;  %p4057_p11 = scmp.eq.s32.totalorder %s2818_s19, 0 }
 0x121   : > { %2608 = dma.done.wait (%p4057_p11), [#allocation11], 336   ;;  %p4058_p10 = pmov %p4057_p11 }
 0x123   : > { %2610 = vsyncadd (%p4058_p10), [#allocation11], 4294966960  ;;  %p4059_p1 = pmov %p4058_p10 }
 0x125   : > { %2612 = dma.done.wait (%p4059_p1), [#allocation14], 16   ;;  %p4060_p3 = pmov %p4059_p1 }
 0x126   : > { %s4061_s23 = sld [smem:[#allocation30_spill]]  ;;  %vm578_vm0 = vcmask 24576   ;;  %v2689_v0 = vmov 0.0   ;;  %vm555_vm1 = vcmask 31744   ;;  %v523_v1 = vld [vmem:[%s3158_s1] sm:$0xff]  ;;  %v524_v2 = vld [vmem:[%s3158_s1 + $0x8] sm:$0xff] }
 0x127   : > { %2614 = vsyncadd (%p4060_p3), [#allocation14], 4294967280  ;;  %580 = vst.msk [vmem:[#allocation2 + $0x27] sm:$0x1] %vm578_vm0, %v2689_v0  ;;  %v539_v3 = vld [vmem:[%s440_s17] sm:$0xff]  ;;  %v540_v6 = vld [vmem:[%s440_s17 + $0x8] sm:$0xff] }
 0x128   : > { %579 = vst.msk [vmem:[#allocation2 + $0x7] sm:$0x1] %vm578_vm0, %v2689_v0  ;;  %581 = vst.msk [vmem:[#allocation2 + $0x47] sm:$0x1] %vm578_vm0, %v2689_v0  ;;  %v525_v7 = vld [vmem:[%s3158_s1 + $0x10] sm:$0xff]  ;;  %v526_v8 = vld [vmem:[%s3158_s1 + $0x18] sm:$0xff] }
 0x129   : > { %582 = vst.msk [vmem:[#allocation2 + $0x67] sm:$0x1] %vm578_vm0, %v2689_v0  ;;  %583 = vst.msk [vmem:[#allocation2 + $0x87] sm:$0x1] %vm578_vm0, %v2689_v0  ;;  %v527_v10 = vld [vmem:[%s3158_s1 + $0x20] sm:$0xff]  ;;  %v528_v11 = vld [vmem:[%s3158_s1 + $0x28] sm:$0xff] }
 0x12a   : > { %584 = vst.msk [vmem:[#allocation2 + $0xa7] sm:$0x1] %vm578_vm0, %v2689_v0  ;;  %585 = vst.msk [vmem:[#allocation2 + $0xc7] sm:$0x1] %vm578_vm0, %v2689_v0  ;;  %v529_v12 = vld [vmem:[%s3158_s1 + $0x30] sm:$0xff]  ;;  %v530_v13 = vld [vmem:[%s3158_s1 + $0x38] sm:$0xff] }
 0x12b   : > { %586 = vst.msk [vmem:[#allocation2 + $0xe7] sm:$0x1] %vm578_vm0, %v2689_v0  ;;  %587 = vst.msk [vmem:[#allocation2 + $0x107] sm:$0x1] %vm578_vm0, %v2689_v0  ;;  %v531_v14 = vld [vmem:[%s3158_s1 + $0x40] sm:$0xff]  ;;  %v532_v15 = vld [vmem:[%s3158_s1 + $0x48] sm:$0xff] }
 0x12c   : > { %p543_p12 = scmp.gt.s32.totalorder %s4061_s23, 0  ;;  %588 = vst.msk [vmem:[#allocation2 + $0x127] sm:$0x1] %vm578_vm0, %v2689_v0  ;;  %589 = vst.msk [vmem:[#allocation2 + $0x18] sm:$0x1] %vm578_vm0, %v2689_v0  ;;  %s2690_s2 = smov 8  }
 0x12d   : > { %590 = vst.msk [vmem:[#allocation2 + $0x38] sm:$0x1] %vm578_vm0, %v2689_v0  ;;  %591 = vst.msk [vmem:[#allocation2 + $0x58] sm:$0x1] %vm578_vm0, %v2689_v0  ;;  %s2691_s22 = smov 4   ;;  %s2692_s5 = smov 12  }
 0x12e   : > { %592 = vst.msk [vmem:[#allocation2 + $0x78] sm:$0x1] %vm578_vm0, %v2689_v0  ;;  %593 = vst.msk [vmem:[#allocation2 + $0x98] sm:$0x1] %vm578_vm0, %v2689_v0  ;;  %s544_s21 = scalar_select %p543_p12, 1, 0 }
 0x12f   : > { %594 = vst.msk [vmem:[#allocation2 + $0xb8] sm:$0x1] %vm578_vm0, %v2689_v0  ;;  %595 = vst.msk [vmem:[#allocation2 + $0xd8] sm:$0x1] %vm578_vm0, %v2689_v0  ;;  %v533_v34 = vld [vmem:[%s3158_s1 + $0x50] sm:$0xff]  ;;  %v534_v35 = vld [vmem:[%s3158_s1 + $0x58] sm:$0xff] }
 0x130   : > { %596 = vst.msk [vmem:[#allocation2 + $0xf8] sm:$0x1] %vm578_vm0, %v2689_v0  ;;  %597 = vst.msk [vmem:[#allocation2 + $0x118] sm:$0x1] %vm578_vm0, %v2689_v0  ;;  %s545_s28 = scvt.s32.f32 %s544_s21  ;;  %s2693_s0 = smov 16   ;;  %v535_v44 = vld [vmem:[%s3158_s1 + $0x60] sm:$0xff] }
 0x131   : > { %598 = vst.msk [vmem:[#allocation2 + $0x138] sm:$0x1] %vm578_vm0, %v2689_v0  ;;  %s2694_s29 = smov 20   ;;  %v536_v45 = vld [vmem:[%s3158_s1 + $0x68] sm:$0xff]  ;;  %s2695_s20 = smov 24   ;;  %v2278_v48 = vld [vmem:[#allocation10] sm:$0xff]  }
 0x132   : > { %v546_v4 = vstv %s545_s28  ;;  %559 = vst.msk [vmem:[#allocation2 + $0x28] sm:$0xff] %vm555_vm1, %v523_v1  ;;  %560 = vst.msk [vmem:[#allocation2 + $0x30] sm:$0xff] %vm555_vm1, %v524_v2  ;;  %s2696_s6 = smov 28   ;;  %2057 = vmatprep.subr.bf16.mxu0 %v2278_v48  ;;  %2079 = vmatprep.subr.bf16.mxu1 %v2278_v48  ;;  %v2279_v51 = vld [vmem:[#allocation10 + $0x8] sm:$0xff]   ;;  %s2697_s16 = smov 32   ;;  %vm1477_vm2 = vcmask 1041408  }
 0x133   : > { %v547_v5 = vmul.f32 %v546_v4, %v539_v3  ;;  %v548_v9 = vmul.f32 %v546_v4, %v540_v6  ;;  %561 = vst.msk [vmem:[#allocation2 + $0x48] sm:$0xff] %vm555_vm1, %v525_v7  ;;  %562 = vst.msk [vmem:[#allocation2 + $0x50] sm:$0xff] %vm555_vm1, %v526_v8  ;;  %2058 = vmatpush3.bf16.msra.mxu0 %v2278_v48  ;;  %2082 = vmatpush3.bf16.msra.mxu1 %v2278_v48  ;;  %v2280_v52 = vld [vmem:[#allocation10 + $0x10] ss:$0 sps:$4 sm:$0x33]   ;;  %v538_v57 = vld [vmem:[%s3158_s1 + $0x78] sm:$0xff] }
 0x134   : > { %563 = vst.msk [vmem:[#allocation2 + $0x68] sm:$0xff] %vm555_vm1, %v527_v10  ;;  %564 = vst.msk [vmem:[#allocation2 + $0x70] sm:$0xff] %vm555_vm1, %v528_v11  ;;  %2059 = vmatprep.subr.bf16.mxu0 %v2279_v51  ;;  %2080 = vmatprep.subr.bf16.mxu1 %v2279_v51  ;;  %v1479_v53 = vsel %vm1477_vm2, %v2280_v52, 0  ;;  %v537_v56 = vld [vmem:[%s3158_s1 + $0x70] sm:$0xff]  ;;  %p549_p4 = scmp.lt.s32.totalorder %s4061_s23, 1  ;;  %v542_v0 = vld [vmem:[%s449_s25 + $0x8] sm:$0xff] }
 0x135   : > { %556 = vst.msk [vmem:[#allocation2 + $0x8] sm:$0xff] %vm555_vm1, %v547_v5  ;;  %565 = vst.msk [vmem:[#allocation2 + $0x88] sm:$0xff] %vm555_vm1, %v529_v12  ;;  %v541_v62 = vld [vmem:[%s449_s25] sm:$0xff]  ;;  %vm711_vm3 = vcmask 64544   ;;  %vm808_vm4 = vcmask 97344   ;;  %vm905_vm5 = vcmask 130144  }
 0x136   : > { %557 = vst.msk [vmem:[#allocation2 + $0x10] sm:$0xff] %vm555_vm1, %v548_v9  ;;  %566 = vst.msk [vmem:[#allocation2 + $0x90] sm:$0xff] %vm555_vm1, %v530_v13  ;;  %s550_s1 = scalar_select %p549_p4, 1, 0  ;;  %vm1002_vm6 = vcmask 162944   ;;  %vm1099_vm7 = vcmask 195744  }
 0x137   : > { %567 = vst.msk [vmem:[#allocation2 + $0xa8] sm:$0xff] %vm555_vm1, %v531_v14  ;;  %568 = vst.msk [vmem:[#allocation2 + $0xb0] sm:$0xff] %vm555_vm1, %v532_v15  ;;  %2060 = vmatpush3.bf16.msra.mxu0 %v2279_v51  ;;  %2083 = vmatpush3.bf16.msra.mxu1 %v2279_v51  ;;  %vm1197_vm8 = vcmask 228544   ;;  %vm1294_vm9 = vcmask 261344   ;;  %vm1391_vm10 = vcmask 294144   ;;  %vm1452_vm11 = vcmask 293888  }
 0x138   : > { %569 = vst.msk [vmem:[#allocation2 + $0xc8] sm:$0xff] %vm555_vm1, %v533_v34  ;;  %570 = vst.msk [vmem:[#allocation2 + $0xd0] sm:$0xff] %vm555_vm1, %v534_v35  ;;  %2085 = vmatprep.subr.msk.bf16.mxu0 %vm1477_vm2, %v2280_v52  ;;  %2086 = vmatprep.subr.msk.bf16.mxu1 %vm1477_vm2, %v2280_v52  ;;  %s551_s17 = scvt.s32.f32 %s550_s1  ;;  %vm1578_vm12 = vcmask 64512   ;;  %s3643_s24 = scalar_lea.vmem [#allocation15], %s2015_s4 }
 0x139   : > { %v730_v16 = vld [vmem:[#allocation2 + $0x29] sm:$0xff]  ;;  %v731_v26 = vld [vmem:[#allocation2 + $0x31] sm:$0xff]  ;;  %571 = vst.msk [vmem:[#allocation2 + $0xe8] sm:$0xff] %vm555_vm1, %v535_v44  ;;  %572 = vst.msk [vmem:[#allocation2 + $0xf0] sm:$0xff] %vm555_vm1, %v536_v45  ;;  %s4062_s4 = sld [smem:[#allocation31_spill]]  ;;  %s2045_s26 = sshll.u32 %s4061_s23, 4 }
 0x13a   : > { %v633_v17 = vld [vmem:[#allocation2 + $0x28] sm:$0xff]  ;;  %764 = vrot.lane.b32.xlu0 %v730_v16, %s2690_s2  ;;  %v634_v20 = vld [vmem:[#allocation2 + $0x30] sm:$0xff]  ;;  %573 = vst.msk [vmem:[#allocation2 + $0x108] sm:$0xff] %vm555_vm1, %v537_v56  ;;  %574 = vst.msk [vmem:[#allocation2 + $0x110] sm:$0xff] %vm555_vm1, %v538_v57  ;;  %v552_v63 = vstv %s551_s17  ;;  %s1730_s21 = sshll.u32 %s3643_s24, 4  ;;  %p4064_p0 = scmp.ne.s32.totalorder %s4030_s15, 0  ;;  %s3737_s21 = int_to_ptr.vmem [resolvable:$true] %s1730_s21 }
 0x13b   : > { %v825_v18 = vld [vmem:[#allocation2 + $0x27] sm:$0xff]  ;;  %667 = vrot.lane.b32.xlu1 %v633_v17, %s2691_s22  ;;  %v826_v19 = vld [vmem:[#allocation2 + $0x2f] sm:$0xff]  ;;  %2062 = vmatpush3.bf16.msra.mxu0 %v1479_v53  ;;  %v553_v1 = vmul.f32 %v552_v63, %v541_v62  ;;  %v554_v2 = vmul.f32 %v552_v63, %v542_v0 }
 0x13c   : > { %617 = vst.msk [vmem:[#allocation3 + $0x10] sm:$0xff] %vm555_vm1, %v825_v18  ;;  %v3243_v21 = vld [vmem:[#allocation2 + $0x47] sm:$0xff]  ;;  %v3245_v22 = vld [vmem:[#allocation2 + $0x4f] sm:$0xff]  ;;  %618 = vst.msk [vmem:[#allocation3 + $0x18] sm:$0xff] %vm555_vm1, %v826_v19  ;;  %2084 = vmatpush3.bf16.msra.mxu1 %v1479_v53 }
 0x13d   : > { %619 = vst.msk [vmem:[#allocation3 + $0x20] sm:$0xff] %vm555_vm1, %v3243_v21  ;;  %620 = vst.msk [vmem:[#allocation3 + $0x28] sm:$0xff] %vm555_vm1, %v3245_v22  ;;  %v3254_v23 = vld [vmem:[#allocation2 + $0x67] sm:$0xff]  ;;  %v3256_v24 = vld [vmem:[#allocation2 + $0x6f] sm:$0xff] }
 0x13e   : > { %857 = vrot.lane.b32.xlu0 %v825_v18, %s2692_s5  ;;  %v631_v25 = vld [vmem:[#allocation2 + $0x8] sm:$0xff]  ;;  %621 = vst.msk [vmem:[#allocation3 + $0x30] sm:$0xff] %vm555_vm1, %v3254_v23  ;;  %622 = vst.msk [vmem:[#allocation3 + $0x38] sm:$0xff] %vm555_vm1, %v3256_v24  ;;  %v632_v31 = vld [vmem:[#allocation2 + $0x10] sm:$0xff] }
 0x13f   : > { %669 = vrot.lane.b32.xlu1 %v634_v20, %s2691_s22  ;;  %v3262_v27 = vld [vmem:[#allocation2 + $0x87] sm:$0xff]  ;;  %v3264_v28 = vld [vmem:[#allocation2 + $0x8f] sm:$0xff]  ;;  %576 = vst.msk [vmem:[#allocation2 + $0x128] sm:$0xff] %vm555_vm1, %v553_v1  ;;  %577 = vst.msk [vmem:[#allocation2 + $0x130] sm:$0xff] %vm555_vm1, %v554_v2  ;;  %s2036_s9 = sshll.u32 %s4062_s4, 5 }
 0x140   : > { %623 = vst.msk [vmem:[#allocation3 + $0x40] sm:$0xff] %vm555_vm1, %v3262_v27  ;;  %624 = vst.msk [vmem:[#allocation3 + $0x48] sm:$0xff] %vm555_vm1, %v3264_v28  ;;  %v3272_v29 = vld [vmem:[#allocation2 + $0xa7] sm:$0xff]  ;;  %v3274_v30 = vld [vmem:[#allocation2 + $0xaf] sm:$0xff]  ;;  %s1727_s25 = sadd.s32 %s2045_s26, %s2036_s9 }
 0x141   : > { %v599_v32 = vld [vmem:[#allocation2 + $0x7] sm:$0xff]  ;;  %625 = vst.msk [vmem:[#allocation3 + $0x50] sm:$0xff] %vm555_vm1, %v3272_v29  ;;  %626 = vst.msk [vmem:[#allocation3 + $0x58] sm:$0xff] %vm555_vm1, %v3274_v30  ;;  %v600_v33 = vld [vmem:[#allocation2 + $0xf] sm:$0xff]  ;;  %s2037_s28 = sshll.u32 %s1727_s25, 7 }
 0x142   : > { %663 = vrot.lane.b32.xlu0 %v631_v25, %s2691_s22  ;;  %615 = vst.msk [vmem:[#allocation3] sm:$0xff] %vm555_vm1, %v599_v32  ;;  %616 = vst.msk [vmem:[#allocation3 + $0x8] sm:$0xff] %vm555_vm1, %v600_v33  ;;  %v728_v36 = vld [vmem:[#allocation2 + $0x9] sm:$0xff]  ;;  %v729_v37 = vld [vmem:[#allocation2 + $0x11] sm:$0xff] }
 0x143   : > { %766 = vrot.lane.b32.xlu1 %v731_v26, %s2690_s2  ;;  %v3290_v38 = vld [vmem:[#allocation2 + $0xc7] sm:$0xff]  ;;  %v3292_v39 = vld [vmem:[#allocation2 + $0xcf] sm:$0xff] }
 0x144   : > { %627 = vst.msk [vmem:[#allocation3 + $0x60] sm:$0xff] %vm555_vm1, %v3290_v38  ;;  %628 = vst.msk [vmem:[#allocation3 + $0x68] sm:$0xff] %vm555_vm1, %v3292_v39  ;;  %v924_v40 = vld [vmem:[#allocation2 + $0x48] sm:$0xff]  ;;  %v925_v41 = vld [vmem:[#allocation2 + $0x50] sm:$0xff] }
 0x145   : > { %v1021_v42 = vld [vmem:[#allocation2 + $0x49] sm:$0xff]  ;;  %v1022_v43 = vld [vmem:[#allocation2 + $0x51] sm:$0xff] }
 0x146   : > { %665 = vrot.lane.b32.xlu0 %v632_v31, %s2691_s22  ;;  %v3318_v46 = vld [vmem:[#allocation2 + $0xe7] sm:$0xff]  ;;  %v3324_v47 = vld [vmem:[#allocation2 + $0xef] sm:$0xff] }
 0x147   : > { %859 = vrot.lane.b32.xlu1 %v826_v19, %s2692_s5  ;;  %629 = vst.msk [vmem:[#allocation3 + $0x70] sm:$0xff] %vm555_vm1, %v3318_v46  ;;  %630 = vst.msk [vmem:[#allocation3 + $0x78] sm:$0xff] %vm555_vm1, %v3324_v47  ;;  %v1216_v49 = vld [vmem:[#allocation2 + $0x68] sm:$0xff]  ;;  %v1217_v50 = vld [vmem:[#allocation2 + $0x70] sm:$0xff] }
 0x148   : > { %v1313_v54 = vld [vmem:[#allocation2 + $0x69] sm:$0xff]  ;;  %v1314_v55 = vld [vmem:[#allocation2 + $0x71] sm:$0xff] }
 0x149   : > { %v928_v58 = vld [vmem:[#allocation2 + $0x88] sm:$0xff]  ;;  %v929_v59 = vld [vmem:[#allocation2 + $0x90] sm:$0xff] }
 0x14a   : > { %760 = vrot.lane.b32.xlu0 %v728_v36, %s2690_s2  ;;  %v1025_v60 = vld [vmem:[#allocation2 + $0x89] sm:$0xff]  ;;  %v1026_v61 = vld [vmem:[#allocation2 + $0x91] sm:$0xff] }
 0x14b   : > { %762 = vrot.lane.b32.xlu1 %v729_v37, %s2690_s2  ;;  %v3383_v3 = vld [vmem:[#allocation2 + $0xa8] sm:$0xff]  ;;  %v3385_v4 = vld [vmem:[#allocation2 + $0xb0] sm:$0xff] }
 0x14c   : > { %v1317_v11 = vld [vmem:[#allocation2 + $0xa9] sm:$0xff]  ;;  %v1318_v12 = vld [vmem:[#allocation2 + $0xb1] sm:$0xff] }
 0x14d   : > { %v3451_v33 = vld [vmem:[#allocation2 + $0xc9] sm:$0xff]  ;;  %v3453_v34 = vld [vmem:[#allocation2 + $0xd1] sm:$0xff] }
 0x14e   : > { %861 = vrot.lane.b32.xlu0 %v3243_v21, %s2692_s5 }
 0x14f   : > { %863 = vrot.lane.b32.xlu1 %v3245_v22, %s2692_s5 }
 0x152   : > { %954 = vrot.lane.b32.xlu0 %v633_v17, %s2693_s0 }
 0x153   : > { %956 = vrot.lane.b32.xlu1 %v634_v20, %s2693_s0 }
 0x156   : > { %958 = vrot.lane.b32.xlu0 %v924_v40, %s2693_s0 }
 0x157   : > { %960 = vrot.lane.b32.xlu1 %v925_v41, %s2693_s0 }
 0x15a   : > { %1051 = vrot.lane.b32.xlu0 %v730_v16, %s2694_s29 }
 0x15b   : > { %1053 = vrot.lane.b32.xlu1 %v731_v26, %s2694_s29 }
 0x15e   : > { %1055 = vrot.lane.b32.xlu0 %v1021_v42, %s2694_s29 }
 0x15f   : > { %1057 = vrot.lane.b32.xlu1 %v1022_v43, %s2694_s29 }
 0x162   : > { %1149 = vrot.lane.b32.xlu0 %v3243_v21, %s2695_s20 }
 0x163   : > { %1151 = vrot.lane.b32.xlu1 %v3245_v22, %s2695_s20 }
 0x166   : > { %1153 = vrot.lane.b32.xlu0 %v3254_v23, %s2695_s20 }
 0x167   : > { %1155 = vrot.lane.b32.xlu1 %v3256_v24, %s2695_s20 }
 0x16a   : > { %1246 = vrot.lane.b32.xlu0 %v924_v40, %s2696_s6 }
 0x16b   : > { %1248 = vrot.lane.b32.xlu1 %v925_v41, %s2696_s6 }
 0x16e   : > { %1250 = vrot.lane.b32.xlu0 %v1216_v49, %s2696_s6 }
 0x16f   : > { %1252 = vrot.lane.b32.xlu1 %v1217_v50, %s2696_s6 }
 0x172   : > { %1343 = vrot.lane.b32.xlu0 %v1021_v42, %s2697_s16 }
 0x173   : > { %1345 = vrot.lane.b32.xlu1 %v1022_v43, %s2697_s16 }
 0x176   : > { %671 = vrot.lane.b32.xlu0 %v924_v40, %s2691_s22 }
 0x177   : > { %673 = vrot.lane.b32.xlu1 %v925_v41, %s2691_s22 }
 0x17a   : > { %1347 = vrot.lane.b32.xlu0 %v1313_v54, %s2697_s16 }
 0x17b   : > { %1349 = vrot.lane.b32.xlu1 %v1314_v55, %s2697_s16 }
 0x17e   : > { %675 = vrot.lane.b32.xlu0 %v1216_v49, %s2691_s22 }
 0x17f   : > { %677 = vrot.lane.b32.xlu1 %v1217_v50, %s2691_s22 }
 0x182   : > { %768 = vrot.lane.b32.xlu0 %v1021_v42, %s2690_s2 }
 0x183   : > { %770 = vrot.lane.b32.xlu1 %v1022_v43, %s2690_s2 }
 0x186   : > { %772 = vrot.lane.b32.xlu0 %v1313_v54, %s2690_s2 }
 0x187   : > { %774 = vrot.lane.b32.xlu1 %v1314_v55, %s2690_s2 }
 0x18a   : > { %865 = vrot.lane.b32.xlu0 %v3254_v23, %s2692_s5 }
 0x18b   : > { %867 = vrot.lane.b32.xlu1 %v3256_v24, %s2692_s5 }
 0x18e   : > { %869 = vrot.lane.b32.xlu0 %v3262_v27, %s2692_s5 }
 0x18f   : > { %871 = vrot.lane.b32.xlu1 %v3264_v28, %s2692_s5 }
 0x192   : > { %962 = vrot.lane.b32.xlu0 %v1216_v49, %s2693_s0 }
 0x193   : > { %964 = vrot.lane.b32.xlu1 %v1217_v50, %s2693_s0 }
 0x196   : > { %966 = vrot.lane.b32.xlu0 %v928_v58, %s2693_s0 }
 0x197   : > { %968 = vrot.lane.b32.xlu1 %v929_v59, %s2693_s0 }
 0x19a   : > { %1059 = vrot.lane.b32.xlu0 %v1313_v54, %s2694_s29 }
 0x19b   : > { %1061 = vrot.lane.b32.xlu1 %v1314_v55, %s2694_s29 }
 0x19e   : > { %1063 = vrot.lane.b32.xlu0 %v1025_v60, %s2694_s29 }
 0x19f   : > { %1065 = vrot.lane.b32.xlu1 %v1026_v61, %s2694_s29 }
 0x1a2   : > { %1157 = vrot.lane.b32.xlu0 %v3262_v27, %s2695_s20  ;;  %v3437_v27 = vld [vmem:[#allocation2 + $0xc8] sm:$0xff] }
 0x1a3   : > { %1159 = vrot.lane.b32.xlu1 %v3264_v28, %s2695_s20  ;;  %v3439_v28 = vld [vmem:[#allocation2 + $0xd0] sm:$0xff] }
 0x1a6   : > { %1161 = vrot.lane.b32.xlu0 %v3272_v29, %s2695_s20 }
 0x1a7   : > { %1163 = vrot.lane.b32.xlu1 %v3274_v30, %s2695_s20 }
 0x1aa   : > { %1254 = vrot.lane.b32.xlu0 %v928_v58, %s2696_s6 }
 0x1ab   : > { %1256 = vrot.lane.b32.xlu1 %v929_v59, %s2696_s6 }
 0x1ac   : > { %v765_v5 = vpop.permute.xlu0 %764 }
 0x1ad   : > { %v668_v6 = vpop.permute.xlu1 %667 }
 0x1ae   : > { %714 = vst.msk [vmem:[#allocation3 + $0x10] sm:$0xff] %vm711_vm3, %v668_v6  ;;  %1258 = vrot.lane.b32.xlu0 %v3383_v3, %s2696_s6 }
 0x1af   : > { %1260 = vrot.lane.b32.xlu1 %v3385_v4, %s2696_s6  ;;  %811 = vst.msk [vmem:[#allocation3 + $0x10] sm:$0xff] %vm808_vm4, %v765_v5 }
 0x1b0   : > { %v858_v7 = vpop.permute.xlu0 %857 }
 0x1b1   : > { %v670_v8 = vpop.permute.xlu1 %669 }
 0x1b2   : > { %715 = vst.msk [vmem:[#allocation3 + $0x18] sm:$0xff] %vm711_vm3, %v670_v8  ;;  %1351 = vrot.lane.b32.xlu0 %v1025_v60, %s2697_s16  ;;  %v840_v8 = vld [vmem:[#allocation2 + $0x10f] sm:$0xff] }
 0x1b3   : > { %1353 = vrot.lane.b32.xlu1 %v1026_v61, %s2697_s16 }
 0x1b4   : > { %v664_v9 = vpop.permute.xlu0 %663 }
 0x1b5   : > { %v767_v10 = vpop.permute.xlu1 %766  ;;  %712 = vst.msk [vmem:[#allocation3] sm:$0xff] %vm711_vm3, %v664_v9 }
 0x1b6   : > { %812 = vst.msk [vmem:[#allocation3 + $0x18] sm:$0xff] %vm808_vm4, %v767_v10  ;;  %679 = vrot.lane.b32.xlu0 %v928_v58, %s2691_s22 }
 0x1b7   : > { %681 = vrot.lane.b32.xlu1 %v929_v59, %s2691_s22  ;;  %v1321_v59 = vld [vmem:[#allocation2 + $0xe9] sm:$0xff] }
 0x1b8   : > { %v666_v13 = vpop.permute.xlu0 %665 }
 0x1b9   : > { %v860_v14 = vpop.permute.xlu1 %859  ;;  %713 = vst.msk [vmem:[#allocation3 + $0x8] sm:$0xff] %vm711_vm3, %v666_v13 }
 0x1ba   : > { %1355 = vrot.lane.b32.xlu0 %v1317_v11, %s2697_s16 }
 0x1bb   : > { %1357 = vrot.lane.b32.xlu1 %v1318_v12, %s2697_s16 }
 0x1bc   : > { %v761_v15 = vpop.permute.xlu0 %760 }
 0x1bd   : > { %v763_v16 = vpop.permute.xlu1 %762  ;;  %809 = vst.msk [vmem:[#allocation3] sm:$0xff] %vm808_vm4, %v761_v15 }
 0x1be   : > { %810 = vst.msk [vmem:[#allocation3 + $0x8] sm:$0xff] %vm808_vm4, %v763_v16  ;;  %683 = vrot.lane.b32.xlu0 %v3383_v3, %s2691_s22 }
 0x1bf   : > { %685 = vrot.lane.b32.xlu1 %v3385_v4, %s2691_s22  ;;  %906 = vst.msk [vmem:[#allocation3] sm:$0xff] %vm905_vm5, %v858_v7  ;;  %907 = vst.msk [vmem:[#allocation3 + $0x8] sm:$0xff] %vm905_vm5, %v860_v14  ;;  %v839_v7 = vld [vmem:[#allocation2 + $0x107] sm:$0xff] }
 0x1c0   : > { %v862_v17 = vpop.permute.xlu0 %861 }
 0x1c1   : > { %v864_v18 = vpop.permute.xlu1 %863  ;;  %908 = vst.msk [vmem:[#allocation3 + $0x10] sm:$0xff] %vm905_vm5, %v862_v17  ;;  %v1033_v17 = vld [vmem:[#allocation2 + $0x109] sm:$0xff] }
 0x1c2   : > { %909 = vst.msk [vmem:[#allocation3 + $0x18] sm:$0xff] %vm905_vm5, %v864_v18  ;;  %776 = vrot.lane.b32.xlu0 %v1025_v60, %s2690_s2  ;;  %v1322_v60 = vld [vmem:[#allocation2 + $0xf1] sm:$0xff] }
 0x1c3   : > { %778 = vrot.lane.b32.xlu1 %v1026_v61, %s2690_s2  ;;  %v1034_v18 = vld [vmem:[#allocation2 + $0x111] sm:$0xff] }
 0x1c4   : > { %v955_v19 = vpop.permute.xlu0 %954 }
 0x1c5   : > { %v957_v20 = vpop.permute.xlu1 %956  ;;  %1003 = vst.msk [vmem:[#allocation3] sm:$0xff] %vm1002_vm6, %v955_v19 }
 0x1c6   : > { %1004 = vst.msk [vmem:[#allocation3 + $0x8] sm:$0xff] %vm1002_vm6, %v957_v20  ;;  %780 = vrot.lane.b32.xlu0 %v1317_v11, %s2690_s2 }
 0x1c7   : > { %782 = vrot.lane.b32.xlu1 %v1318_v12, %s2690_s2 }
 0x1c8   : > { %v959_v21 = vpop.permute.xlu0 %958 }
 0x1c9   : > { %v961_v22 = vpop.permute.xlu1 %960  ;;  %1005 = vst.msk [vmem:[#allocation3 + $0x10] sm:$0xff] %vm1002_vm6, %v959_v21 }
 0x1ca   : > { %1006 = vst.msk [vmem:[#allocation3 + $0x18] sm:$0xff] %vm1002_vm6, %v961_v22  ;;  %873 = vrot.lane.b32.xlu0 %v3272_v29, %s2692_s5 }
 0x1cb   : > { %875 = vrot.lane.b32.xlu1 %v3274_v30, %s2692_s5 }
 0x1cc   : > { %v1052_v23 = vpop.permute.xlu0 %1051 }
 0x1cd   : > { %v1054_v24 = vpop.permute.xlu1 %1053  ;;  %1100 = vst.msk [vmem:[#allocation3] sm:$0xff] %vm1099_vm7, %v1052_v23  ;;  %v1131_v23 = vld [vmem:[#allocation2 + $0x127] sm:$0xff] }
 0x1ce   : > { %1101 = vst.msk [vmem:[#allocation3 + $0x8] sm:$0xff] %vm1099_vm7, %v1054_v24  ;;  %877 = vrot.lane.b32.xlu0 %v3290_v38, %s2692_s5  ;;  %v1132_v24 = vld [vmem:[#allocation2 + $0x12f] sm:$0xff] }
 0x1cf   : > { %879 = vrot.lane.b32.xlu1 %v3292_v39, %s2692_s5 }
 0x1d0   : > { %v1056_v25 = vpop.permute.xlu0 %1055 }
 0x1d1   : > { %v1058_v26 = vpop.permute.xlu1 %1057  ;;  %1102 = vst.msk [vmem:[#allocation3 + $0x10] sm:$0xff] %vm1099_vm7, %v1056_v25 }
 0x1d2   : > { %1103 = vst.msk [vmem:[#allocation3 + $0x18] sm:$0xff] %vm1099_vm7, %v1058_v26  ;;  %970 = vrot.lane.b32.xlu0 %v3383_v3, %s2693_s0 }
 0x1d3   : > { %972 = vrot.lane.b32.xlu1 %v3385_v4, %s2693_s0 }
 0x1d4   : > { %v1150_v29 = vpop.permute.xlu0 %1149 }
 0x1d5   : > { %v1152_v30 = vpop.permute.xlu1 %1151  ;;  %1198 = vst.msk [vmem:[#allocation3] sm:$0xff] %vm1197_vm8, %v1150_v29  ;;  %v1228_v29 = vld [vmem:[#allocation2 + $0x128] sm:$0xff] }
 0x1d6   : > { %1199 = vst.msk [vmem:[#allocation3 + $0x8] sm:$0xff] %vm1197_vm8, %v1152_v30  ;;  %974 = vrot.lane.b32.xlu0 %v3437_v27, %s2693_s0  ;;  %v1229_v30 = vld [vmem:[#allocation2 + $0x130] sm:$0xff] }
 0x1d7   : > { %976 = vrot.lane.b32.xlu1 %v3439_v28, %s2693_s0 }
 0x1d8   : > { %v1154_v31 = vpop.permute.xlu0 %1153 }
 0x1d9   : > { %v1156_v32 = vpop.permute.xlu1 %1155  ;;  %1200 = vst.msk [vmem:[#allocation3 + $0x10] sm:$0xff] %vm1197_vm8, %v1154_v31 }
 0x1da   : > { %1201 = vst.msk [vmem:[#allocation3 + $0x18] sm:$0xff] %vm1197_vm8, %v1156_v32  ;;  %1067 = vrot.lane.b32.xlu0 %v1317_v11, %s2694_s29 }
 0x1db   : > { %1069 = vrot.lane.b32.xlu1 %v1318_v12, %s2694_s29 }
 0x1dc   : > { %v1247_v35 = vpop.permute.xlu0 %1246 }
 0x1dd   : > { %v1249_v36 = vpop.permute.xlu1 %1248  ;;  %1295 = vst.msk [vmem:[#allocation3] sm:$0xff] %vm1294_vm9, %v1247_v35 }
 0x1de   : > { %1296 = vst.msk [vmem:[#allocation3 + $0x8] sm:$0xff] %vm1294_vm9, %v1249_v36  ;;  %1071 = vrot.lane.b32.xlu0 %v3451_v33, %s2694_s29 }
 0x1df   : > { %1073 = vrot.lane.b32.xlu1 %v3453_v34, %s2694_s29 }
 0x1e0   : > { %v1251_v37 = vpop.permute.xlu0 %1250 }
 0x1e1   : > { %v1253_v40 = vpop.permute.xlu1 %1252  ;;  %1297 = vst.msk [vmem:[#allocation3 + $0x10] sm:$0xff] %vm1294_vm9, %v1251_v37 }
 0x1e2   : > { %1298 = vst.msk [vmem:[#allocation3 + $0x18] sm:$0xff] %vm1294_vm9, %v1253_v40  ;;  %1165 = vrot.lane.b32.xlu0 %v3290_v38, %s2695_s20  ;;  %v3479_v38 = vld [vmem:[#allocation2 + $0xe8] sm:$0xff] }
 0x1e3   : > { %1167 = vrot.lane.b32.xlu1 %v3292_v39, %s2695_s20  ;;  %v3481_v39 = vld [vmem:[#allocation2 + $0xf0] sm:$0xff] }
 0x1e4   : > { %v1344_v41 = vpop.permute.xlu0 %1343  ;;  %v1325_v40 = vld [vmem:[#allocation2 + $0x129] sm:$0xff] }
 0x1e5   : > { %v1346_v42 = vpop.permute.xlu1 %1345  ;;  %1392 = vst.msk [vmem:[#allocation3] sm:$0xff] %vm1391_vm10, %v1344_v41  ;;  %v1326_v41 = vld [vmem:[#allocation2 + $0x131] sm:$0xff] }
 0x1e6   : > { %1393 = vst.msk [vmem:[#allocation3 + $0x8] sm:$0xff] %vm1391_vm10, %v1346_v42  ;;  %1169 = vrot.lane.b32.xlu0 %v3318_v46, %s2695_s20 }
 0x1e7   : > { %1171 = vrot.lane.b32.xlu1 %v3324_v47, %s2695_s20 }
 0x1e8   : > { %v672_v43 = vpop.permute.xlu0 %671 }
 0x1e9   : > { %v674_v44 = vpop.permute.xlu1 %673  ;;  %716 = vst.msk [vmem:[#allocation3 + $0x20] sm:$0xff] %vm711_vm3, %v672_v43 }
 0x1ea   : > { %717 = vst.msk [vmem:[#allocation3 + $0x28] sm:$0xff] %vm711_vm3, %v674_v44  ;;  %1262 = vrot.lane.b32.xlu0 %v3437_v27, %s2696_s6 }
 0x1eb   : > { %1264 = vrot.lane.b32.xlu1 %v3439_v28, %s2696_s6 }
 0x1ec   : > { %v1348_v45 = vpop.permute.xlu0 %1347  ;;  %v1408_v49 = vld [vmem:[#allocation3] sm:$0xff] }
 0x1ed   : > { %v1350_v48 = vpop.permute.xlu1 %1349  ;;  %v1409_v50 = vld [vmem:[#allocation3 + $0x8] sm:$0xff]  ;;  %1394 = vst.msk [vmem:[#allocation3 + $0x10] sm:$0xff] %vm1391_vm10, %v1348_v45 }
 0x1ee   : > { %1395 = vst.msk [vmem:[#allocation3 + $0x18] sm:$0xff] %vm1391_vm10, %v1350_v48  ;;  %v1424_v51 = vpack.c.bf16 %v1409_v50, %v1408_v49  ;;  %1266 = vrot.lane.b32.xlu0 %v3479_v38, %s2696_s6 }
 0x1ef   : > { %1268 = vrot.lane.b32.xlu1 %v3481_v39, %s2696_s6 }
 0x1f0   : > { %2063 = vmatprep.mubr.msk.bf16.mxu0 %vm1452_vm11, %v1424_v51  ;;  %v676_v52 = vpop.permute.xlu0 %675 }
 0x1f1   : > { %v678_v53 = vpop.permute.xlu1 %677  ;;  %718 = vst.msk [vmem:[#allocation3 + $0x30] sm:$0xff] %vm711_vm3, %v676_v52 }
 0x1f2   : > { %719 = vst.msk [vmem:[#allocation3 + $0x38] sm:$0xff] %vm711_vm3, %v678_v53  ;;  %1359 = vrot.lane.b32.xlu0 %v3451_v33, %s2697_s16 }
 0x1f3   : > { %1361 = vrot.lane.b32.xlu1 %v3453_v34, %s2697_s16 }
 0x1f4   : > { %v769_v54 = vpop.permute.xlu0 %768  ;;  %v1410_v56 = vld [vmem:[#allocation3 + $0x10] sm:$0xff] }
 0x1f5   : > { %v771_v55 = vpop.permute.xlu1 %770  ;;  %v1411_v57 = vld [vmem:[#allocation3 + $0x18] sm:$0xff]  ;;  %813 = vst.msk [vmem:[#allocation3 + $0x20] sm:$0xff] %vm808_vm4, %v769_v54 }
 0x1f6   : > { %814 = vst.msk [vmem:[#allocation3 + $0x28] sm:$0xff] %vm808_vm4, %v771_v55  ;;  %v1425_v58 = vpack.c.bf16 %v1411_v57, %v1410_v56  ;;  %687 = vrot.lane.b32.xlu0 %v3437_v27, %s2691_s22 }
 0x1f7   : > { %689 = vrot.lane.b32.xlu1 %v3439_v28, %s2691_s22 }
 0x1f8   : > { %2064 = vmatmul.mubr.msk.bf16.vlgmr.msra.gmra.mrb[0].mxu0 %vm1452_vm11, %v1425_v58  ;;  %v773_v61 = vpop.permute.xlu0 %772 }
 0x1f9   : > { %v775_v62 = vpop.permute.xlu1 %774  ;;  %815 = vst.msk [vmem:[#allocation3 + $0x30] sm:$0xff] %vm808_vm4, %v773_v61 }
 0x1fa   : > { %816 = vst.msk [vmem:[#allocation3 + $0x38] sm:$0xff] %vm808_vm4, %v775_v62  ;;  %1363 = vrot.lane.b32.xlu0 %v1321_v59, %s2697_s16 }
 0x1fb   : > { %1365 = vrot.lane.b32.xlu1 %v1322_v60, %s2697_s16 }
 0x1fc   : > { %v866_v63 = vpop.permute.xlu0 %865 }
 0x1fd   : > { %v868_v0 = vpop.permute.xlu1 %867  ;;  %910 = vst.msk [vmem:[#allocation3 + $0x20] sm:$0xff] %vm905_vm5, %v866_v63 }
 0x1fe   : > { %911 = vst.msk [vmem:[#allocation3 + $0x28] sm:$0xff] %vm905_vm5, %v868_v0  ;;  %691 = vrot.lane.b32.xlu0 %v3479_v38, %s2691_s22 }
 0x1ff   : > { %693 = vrot.lane.b32.xlu1 %v3481_v39, %s2691_s22 }
 0x200   : > { %v870_v1 = vpop.permute.xlu0 %869 }
 0x201   : > { %v872_v2 = vpop.permute.xlu1 %871  ;;  %912 = vst.msk [vmem:[#allocation3 + $0x30] sm:$0xff] %vm905_vm5, %v870_v1 }
 0x202   : > { %913 = vst.msk [vmem:[#allocation3 + $0x38] sm:$0xff] %vm905_vm5, %v872_v2  ;;  %784 = vrot.lane.b32.xlu0 %v3451_v33, %s2690_s2 }
 0x203   : > { %786 = vrot.lane.b32.xlu1 %v3453_v34, %s2690_s2 }
 0x204   : > { %v963_v3 = vpop.permute.xlu0 %962 }
 0x205   : > { %v965_v4 = vpop.permute.xlu1 %964  ;;  %1007 = vst.msk [vmem:[#allocation3 + $0x20] sm:$0xff] %vm1002_vm6, %v963_v3 }
 0x206   : > { %1008 = vst.msk [vmem:[#allocation3 + $0x28] sm:$0xff] %vm1002_vm6, %v965_v4  ;;  %788 = vrot.lane.b32.xlu0 %v1321_v59, %s2690_s2 }
 0x207   : > { %790 = vrot.lane.b32.xlu1 %v1322_v60, %s2690_s2 }
 0x208   : > { %v967_v5 = vpop.permute.xlu0 %966 }
 0x209   : > { %v969_v6 = vpop.permute.xlu1 %968  ;;  %1009 = vst.msk [vmem:[#allocation3 + $0x30] sm:$0xff] %vm1002_vm6, %v967_v5 }
 0x20a   : > { %1010 = vst.msk [vmem:[#allocation3 + $0x38] sm:$0xff] %vm1002_vm6, %v969_v6  ;;  %881 = vrot.lane.b32.xlu0 %v3318_v46, %s2692_s5  ;;  %v936_v46 = vld [vmem:[#allocation2 + $0x108] sm:$0xff] }
 0x20b   : > { %883 = vrot.lane.b32.xlu1 %v3324_v47, %s2692_s5  ;;  %v937_v47 = vld [vmem:[#allocation2 + $0x110] sm:$0xff] }
 0x20c   : > { %v1060_v9 = vpop.permute.xlu0 %1059 }
 0x20d   : > { %v1062_v10 = vpop.permute.xlu1 %1061  ;;  %1104 = vst.msk [vmem:[#allocation3 + $0x20] sm:$0xff] %vm1099_vm7, %v1060_v9 }
 0x20e   : > { %1105 = vst.msk [vmem:[#allocation3 + $0x28] sm:$0xff] %vm1099_vm7, %v1062_v10  ;;  %885 = vrot.lane.b32.xlu0 %v839_v7, %s2692_s5 }
 0x20f   : > { %887 = vrot.lane.b32.xlu1 %v840_v8, %s2692_s5 }
 0x210   : > { %v1064_v11 = vpop.permute.xlu0 %1063 }
 0x211   : > { %v1066_v12 = vpop.permute.xlu1 %1065  ;;  %1106 = vst.msk [vmem:[#allocation3 + $0x30] sm:$0xff] %vm1099_vm7, %v1064_v11 }
 0x212   : > { %1107 = vst.msk [vmem:[#allocation3 + $0x38] sm:$0xff] %vm1099_vm7, %v1066_v12  ;;  %978 = vrot.lane.b32.xlu0 %v3479_v38, %s2693_s0 }
 0x213   : > { %980 = vrot.lane.b32.xlu1 %v3481_v39, %s2693_s0 }
 0x214   : > { %v1158_v13 = vpop.permute.xlu0 %1157 }
 0x215   : > { %v1160_v14 = vpop.permute.xlu1 %1159  ;;  %1202 = vst.msk [vmem:[#allocation3 + $0x20] sm:$0xff] %vm1197_vm8, %v1158_v13 }
 0x216   : > { %1203 = vst.msk [vmem:[#allocation3 + $0x28] sm:$0xff] %vm1197_vm8, %v1160_v14  ;;  %982 = vrot.lane.b32.xlu0 %v936_v46, %s2693_s0 }
 0x217   : > { %984 = vrot.lane.b32.xlu1 %v937_v47, %s2693_s0  ;;  %s4063_s0 = sld [smem:[#allocation47_spill]] }
 0x218   : > { %v1162_v15 = vpop.permute.xlu0 %1161 }
 0x219   : > { %v1164_v16 = vpop.permute.xlu1 %1163  ;;  %1204 = vst.msk [vmem:[#allocation3 + $0x30] sm:$0xff] %vm1197_vm8, %v1162_v15 }
 0x21a   : > { %1205 = vst.msk [vmem:[#allocation3 + $0x38] sm:$0xff] %vm1197_vm8, %v1164_v16  ;;  %1075 = vrot.lane.b32.xlu0 %v1321_v59, %s2694_s29 }
 0x21b   : > { %1077 = vrot.lane.b32.xlu1 %v1322_v60, %s2694_s29 }
 0x21c   : > { %v1255_v19 = vpop.permute.xlu0 %1254 }
 0x21d   : > { %v1257_v20 = vpop.permute.xlu1 %1256  ;;  %1299 = vst.msk [vmem:[#allocation3 + $0x20] sm:$0xff] %vm1294_vm9, %v1255_v19 }
 0x21e   : > { %1300 = vst.msk [vmem:[#allocation3 + $0x28] sm:$0xff] %vm1294_vm9, %v1257_v20  ;;  %1079 = vrot.lane.b32.xlu0 %v1033_v17, %s2694_s29 }
 0x21f   : > { %1081 = vrot.lane.b32.xlu1 %v1034_v18, %s2694_s29  ;;  %s3749_s29 = scalar_lea.hbm %s4063_s0, %s2037_s28 }
 0x220   : > { %v1259_v21 = vpop.permute.xlu0 %1258 }
 0x221   : > { %v1261_v22 = vpop.permute.xlu1 %1260  ;;  %1301 = vst.msk [vmem:[#allocation3 + $0x30] sm:$0xff] %vm1294_vm9, %v1259_v21 }
 0x222   : > { %1302 = vst.msk [vmem:[#allocation3 + $0x38] sm:$0xff] %vm1294_vm9, %v1261_v22  ;;  %1173 = vrot.lane.b32.xlu0 %v839_v7, %s2695_s20 }
 0x223   : > { %1175 = vrot.lane.b32.xlu1 %v840_v8, %s2695_s20 }
 0x224   : > { %v1352_v25 = vpop.permute.xlu0 %1351 }
 0x225   : > { %v1354_v26 = vpop.permute.xlu1 %1353  ;;  %1396 = vst.msk [vmem:[#allocation3 + $0x20] sm:$0xff] %vm1391_vm10, %v1352_v25 }
 0x226   : > { %1397 = vst.msk [vmem:[#allocation3 + $0x28] sm:$0xff] %vm1391_vm10, %v1354_v26  ;;  %1177 = vrot.lane.b32.xlu0 %v1131_v23, %s2695_s20 }
 0x227   : > { %1179 = vrot.lane.b32.xlu1 %v1132_v24, %s2695_s20  ;;  %s1706_s20 = scalar_lea.sflag [#allocation6], %s3152_s27 }
 0x228   : > { %v680_v27 = vpop.permute.xlu0 %679 }
 0x229   : > { %v682_v28 = vpop.permute.xlu1 %681  ;;  %720 = vst.msk [vmem:[#allocation3 + $0x40] sm:$0xff] %vm711_vm3, %v680_v27 }
 0x22a   : > { %721 = vst.msk [vmem:[#allocation3 + $0x48] sm:$0xff] %vm711_vm3, %v682_v28  ;;  %1270 = vrot.lane.b32.xlu0 %v936_v46, %s2696_s6 }
 0x22b   : > { %1272 = vrot.lane.b32.xlu1 %v937_v47, %s2696_s6 }
 0x22c   : > { %v1356_v31 = vpop.permute.xlu0 %1355  ;;  %v1412_v33 = vld [vmem:[#allocation3 + $0x20] sm:$0xff] }
 0x22d   : > { %v1358_v32 = vpop.permute.xlu1 %1357  ;;  %v1413_v34 = vld [vmem:[#allocation3 + $0x28] sm:$0xff]  ;;  %1398 = vst.msk [vmem:[#allocation3 + $0x30] sm:$0xff] %vm1391_vm10, %v1356_v31 }
 0x22e   : > { %1399 = vst.msk [vmem:[#allocation3 + $0x38] sm:$0xff] %vm1391_vm10, %v1358_v32  ;;  %v1426_v35 = vpack.c.bf16 %v1413_v34, %v1412_v33  ;;  %1274 = vrot.lane.b32.xlu0 %v1228_v29, %s2696_s6 }
 0x22f   : > { %1276 = vrot.lane.b32.xlu1 %v1229_v30, %s2696_s6  ;;  %s2455_s6 = scalar_lea.vmem %s3737_s21, 2048 }
 0x230   : > { %2067 = vmatprep.mubr.msk.bf16.mxu0 %vm1452_vm11, %v1426_v35  ;;  %v684_v36 = vpop.permute.xlu0 %683  ;;  %p2456_p5 = scmp.ne.s32.totalorder %s3737_s21, %s2455_s6 }
 0x231   : > { %v686_v37 = vpop.permute.xlu1 %685  ;;  %722 = vst.msk [vmem:[#allocation3 + $0x50] sm:$0xff] %vm711_vm3, %v684_v36 }
 0x232   : > { %723 = vst.msk [vmem:[#allocation3 + $0x58] sm:$0xff] %vm711_vm3, %v686_v37  ;;  %1367 = vrot.lane.b32.xlu0 %v1033_v17, %s2697_s16  ;;  %p2457_p8 = pnand %p2456_p5, %p4064_p0 }
 0x233   : > { %1369 = vrot.lane.b32.xlu1 %v1034_v18, %s2697_s16 }
 0x234   : > { %v777_v42 = vpop.permute.xlu0 %776  ;;  %v1414_v44 = vld [vmem:[#allocation3 + $0x30] sm:$0xff]  ;;  %p2458_p2 = pneg %p2457_p8 }
 0x235   : > { %v779_v43 = vpop.permute.xlu1 %778  ;;  %v1415_v38 = vld [vmem:[#allocation3 + $0x38] sm:$0xff]  ;;  %817 = vst.msk [vmem:[#allocation3 + $0x40] sm:$0xff] %vm808_vm4, %v777_v42 }
 0x236   : > { %818 = vst.msk [vmem:[#allocation3 + $0x48] sm:$0xff] %vm808_vm4, %v779_v43  ;;  %v1427_v39 = vpack.c.bf16 %v1415_v38, %v1414_v44  ;;  %1371 = vrot.lane.b32.xlu0 %v1325_v40, %s2697_s16 }
 0x237   : > { %1373 = vrot.lane.b32.xlu1 %v1326_v41, %s2697_s16  ;;  %s2698_s16 = smov [#allocation15]  }
 0x238   : > { %2068 = vmatmul.mubr.msk.bf16.gmra.mrb[4].mxu0 %vm1452_vm11, %v1427_v39  ;;  %v781_v45 = vpop.permute.xlu0 %780  ;;  %s2459_s1 = sshll.u32 %s2698_s16, 4  ;;  %s2460_s1 = int_to_ptr.vmem [resolvable:$false] %s2459_s1 }
 0x239   : > { %v783_v48 = vpop.permute.xlu1 %782  ;;  %819 = vst.msk [vmem:[#allocation3 + $0x50] sm:$0xff] %vm808_vm4, %v781_v45  ;;  %s2461_s17 = scalar_lea.vmem %s2460_s1, 4096  ;;  %p2462_p9 = scmp.lt.s32.totalorder %s3737_s21, %s2460_s1 }
 0x23a   : > { %820 = vst.msk [vmem:[#allocation3 + $0x58] sm:$0xff] %vm808_vm4, %v783_v48  ;;  %p2463_p7 = scmp.lt.s32.totalorder %s2461_s17, %s2455_s6 }
 0x23c   : > { %v874_v49 = vpop.permute.xlu0 %873  ;;  %p2464_p6 = por %p2463_p7, %p2462_p9 }
 0x23d   : > { %v876_v50 = vpop.permute.xlu1 %875  ;;  %914 = vst.msk [vmem:[#allocation3 + $0x40] sm:$0xff] %vm905_vm5, %v874_v49 }
 0x23e   : > { %915 = vst.msk [vmem:[#allocation3 + $0x48] sm:$0xff] %vm905_vm5, %v876_v50  ;;  %p2465_p13 = pnand %p2464_p6, %p2458_p2 }
 0x240   : > { %v878_v51 = vpop.permute.xlu0 %877 }
 0x241   : > { %v880_v52 = vpop.permute.xlu1 %879  ;;  %916 = vst.msk [vmem:[#allocation3 + $0x50] sm:$0xff] %vm905_vm5, %v878_v51 }
 0x242   : > { %917 = vst.msk [vmem:[#allocation3 + $0x58] sm:$0xff] %vm905_vm5, %v880_v52 }
 0x244   : > { %v971_v53 = vpop.permute.xlu0 %970 }
 0x245   : > { %v973_v54 = vpop.permute.xlu1 %972  ;;  %1011 = vst.msk [vmem:[#allocation3 + $0x40] sm:$0xff] %vm1002_vm6, %v971_v53 }
 0x246   : > { %1012 = vst.msk [vmem:[#allocation3 + $0x48] sm:$0xff] %vm1002_vm6, %v973_v54 }
 0x248   : > { %v975_v55 = vpop.permute.xlu0 %974 }
 0x249   : > { %v977_v56 = vpop.permute.xlu1 %976  ;;  %1013 = vst.msk [vmem:[#allocation3 + $0x50] sm:$0xff] %vm1002_vm6, %v975_v55 }
 0x24a   : > { %1014 = vst.msk [vmem:[#allocation3 + $0x58] sm:$0xff] %vm1002_vm6, %v977_v56 }
 0x24c   : > { %v1068_v57 = vpop.permute.xlu0 %1067 }
 0x24d   : > { %v1070_v58 = vpop.permute.xlu1 %1069  ;;  %1108 = vst.msk [vmem:[#allocation3 + $0x40] sm:$0xff] %vm1099_vm7, %v1068_v57 }
 0x24e   : > { %1109 = vst.msk [vmem:[#allocation3 + $0x48] sm:$0xff] %vm1099_vm7, %v1070_v58 }
 0x250   : > { %v1072_v59 = vpop.permute.xlu0 %1071 }
 0x251   : > { %v1074_v60 = vpop.permute.xlu1 %1073  ;;  %1110 = vst.msk [vmem:[#allocation3 + $0x50] sm:$0xff] %vm1099_vm7, %v1072_v59 }
 0x252   : > { %1111 = vst.msk [vmem:[#allocation3 + $0x58] sm:$0xff] %vm1099_vm7, %v1074_v60 }
 0x254   : > { %v1166_v61 = vpop.permute.xlu0 %1165 }
 0x255   : > { %v1168_v62 = vpop.permute.xlu1 %1167  ;;  %1206 = vst.msk [vmem:[#allocation3 + $0x40] sm:$0xff] %vm1197_vm8, %v1166_v61 }
 0x256   : > { %1207 = vst.msk [vmem:[#allocation3 + $0x48] sm:$0xff] %vm1197_vm8, %v1168_v62 }
 0x258   : > { %v1170_v63 = vpop.permute.xlu0 %1169 }
 0x259   : > { %v1172_v0 = vpop.permute.xlu1 %1171  ;;  %1208 = vst.msk [vmem:[#allocation3 + $0x50] sm:$0xff] %vm1197_vm8, %v1170_v63 }
 0x25a   : > { %1209 = vst.msk [vmem:[#allocation3 + $0x58] sm:$0xff] %vm1197_vm8, %v1172_v0 }
 0x25c   : > { %v1263_v1 = vpop.permute.xlu0 %1262 }
 0x25d   : > { %v1265_v2 = vpop.permute.xlu1 %1264  ;;  %1303 = vst.msk [vmem:[#allocation3 + $0x40] sm:$0xff] %vm1294_vm9, %v1263_v1 }
 0x25e   : > { %1304 = vst.msk [vmem:[#allocation3 + $0x48] sm:$0xff] %vm1294_vm9, %v1265_v2 }
 0x260   : > { %v1267_v3 = vpop.permute.xlu0 %1266 }
 0x261   : > { %v1269_v4 = vpop.permute.xlu1 %1268  ;;  %1305 = vst.msk [vmem:[#allocation3 + $0x50] sm:$0xff] %vm1294_vm9, %v1267_v3 }
 0x262   : > { %1306 = vst.msk [vmem:[#allocation3 + $0x58] sm:$0xff] %vm1294_vm9, %v1269_v4 }
 0x264   : > { %v1360_v5 = vpop.permute.xlu0 %1359 }
 0x265   : > { %v1362_v6 = vpop.permute.xlu1 %1361  ;;  %1400 = vst.msk [vmem:[#allocation3 + $0x40] sm:$0xff] %vm1391_vm10, %v1360_v5 }
 0x266   : > { %1401 = vst.msk [vmem:[#allocation3 + $0x48] sm:$0xff] %vm1391_vm10, %v1362_v6 }
 0x268   : > { %v688_v7 = vpop.permute.xlu0 %687 }
 0x269   : > { %v690_v8 = vpop.permute.xlu1 %689  ;;  %724 = vst.msk [vmem:[#allocation3 + $0x60] sm:$0xff] %vm711_vm3, %v688_v7 }
 0x26a   : > { %725 = vst.msk [vmem:[#allocation3 + $0x68] sm:$0xff] %vm711_vm3, %v690_v8 }
 0x26c   : > { %v1364_v9 = vpop.permute.xlu0 %1363  ;;  %v1416_v11 = vld [vmem:[#allocation3 + $0x40] sm:$0xff] }
 0x26d   : > { %v1366_v10 = vpop.permute.xlu1 %1365  ;;  %v1417_v12 = vld [vmem:[#allocation3 + $0x48] sm:$0xff]  ;;  %1402 = vst.msk [vmem:[#allocation3 + $0x50] sm:$0xff] %vm1391_vm10, %v1364_v9 }
 0x26e   : > { %1403 = vst.msk [vmem:[#allocation3 + $0x58] sm:$0xff] %vm1391_vm10, %v1366_v10  ;;  %v1428_v46 = vpack.c.bf16 %v1417_v12, %v1416_v11 }
 0x270   : > { %2071 = vmatprep.mubr.msk.bf16.mxu1 %vm1452_vm11, %v1428_v46  ;;  %v692_v47 = vpop.permute.xlu0 %691 }
 0x271   : > { %v694_v13 = vpop.permute.xlu1 %693  ;;  %726 = vst.msk [vmem:[#allocation3 + $0x70] sm:$0xff] %vm711_vm3, %v692_v47 }
 0x272   : > { %727 = vst.msk [vmem:[#allocation3 + $0x78] sm:$0xff] %vm711_vm3, %v694_v13 }
 0x274   : > { %v785_v14 = vpop.permute.xlu0 %784  ;;  %v1418_v16 = vld [vmem:[#allocation3 + $0x50] sm:$0xff] }
 0x275   : > { %v787_v15 = vpop.permute.xlu1 %786  ;;  %v1419_v17 = vld [vmem:[#allocation3 + $0x58] sm:$0xff]  ;;  %821 = vst.msk [vmem:[#allocation3 + $0x60] sm:$0xff] %vm808_vm4, %v785_v14 }
 0x276   : > { %822 = vst.msk [vmem:[#allocation3 + $0x68] sm:$0xff] %vm808_vm4, %v787_v15  ;;  %v1429_v18 = vpack.c.bf16 %v1419_v17, %v1418_v16 }
 0x278   : > { %2072 = vmatmul.mubr.msk.bf16.vlgmr.msra.gmra.mrb[0].mxu1 %vm1452_vm11, %v1429_v18  ;;  %v789_v19 = vpop.permute.xlu0 %788 }
 0x279   : > { %v791_v20 = vpop.permute.xlu1 %790  ;;  %823 = vst.msk [vmem:[#allocation3 + $0x70] sm:$0xff] %vm808_vm4, %v789_v19 }
 0x27a   : > { %824 = vst.msk [vmem:[#allocation3 + $0x78] sm:$0xff] %vm808_vm4, %v791_v20 }
 0x27c   : > { %v882_v21 = vpop.permute.xlu0 %881 }
 0x27d   : > { %v884_v22 = vpop.permute.xlu1 %883  ;;  %918 = vst.msk [vmem:[#allocation3 + $0x60] sm:$0xff] %vm905_vm5, %v882_v21 }
 0x27e   : > { %919 = vst.msk [vmem:[#allocation3 + $0x68] sm:$0xff] %vm905_vm5, %v884_v22 }
 0x280   : > { %v886_v23 = vpop.permute.xlu0 %885 }
 0x281   : > { %v888_v24 = vpop.permute.xlu1 %887  ;;  %920 = vst.msk [vmem:[#allocation3 + $0x70] sm:$0xff] %vm905_vm5, %v886_v23 }
 0x282   : > { %921 = vst.msk [vmem:[#allocation3 + $0x78] sm:$0xff] %vm905_vm5, %v888_v24 }
 0x284   : > { %v979_v25 = vpop.permute.xlu0 %978 }
 0x285   : > { %v981_v26 = vpop.permute.xlu1 %980  ;;  %1015 = vst.msk [vmem:[#allocation3 + $0x60] sm:$0xff] %vm1002_vm6, %v979_v25 }
 0x286   : > { %1016 = vst.msk [vmem:[#allocation3 + $0x68] sm:$0xff] %vm1002_vm6, %v981_v26 }
 0x288   : > { %v983_v27 = vpop.permute.xlu0 %982 }
 0x289   : > { %v985_v28 = vpop.permute.xlu1 %984  ;;  %1017 = vst.msk [vmem:[#allocation3 + $0x70] sm:$0xff] %vm1002_vm6, %v983_v27 }
 0x28a   : > { %1018 = vst.msk [vmem:[#allocation3 + $0x78] sm:$0xff] %vm1002_vm6, %v985_v28 }
 0x28c   : > { %v1076_v29 = vpop.permute.xlu0 %1075 }
 0x28d   : > { %v1078_v30 = vpop.permute.xlu1 %1077  ;;  %1112 = vst.msk [vmem:[#allocation3 + $0x60] sm:$0xff] %vm1099_vm7, %v1076_v29 }
 0x28e   : > { %1113 = vst.msk [vmem:[#allocation3 + $0x68] sm:$0xff] %vm1099_vm7, %v1078_v30 }
 0x290   : > { %v1080_v31 = vpop.permute.xlu0 %1079 }
 0x291   : > { %v1082_v32 = vpop.permute.xlu1 %1081  ;;  %1114 = vst.msk [vmem:[#allocation3 + $0x70] sm:$0xff] %vm1099_vm7, %v1080_v31 }
 0x292   : > { %1115 = vst.msk [vmem:[#allocation3 + $0x78] sm:$0xff] %vm1099_vm7, %v1082_v32 }
 0x294   : > { %v1174_v33 = vpop.permute.xlu0 %1173 }
 0x295   : > { %v1176_v34 = vpop.permute.xlu1 %1175  ;;  %1210 = vst.msk [vmem:[#allocation3 + $0x60] sm:$0xff] %vm1197_vm8, %v1174_v33 }
 0x296   : > { %1211 = vst.msk [vmem:[#allocation3 + $0x68] sm:$0xff] %vm1197_vm8, %v1176_v34 }
 0x298   : > { %v1178_v35 = vpop.permute.xlu0 %1177 }
 0x299   : > { %v1180_v36 = vpop.permute.xlu1 %1179  ;;  %1212 = vst.msk [vmem:[#allocation3 + $0x70] sm:$0xff] %vm1197_vm8, %v1178_v35 }
 0x29a   : > { %1213 = vst.msk [vmem:[#allocation3 + $0x78] sm:$0xff] %vm1197_vm8, %v1180_v36 }
 0x29c   : > { %v1271_v37 = vpop.permute.xlu0 %1270 }
 0x29d   : > { %v1273_v40 = vpop.permute.xlu1 %1272  ;;  %1307 = vst.msk [vmem:[#allocation3 + $0x60] sm:$0xff] %vm1294_vm9, %v1271_v37 }
 0x29e   : > { %1308 = vst.msk [vmem:[#allocation3 + $0x68] sm:$0xff] %vm1294_vm9, %v1273_v40 }
 0x2a0   : > { %v1275_v41 = vpop.permute.xlu0 %1274 }
 0x2a1   : > { %v1277_v42 = vpop.permute.xlu1 %1276  ;;  %1309 = vst.msk [vmem:[#allocation3 + $0x70] sm:$0xff] %vm1294_vm9, %v1275_v41 }
 0x2a2   : > { %1310 = vst.msk [vmem:[#allocation3 + $0x78] sm:$0xff] %vm1294_vm9, %v1277_v42 }
 0x2a4   : > { %v1368_v43 = vpop.permute.xlu0 %1367 }
 0x2a5   : > { %v1370_v44 = vpop.permute.xlu1 %1369  ;;  %1404 = vst.msk [vmem:[#allocation3 + $0x60] sm:$0xff] %vm1391_vm10, %v1368_v43 }
 0x2a6   : > { %1405 = vst.msk [vmem:[#allocation3 + $0x68] sm:$0xff] %vm1391_vm10, %v1370_v44 }
 0x2a8   : > { %v1372_v38 = vpop.permute.xlu0 %1371 }
 0x2a9   : > { %v1374_v39 = vpop.permute.xlu1 %1373  ;;  %1406 = vst.msk [vmem:[#allocation3 + $0x70] sm:$0xff] %vm1391_vm10, %v1372_v38 }
 0x2aa   : > { %1407 = vst.msk [vmem:[#allocation3 + $0x78] sm:$0xff] %vm1391_vm10, %v1374_v39 }
 0x2ac   : > { %v1420_v45 = vld [vmem:[#allocation3 + $0x60] sm:$0xff] }
 0x2ad   : > { %v1421_v48 = vld [vmem:[#allocation3 + $0x68] sm:$0xff] }
 0x2ae   : > { %v1430_v49 = vpack.c.bf16 %v1421_v48, %v1420_v45 }
 0x2b0   : > { %2075 = vmatprep.mubr.msk.bf16.mxu1 %vm1452_vm11, %v1430_v49  ;;  %v1422_v50 = vld [vmem:[#allocation3 + $0x70] sm:$0xff] }
 0x2b1   : > { %v1423_v51 = vld [vmem:[#allocation3 + $0x78] sm:$0xff] }
 0x2b2   : > { %v1431_v52 = vpack.c.bf16 %v1423_v51, %v1422_v50 }
 0x2b4   : > { %2076 = vmatmul.mubr.msk.bf16.gmra.mrb[4].mxu1 %vm1452_vm11, %v1431_v52 }
 0x2cb   : > { %v3639_v53 = vpop.f32.mrb[0].mxu0 }
 0x2cc   : > { %1581 = vst.msk [vmem:[%s3643_s24 + $0x10] sm:$0xff] %vm1578_vm12, %v3639_v53  ;;  %v3648_v54 = vpop.f32.mrb[1].mxu0  ;;  %v1598_v60 = vsel %vm1578_vm12, %v3639_v53, 0.0 }
 0x2cd   : > { %1579 = vst.msk [vmem:[%s3643_s24] sm:$0xff] %vm1578_vm12, %v3648_v54  ;;  %v3653_v55 = vpop.f32.mrb[2].mxu0  ;;  %v1595_v57 = vsel %vm1578_vm12, %v3648_v54, 0.0 }
 0x2ce   : > { %1582 = vst.msk [vmem:[%s3643_s24 + $0x18] sm:$0xff] %vm1578_vm12, %v3653_v55  ;;  %v3658_v56 = vpop.f32.mrb[3].mxu0  ;;  %v1600_v62 = vsel %vm1578_vm12, %v3653_v55, 0.0 }
 0x2cf   : > { %1580 = vst.msk [vmem:[%s3643_s24 + $0x8] sm:$0xff] %vm1578_vm12, %v3658_v56  ;;  %v1596_v58 = vsel %vm1578_vm12, %v3658_v56, 0.0 }
 0x2d0   : > { %v1597_v59 = vadd.f32 %v1596_v58, %v1595_v57 }
 0x2d2   : > { %v1599_v61 = vadd.f32 %v1598_v60, %v1597_v59 }
 0x2d4   : > { %v1601_v63 = vadd.f32 %v1600_v62, %v1599_v61 }
 0x30b   : > { %v3671_v0 = vpop.f32.mrb[4].mxu0 }
 0x30c   : > { %1585 = vst.msk [vmem:[%s3643_s24 + $0x30] sm:$0xff] %vm1578_vm12, %v3671_v0  ;;  %v3676_v1 = vpop.f32.mrb[5].mxu0  ;;  %v1606_v8 = vsel %vm1578_vm12, %v3671_v0, 0.0 }
 0x30d   : > { %1583 = vst.msk [vmem:[%s3643_s24 + $0x20] sm:$0xff] %vm1578_vm12, %v3676_v1  ;;  %v1602_v2 = vsel %vm1578_vm12, %v3676_v1, 0.0  ;;  %v3683_v3 = vpop.f32.mrb[6].mxu0 }
 0x30e   : > { %v1603_v4 = vadd.f32 %v1602_v2, %v1601_v63  ;;  %1586 = vst.msk [vmem:[%s3643_s24 + $0x38] sm:$0xff] %vm1578_vm12, %v3683_v3  ;;  %v3688_v5 = vpop.f32.mrb[7].mxu0  ;;  %v1608_v10 = vsel %vm1578_vm12, %v3683_v3, 0.0 }
 0x30f   : > { %1584 = vst.msk [vmem:[%s3643_s24 + $0x28] sm:$0xff] %vm1578_vm12, %v3688_v5  ;;  %v1604_v6 = vsel %vm1578_vm12, %v3688_v5, 0.0 }
 0x310   : > { %v1605_v7 = vadd.f32 %v1604_v6, %v1603_v4 }
 0x312   : > { %v1607_v9 = vadd.f32 %v1606_v8, %v1605_v7 }
 0x314   : > { %v1609_v11 = vadd.f32 %v1608_v10, %v1607_v9 }
 0x34b   : > { %v3699_v12 = vpop.f32.mrb[0].mxu1 }
 0x34c   : > { %1589 = vst.msk [vmem:[%s3643_s24 + $0x50] sm:$0xff] %vm1578_vm12, %v3699_v12  ;;  %v3704_v46 = vpop.f32.mrb[1].mxu1  ;;  %v1614_v18 = vsel %vm1578_vm12, %v3699_v12, 0.0 }
 0x34d   : > { %1587 = vst.msk [vmem:[%s3643_s24 + $0x40] sm:$0xff] %vm1578_vm12, %v3704_v46  ;;  %v1610_v47 = vsel %vm1578_vm12, %v3704_v46, 0.0  ;;  %v3711_v13 = vpop.f32.mrb[2].mxu1 }
 0x34e   : > { %v1611_v14 = vadd.f32 %v1610_v47, %v1609_v11  ;;  %1590 = vst.msk [vmem:[%s3643_s24 + $0x58] sm:$0xff] %vm1578_vm12, %v3711_v13  ;;  %v3716_v15 = vpop.f32.mrb[3].mxu1  ;;  %v1616_v20 = vsel %vm1578_vm12, %v3711_v13, 0.0 }
 0x34f   : > { %1588 = vst.msk [vmem:[%s3643_s24 + $0x48] sm:$0xff] %vm1578_vm12, %v3716_v15  ;;  %v1612_v16 = vsel %vm1578_vm12, %v3716_v15, 0.0 }
 0x350   : > { %v1613_v17 = vadd.f32 %v1612_v16, %v1611_v14 }
 0x352   : > { %v1615_v19 = vadd.f32 %v1614_v18, %v1613_v17 }
 0x354   : > { %v1617_v21 = vadd.f32 %v1616_v20, %v1615_v19 }
 0x387   : > { %v3730_v22 = vpop.f32.mrb[4].mxu1 }
 0x388   : > { %1593 = vst.msk [vmem:[%s3643_s24 + $0x70] sm:$0xff] %vm1578_vm12, %v3730_v22  ;;  %v3735_v23 = vpop.f32.mrb[5].mxu1 }
 0x389   : > { %1591 = vst.msk [vmem:[%s3643_s24 + $0x60] sm:$0xff] %vm1578_vm12, %v3735_v23  ;;  %v1618_v24 = vsel %vm1578_vm12, %v3735_v23, 0.0  ;;  %v3744_v25 = vpop.f32.mrb[6].mxu1 }
 0x38a   : > { %v1619_v26 = vadd.f32 %v1618_v24, %v1617_v21  ;;  %1594 = vst.msk [vmem:[%s3643_s24 + $0x78] sm:$0xff] %vm1578_vm12, %v3744_v25  ;;  %v3754_v27 = vpop.f32.mrb[7].mxu1 }
 0x38b   : > { %1592 = vst.msk [vmem:[%s3643_s24 + $0x68] sm:$0xff] %vm1578_vm12, %v3754_v27  ;;  %v1620_v28 = vsel %vm1578_vm12, %v3754_v27, 0.0 }
 0x38c   : > { %v1621_v29 = vadd.f32 %v1620_v28, %v1619_v26 }
 0x38d   : > { %2468 = shalt.err (!%p2465_p13)
}
 0x38e   : > { %s2469_s24 = scalar_lea.hbm %s3749_s29, 2048  ;;  %s2473_s25 = scalar_lea.hbm %s4063_s0, 8192 }
 0x38f   : > { %p2470_p11 = scmp.ne.s32.totalorder %s3749_s29, %s2469_s24  ;;  %p2474_p3 = scmp.lt.u32.totalorder %s3749_s29, %s4063_s0 }
 0x390   : > { %p2475_p12 = scmp.lt.u32.totalorder %s2473_s25, %s2469_s24  ;;  %p2477_p5 = scmp.lt.u32.totalorder %s2469_s24, %s3749_s29 }
 0x391   : > { %p2471_p10 = pnand %p2470_p11, %p4064_p0 }
 0x392   : > { %p2476_p4 = por %p2475_p12, %p2474_p3 }
 0x393   : > { %p2472_p1 = pneg %p2471_p10 }
 0x394   : > { %p2478_p8 = por %p2477_p5, %p2476_p4 }
 0x396   : > { %p2479_p2 = pnand %p2478_p8, %p2472_p1 }
 0x398   : > { %2482 = shalt.err (!%p2479_p2)
}
 0x399   : > { %s2699_s5 = smov 128   ;;  %v1622_v30 = vsel %vm1578_vm12, %v3730_v22, 0.0  ;;  %v1624_v32 = vsel %vm1578_vm12, %v3744_v25, 0.0  ;;  %s2038_s6 = sshll.u32 %s4062_s4, 1  ;;  %vm1702_vm13 = vcmask 57344  }
 0x39a   : > { %2105 = dma.vmem_to_hbm [thread:$0]  (%p4064_p0), %s3737_s21, 2048, %s3749_s29, %s1706_s20, %s2699_s5, %s2699_s5, %s2690_s2   ;;  %v1623_v31 = vadd.f32 %v1622_v30, %v1621_v29 }
 0x39b   : > { %s3792_s16 = sadd.s32 %s4061_s23, %s2038_s6  ;;  %s505_s21 = scalar_lea.vmem [#allocation16], %s3152_s27 }
 0x39c   : > { %v1625_v33 = vadd.f32 %v1624_v32, %v1623_v31  ;;  %s2039_s2 = sshll.u32 %s3792_s16, 4  ;;  %s1748_s29 = sshll.u32 %s505_s21, 4  ;;  %s3803_s29 = int_to_ptr.vmem [resolvable:$true] %s1748_s29 }
 0x39d   : > { %s4065_s17 = sld [smem:[#allocation48_spill]]  ;;  %s3808_s23 = scalar_lea.sflag [#allocation17], %s436_s14 }
 0x39e   : > { %v1626_v34 = vrot.slane %v1625_v33, 4  ;;  %s2483_s4 = scalar_lea.vmem %s3803_s29, 16  ;;  %s2700_s9 = smov [#allocation16]  }
 0x39f   : > { %p2484_p9 = scmp.ne.s32.totalorder %s3803_s29, %s2483_s4  ;;  %s2487_s25 = sshll.u32 %s2700_s9, 4  ;;  %s2488_s25 = int_to_ptr.vmem [resolvable:$false] %s2487_s25 }
 0x3a0   : > { %v1627_v35 = vadd.f32 %v1626_v34, %v1625_v33  ;;  %s2489_s28 = scalar_lea.vmem %s2488_s25, 32  ;;  %p2490_p13 = scmp.lt.s32.totalorder %s3803_s29, %s2488_s25 }
 0x3a1   : > { %p2485_p7 = pnand %p2484_p9, %p4064_p0  ;;  %p2491_p11 = scmp.lt.s32.totalorder %s2489_s28, %s2483_s4 }
 0x3a2   : > { %v1628_v36 = vrot.slane %v1627_v35, 2 }
 0x3a3   : > { %s4066_s24 = smov %s4065_s17  ;;  %s3801_s26 = scalar_lea.hbm %s4065_s17, %s2039_s2 }
 0x3a4   : > { %v1629_v37 = vadd.f32 %v1628_v36, %v1627_v35  ;;  %p2486_p6 = pneg %p2485_p7  ;;  %p2492_p10 = por %p2491_p11, %p2490_p13 }
 0x3a6   : > { %v1630_v40 = vrot.slane %v1629_v37, 1  ;;  %p2493_p1 = pnand %p2492_p10, %p2486_p6 }
 0x3a8   : > { %v1631_v41 = vadd.f32 %v1630_v40, %v1629_v37 }
 0x3aa   : > { %v1632_v42 = vmul.f32 0.0078125, %v1631_v41  ;;  %1703 = vst.msk [vmem:[%s505_s21] sm:$0x1] %vm1702_vm13, %v1631_v41 }
 0x3ab   : > { %2496 = shalt.err (!%p2493_p1)
}
 0x3ac   : > { %s2497_s19 = scalar_lea.hbm %s3801_s26, 16  ;;  %s2501_s5 = scalar_lea.hbm %s4066_s24, 64 }
 0x3ad   : > { %p2498_p3 = scmp.ne.s32.totalorder %s3801_s26, %s2497_s19  ;;  %p2502_p5 = scmp.lt.u32.totalorder %s3801_s26, %s4066_s24 }
 0x3ae   : > { %p2503_p8 = scmp.lt.u32.totalorder %s2501_s5, %s2497_s19  ;;  %p2505_p9 = scmp.lt.u32.totalorder %s2497_s19, %s3801_s26 }
 0x3af   : > { %p2499_p12 = pnand %p2498_p3, %p4064_p0 }
 0x3b0   : > { %p2504_p2 = por %p2503_p8, %p2502_p5 }
 0x3b1   : > { %p2500_p4 = pneg %p2499_p12 }
 0x3b2   : > { %p2506_p7 = por %p2505_p9, %p2504_p2 }
 0x3b4   : > { %p2507_p6 = pnand %p2506_p7, %p2500_p4 }
 0x3b6   : > { %2510 = shalt.err (!%p2507_p6)
}
 0x3b7   : > { %2106 = dma.vmem_to_hbm [thread:$0]  (%p4064_p0), %s3803_s29, 16, %s3801_s26, %s3808_s23   ;;  %v1633_v43 = vsub.f32 %v3648_v54, %v1632_v42  ;;  %v1634_v44 = vsub.f32 %v3658_v56, %v1632_v42  ;;  %v1635_v38 = vsub.f32 %v3639_v53, %v1632_v42  ;;  %v1636_v39 = vsub.f32 %v3653_v55, %v1632_v42 }
 0x3b8   : > { %v1637_v45 = vsub.f32 %v3676_v1, %v1632_v42  ;;  %v1638_v48 = vsub.f32 %v3688_v5, %v1632_v42  ;;  %v1639_v49 = vsub.f32 %v3671_v0, %v1632_v42  ;;  %v1640_v50 = vsub.f32 %v3683_v3, %v1632_v42  ;;  %s511_s29 = scalar_lea.vmem [#allocation18], %s3152_s27  ;;  %s4067_s26 = sld [smem:[#allocation49_spill]] }
 0x3b9   : > { %v1641_v51 = vsub.f32 %v3704_v46, %v1632_v42  ;;  %v1642_v52 = vsub.f32 %v3716_v15, %v1632_v42  ;;  %v1643_v54 = vsub.f32 %v3699_v12, %v1632_v42  ;;  %v1644_v56 = vsub.f32 %v3711_v13, %v1632_v42  ;;  %s1763_s20 = sshll.u32 %s511_s29, 4  ;;  %s2701_s25 = smov [#allocation18]   ;;  %s1764_s20 = int_to_ptr.vmem [resolvable:$true] %s1763_s20 }
 0x3ba   : > { %v1645_v53 = vsub.f32 %v3735_v23, %v1632_v42  ;;  %v1646_v55 = vsub.f32 %v3754_v27, %v1632_v42  ;;  %v1647_v57 = vsub.f32 %v3730_v22, %v1632_v42  ;;  %v1648_v58 = vsub.f32 %v3744_v25, %v1632_v42  ;;  %s2511_s9 = scalar_lea.vmem %s1764_s20, 16  ;;  %s2515_s28 = sshll.u32 %s2701_s25, 4  ;;  %s2516_s28 = int_to_ptr.vmem [resolvable:$false] %s2515_s28 }
 0x3bb   : > { %v1649_v59 = vmul.f32 %v1633_v43, %v1633_v43  ;;  %v1650_v60 = vmul.f32 %v1634_v44, %v1634_v44  ;;  %v1651_v61 = vmul.f32 %v1635_v38, %v1635_v38  ;;  %v1652_v62 = vmul.f32 %v1636_v39, %v1636_v39  ;;  %p2512_p13 = scmp.ne.s32.totalorder %s1764_s20, %s2511_s9  ;;  %s2517_s27 = scalar_lea.vmem %s2516_s28, 32 }
 0x3bc   : > { %v1653_v2 = vmul.f32 %v1637_v45, %v1637_v45  ;;  %v1654_v5 = vmul.f32 %v1638_v48, %v1638_v48  ;;  %v1655_v8 = vmul.f32 %v1639_v49, %v1639_v49  ;;  %v1656_v11 = vmul.f32 %v1640_v50, %v1640_v50  ;;  %p2518_p1 = scmp.lt.s32.totalorder %s1764_s20, %s2516_s28  ;;  %p2519_p3 = scmp.lt.s32.totalorder %s2517_s27, %s2511_s9 }
 0x3bd   : > { %v1665_v63 = vsel %vm1578_vm12, %v1649_v59, 0.0  ;;  %v1666_v0 = vsel %vm1578_vm12, %v1650_v60, 0.0  ;;  %v1668_v3 = vsel %vm1578_vm12, %v1651_v61, 0.0  ;;  %v1670_v6 = vsel %vm1578_vm12, %v1652_v62, 0.0  ;;  %p2513_p11 = pnand %p2512_p13, %p4064_p0 }
 0x3be   : > { %v1667_v1 = vadd.f32 %v1666_v0, %v1665_v63  ;;  %v1672_v9 = vsel %vm1578_vm12, %v1653_v2, 0.0  ;;  %v1674_v12 = vsel %vm1578_vm12, %v1654_v5, 0.0  ;;  %v1657_v47 = vmul.f32 %v1641_v51, %v1641_v51  ;;  %s3870_s4 = scalar_lea.hbm %s4067_s26, %s2039_s2  ;;  %p2520_p12 = por %p2519_p3, %p2518_p1 }
 0x3bf   : > { %v1676_v13 = vsel %vm1578_vm12, %v1655_v8, 0.0  ;;  %v1658_v15 = vmul.f32 %v1642_v52, %v1642_v52  ;;  %v1678_v16 = vsel %vm1578_vm12, %v1656_v11, 0.0  ;;  %v1659_v18 = vmul.f32 %v1643_v54, %v1643_v54  ;;  %p2514_p10 = pneg %p2513_p11 }
 0x3c0   : > { %v1669_v4 = vadd.f32 %v1668_v3, %v1667_v1  ;;  %v1680_v19 = vsel %vm1578_vm12, %v1657_v47, 0.0  ;;  %v1660_v21 = vmul.f32 %v1644_v56, %v1644_v56  ;;  %v1661_v24 = vmul.f32 %v1645_v53, %v1645_v53 }
 0x3c1   : > { %v1682_v22 = vsel %vm1578_vm12, %v1658_v15, 0.0  ;;  %v1684_v25 = vsel %vm1578_vm12, %v1659_v18, 0.0  ;;  %v1662_v27 = vmul.f32 %v1646_v55, %v1646_v55  ;;  %v1663_v30 = vmul.f32 %v1647_v57, %v1647_v57  ;;  %p2521_p4 = pnand %p2520_p12, %p2514_p10 }
 0x3c2   : > { %v1671_v7 = vadd.f32 %v1670_v6, %v1669_v4  ;;  %v1686_v28 = vsel %vm1578_vm12, %v1660_v21, 0.0  ;;  %v1688_v31 = vsel %vm1578_vm12, %v1661_v24, 0.0  ;;  %v1664_v33 = vmul.f32 %v1648_v58, %v1648_v58 }
 0x3c3   : > { %v1690_v34 = vsel %vm1578_vm12, %v1662_v27, 0.0  ;;  %v1692_v36 = vsel %vm1578_vm12, %v1663_v30, 0.0 }
 0x3c4   : > { %v1673_v10 = vadd.f32 %v1672_v9, %v1671_v7  ;;  %v1694_v40 = vsel %vm1578_vm12, %v1664_v33, 0.0 }
 0x3c6   : > { %v1675_v46 = vadd.f32 %v1674_v12, %v1673_v10 }
 0x3c8   : > { %v1677_v14 = vadd.f32 %v1676_v13, %v1675_v46 }
 0x3ca   : > { %v1679_v17 = vadd.f32 %v1678_v16, %v1677_v14 }
 0x3cc   : > { %v1681_v20 = vadd.f32 %v1680_v19, %v1679_v17 }
 0x3ce   : > { %v1683_v23 = vadd.f32 %v1682_v22, %v1681_v20 }
 0x3d0   : > { %v1685_v26 = vadd.f32 %v1684_v25, %v1683_v23 }
 0x3d2   : > { %v1687_v29 = vadd.f32 %v1686_v28, %v1685_v26 }
 0x3d4   : > { %v1689_v32 = vadd.f32 %v1688_v31, %v1687_v29 }
 0x3d6   : > { %v1691_v35 = vadd.f32 %v1690_v34, %v1689_v32 }
 0x3d8   : > { %v1693_v37 = vadd.f32 %v1692_v36, %v1691_v35 }
 0x3da   : > { %v1695_v41 = vadd.f32 %v1694_v40, %v1693_v37 }
 0x3dc   : > { %v1696_v42 = vrot.slane %v1695_v41, 4 }
 0x3de   : > { %v1697_v43 = vadd.f32 %v1696_v42, %v1695_v41 }
 0x3e0   : > { %v1698_v44 = vrot.slane %v1697_v43, 2 }
 0x3e2   : > { %v1699_v38 = vadd.f32 %v1698_v44, %v1697_v43 }
 0x3e4   : > { %v1700_v39 = vrot.slane %v1699_v38, 1 }
 0x3e6   : > { %v1701_v45 = vadd.f32 %v1700_v39, %v1699_v38 }
 0x3e8   : > { %1704 = vst.msk [vmem:[%s511_s29] sm:$0x1] %vm1702_vm13, %v1701_v45 }
 0x3e9   : > { %2524 = shalt.err (!%p2521_p4)
}
 0x3ea   : > { %s2525_s16 = scalar_lea.hbm %s3870_s4, 16  ;;  %s2529_s14 = scalar_lea.hbm %s4067_s26, 64 }
 0x3eb   : > { %p2526_p5 = scmp.ne.s32.totalorder %s3870_s4, %s2525_s16  ;;  %p2530_p9 = scmp.lt.u32.totalorder %s3870_s4, %s4067_s26 }
 0x3ec   : > { %p2531_p7 = scmp.lt.u32.totalorder %s2529_s14, %s2525_s16  ;;  %p2533_p13 = scmp.lt.u32.totalorder %s2525_s16, %s3870_s4 }
 0x3ed   : > { %p2527_p8 = pnand %p2526_p5, %p4064_p0 }
 0x3ee   : > { %p2532_p6 = por %p2531_p7, %p2530_p9 }
 0x3ef   : > { %p2528_p2 = pneg %p2527_p8 }
 0x3f0   : > { %p2534_p11 = por %p2533_p13, %p2532_p6 }
 0x3f2   : > { %p2535_p10 = pnand %p2534_p11, %p2528_p2 }
 0x3f4   : > { %2538 = shalt.err (!%p2535_p10)
}
 0x3f5   : > { %2107 = dma.vmem_to_hbm [thread:$0]  (%p4064_p0), %s1764_s20, 16, %s3870_s4, %s3808_s23  }
 0x3f6 PF: > { %p2148_p1 = scmp.ge.s32.totalorder %s2677_s18, 2  ;;  %s1775_s6 = sand.u32 1, %s2649_s11  }
 0x3f7   : > { %p4068_p3 = scmp.ne.s32.totalorder %s4031_s8, 0  ;;  %s1776_s21 = scalar_lea.sflag [#allocation6], %s1775_s6 }
 0x3f9   : > { %p2132_p12 = pnand %p2148_p1, %p4068_p3 }
 0x3fb   : > { %2616 = dma.done.wait (!%p2132_p12), %s1776_s21, 2048  }
 0x3fc   : > { %2618 = vsyncadd (!%p2132_p12), %s1776_s21, 4294965248  ;;  %s4069_s29 = sadd.s32 4294967294, %s2677_s18  }
 0x3fd   : > { %s1784_s1 = sand.u32 1, %s4069_s29  }
 0x3fe   : > { %s1785_s17 = scalar_lea.sflag [#allocation17], %s1784_s1 }
 0x3ff   : > { %2620 = dma.done.wait (!%p2132_p12), %s1785_s17, 32  }
 0x400   : > { %2622 = vsyncadd (!%p2132_p12), %s1785_s17, 4294967264  ;;  %s33_s18 = sadd.s32 1, %s2677_s18   ;;  %s4071_s27 = sld [smem:[#allocation27_spill]] }
 0x401   : > { %p3898_p0 = scmp.ge.s32.totalorder %s33_s18, 6   ;;  %s4072_s28 = sld [smem:[#allocation28_spill]] }
 0x402   : > { %s4073_s11 = sld [smem:[#allocation29_spill]]  ;;  %s4074_s8 = smov %s2906_s30 }
 0x403   : > { %s4075_s23 = sld [smem:[#allocation40_spill]]  ;;  %s4076_s14 = sld [smem:[#allocation32_spill]] }
 0x404   : > { %s4077_s20 = sld [smem:[#allocation33_spill]]  ;;  %s4078_s16 = sld [smem:[#allocation35_spill]] }
 0x405   : > { %s4079_s17 = sld [smem:[#allocation36_spill]]  ;;  %s4081_s29 = smov %s4104_s7 }
 0x406   : > { %s4083_s9 = smov %s2645_s10  ;;  %s4084_s10 = smov %s4074_s8 }
 0x407   :  { %32 = sbr.rel (!%p3898_p0) target bundleno = 26 (0x1a), region = 160 }
 0x408   : > { %s4082_s30 = smov %s4073_s11  ;;  %s4085_s11 = smov %s2653_s12 }
 0x409   : > { %s4086_s12 = smov %s2657_s13  ;;  %s4087_s13 = smov %s4075_s23 }
 0x40a   : > { %s4088_s15 = smov %s4077_s20 }
 0x40e   :  { %1797 = vsyncpa [#allocation5], 1 }
 0x40f   :  { %1799 = vsyncpa [#allocation5 + $0x1], 1 }
 0x410   :  { %1800 = vsyncpa [#allocation8], 1 }
 0x411   :  { %1802 = vsyncpa [#allocation8 + $0x1], 1 }
 0x412   :  { %1803 = vsyncpa [#allocation11], 1 }
 0x413   :  { %1804 = vsyncpa [#allocation14], 1 }
 0x414   :  { %1805 = vsyncpa [#allocation6], 1 }
 0x415   :  { %1807 = vsyncpa [#allocation6 + $0x1], 1 }
 0x416   :  { %1808 = vsyncpa [#allocation17], 1 }
 0x417   :  { %1810 = vsyncpa [#allocation17 + $0x1], 1 }

// kernel: double_conv_forward.4
= control target key start
LH: loop header
LB: loop body
LE: loop exit
PB: predicated region body
PF: predicated region fallthrough
CT: control target
= control target key end

     0   :  { %s4156_s0 = inlined_call_operand.hbm [shape: f32[2,16,16,8], index: 0, kind: input, shape index: {}, may-alias: {0,1,2}]   ;;  %s4157_s1 = inlined_call_operand.hbm [shape: f32[2,16,16,8], index: 1, kind: input, shape index: {}, may-alias: {0,1,2}]   ;;  %s4158_s2 = inlined_call_operand.hbm [shape: f32[2,16,16,8], index: 2, kind: input, shape index: {}, may-alias: {0,1,2}]   ;;  %s4159_s3 = inlined_call_operand.hbm [shape: bf16[72,8], index: 3, kind: input, shape index: {}]   ;;  %s4160_s4 = inlined_call_operand.hbm [shape: f32[1,1,8], index: 4, kind: input, shape index: {}]   ;;  %s4161_s5 = inlined_call_operand.hbm [shape: f32[1,1,8], index: 5, kind: input, shape index: {}]   ;;  %s4162_s6 = inlined_call_operand.hbm [shape: f32[2,16,16,8], index: 6, kind: output, shape index: {0}]   ;;  %s4163_s7 = inlined_call_operand.hbm [shape: f32[2,2,1,8], index: 7, kind: output, shape index: {1}]   ;;  %s4164_s8 = inlined_call_operand.hbm [shape: f32[2,2,1,8], index: 8, kind: output, shape index: {2}]  }
   0x1   :  { %4200 = sst [smem:[#allocation41_spill]] %s4156_s0 }
   0x2   :  { %4201 = sst [smem:[#allocation42_spill]] %s4157_s1 }
   0x3   :  { %4202 = sst [smem:[#allocation43_spill]] %s4158_s2 }
   0x4   :  { %4203 = sst [smem:[#allocation44_spill]] %s4159_s3 }
   0x5   :  { %4204 = sst [smem:[#allocation45_spill]] %s4160_s4 }
   0x6   :  { %4205 = sst [smem:[#allocation46_spill]] %s4161_s5 }
   0x7   :  { %4206 = sst [smem:[#allocation47_spill]] %s4162_s6 }
   0x8   :  { %4207 = sst [smem:[#allocation48_spill]] %s4163_s7 }
   0x9   :  { %4208 = sst [smem:[#allocation49_spill]] %s4164_s8 }
   0xa   :  { %14 = vsyncpa [#allocation5], 0 }
   0xb   :  { %16 = vsyncpa [#allocation5 + $0x1], 0 }
   0xc   :  { %17 = vsyncpa [#allocation8], 0 }
   0xd   :  { %19 = vsyncpa [#allocation8 + $0x1], 0 }
   0xe   :  { %20 = vsyncpa [#allocation11], 0 }
   0xf   :  { %21 = vsyncpa [#allocation14], 0 }
  0x10   :  { %22 = vsyncpa [#allocation6], 0 }
  0x11   :  { %24 = vsyncpa [#allocation6 + $0x1], 0 }
  0x12   :  { %25 = vsyncpa [#allocation17], 0 }
  0x13   :  { %27 = vsyncpa [#allocation17 + $0x1], 0  ;;  %s2891_s27 = smov 0   ;;  %s2893_s28 = smov 0  }
  0x14   :  { %s2895_s29 = smov 0   ;;  %s2897_s30 = smov 0  }
  0x15   :  { %s2899_s9 = smov 0   ;;  %s2901_s10 = smov 0  }
  0x16   :  { %s2903_s11 = smov 0   ;;  %s2905_s12 = smov 0  }
  0x17   :  { %s2907_s13 = smov 0   ;;  %s2909_s14 = smov 0  }
  0x18   :  { %s2911_s15 = smov 0   ;;  %s2913_s16 = smov 0  }
  0x19   :  { %s2915_s17 = smov 0   ;;  %s2917_s18 = smov 0  }
  0x1a LB: > { %4209 = sst [smem:[#allocation26_spill]] %s2769_s27  ;;  %s2962_s19 = sadd.s32 4294967295, %s2821_s18   ;;  %s2821_s18 = sphi %s2917_s18, %s33_s18   ;;  %s2817_s17 = sphi %s2915_s17, %s4290_s17   ;;  %s2813_s16 = sphi %s2913_s16, %s4289_s16   ;;  %s2809_s15 = sphi %s2911_s15, %s4299_s15   ;;  %s2805_s14 = sphi %s2909_s14, %s4287_s14   ;;  %s2801_s13 = sphi %s2907_s13, %s4298_s13   ;;  %s2797_s12 = sphi %s2905_s12, %s4297_s12   ;;  %s2793_s11 = sphi %s2903_s11, %s4296_s11   ;;  %s2789_s10 = sphi %s2901_s10, %s4295_s10   ;;  %s2785_s9 = sphi %s2899_s9, %s4294_s9   ;;  %s2781_s30 = sphi %s2897_s30, %s4293_s30   ;;  %s2777_s29 = sphi %s2895_s29, %s4292_s29   ;;  %s2773_s28 = sphi %s2893_s28, %s4283_s28   ;;  %s2769_s27 = sphi %s2891_s27, %s4282_s27  }
  0x1b   : > { %4210 = sst [smem:[#allocation27_spill]] %s2773_s28  ;;  %p2121_p0 = scmp.ge.s32.totalorder %s2821_s18, 1 }
  0x1c   : > { %4211 = sst [smem:[#allocation28_spill]] %s2777_s29  ;;  %p4169_p1 = scmp.eq.s32.totalorder %s2962_s19, 0 }
  0x1d   : > { %4212 = sst [smem:[#allocation29_spill]] %s2785_s9  ;;  %p297_p3 = scmp.lt.s32.totalorder %s2821_s18, 5 }
  0x1e   : > { %4213 = sst [smem:[#allocation30_spill]] %s2805_s14  ;;  %s2823_s21 = smov [#allocation10]  }
  0x1f   : > { %4214 = sst [smem:[#allocation31_spill]] %s2809_s15  ;;  %p2968_p4 = pnand %p2121_p0, %p297_p3 }
  0x20   : > { %4215 = sst [smem:[#allocation32_spill]] %s2813_s16  ;;  %s309_s22 = sshll.u32 %s2823_s21, 4  ;;  %s310_s22 = int_to_ptr.vmem [resolvable:$true] %s309_s22 }
  0x21   : > { %4216 = sst [smem:[#allocation33_spill]] %s2817_s17  ;;  %p2253_p5 = pneg %p2968_p4 }
  0x22   : > { %s4217_s20 = scalar_select %p2968_p4, 1, 0 }
  0x23   : > { %p2976_p6 = pnand %p2253_p5, %p4169_p1  ;;  %s4220_s3 = sld [smem:[#allocation44_spill]] }
  0x24   : > { %4218 = sst [smem:[#allocation34_spill]] %s4217_s20 }
  0x25   : > { %s4219_s23 = scalar_select %p2976_p6, 1, 0 }
  0x26   : > { %p2988_p8 = pneg %p2976_p6 }
  0x29   : > { %s2425_s26 = scalar_lea.hbm %s4220_s3, 576 }
  0x2a   : > { %p2426_p7 = scmp.ne.s32.totalorder %s4220_s3, %s2425_s26  ;;  %p2432_p11 = scmp.lt.u32.totalorder %s2425_s26, %s4220_s3 }
  0x2c   : > { %p2428_p9 = pnand %p2988_p8, %p2426_p7 }
  0x2e   : > { %p2429_p10 = pneg %p2428_p9 }
  0x30   : > { %p2434_p12 = pnand %p2432_p11, %p2429_p10 }
  0x32   : > { %2437 = shalt.err (!%p2434_p12)
}
  0x33   : > { %s2438_s24 = scalar_lea.vmem %s310_s22, 576  ;;  %p2446_p5 = scmp.lt.s32.totalorder %s310_s22, %s310_s22 }
  0x34   : > { %p2439_p13 = scmp.ne.s32.totalorder %s310_s22, %s2438_s24  ;;  %p2447_p2 = scmp.lt.s32.totalorder %s2438_s24, %s2438_s24 }
  0x36   : > { %p2441_p0 = pnand %p2439_p13, %p2988_p8  ;;  %p2448_p1 = por %p2447_p2, %p2446_p5 }
  0x38   : > { %p2442_p3 = pneg %p2441_p0 }
  0x3a   : > { %p2449_p4 = pnand %p2448_p1, %p2442_p3 }
  0x3c   : > { %2452 = shalt.err (!%p2449_p4)
}
  0x3d   : > { %s2824_s7 = smov 64   ;;  %s2825_s6 = smov 4  }
  0x3e   : > { %2256 = dma.hbm_to_vmem [thread:$0]  (!%p2976_p6), %s4220_s3, 576, %s310_s22, [#allocation11], %s2824_s7, %s2824_s7, %s2825_s6  }
  0x3f   : > { %s42_s25 = sadd.s32 1, %s2813_s16  ;;  %s45_s26 = sadd.s32 1, %s2817_s17 }
  0x40   : > { %p43_p1 = scmp.ge.s32.totalorder %s42_s25, 2  ;;  %p4186_p2 = scmp.eq.s32.totalorder %s2821_s18, 0 }
  0x41   : > { %s2115_s24 = sshll.u32 %s2813_s16, 3  ;;  %s90_s14 = sadd.s32 1, %s2789_s10 }
  0x42   : > { %s4301_s25 = smov (%p43_p1, %s42_s25), 0  ;;  %s4303_s26 = smov (!%p43_p1, %s45_s26), %s2817_s17 }
  0x43   : > { %4222 = sst [smem:[#allocation35_spill]] %s4301_s25  ;;  %s50_s20 = ssub.s32 %s2813_s16, %s4301_s25 }
  0x44   : > { %s2116_s2 = sadd.s32 4294967295, %s2115_s24  ;;  %p47_p4 = scmp.ge.s32.totalorder %s4303_s26, 2 }
  0x45   : > { %p79_p7 = scmp.gt.s32.totalorder %s2116_s2, 0  ;;  %s2117_s22 = sshll.u32 %s4301_s25, 3 }
  0x46   : > { %p97_p9 = scmp.ne.s32.totalorder %s2789_s10, %s2785_s9  ;;  %s4305_s26 = smov (%p47_p4, %s4303_s26), 0 }
  0x47   : > { %4223 = sst [smem:[#allocation36_spill]] %s4305_s26  ;;  %s4307_s2 = smov (!%p79_p7, %s2116_s2), 0 }
  0x48   : > { %s3021_s7 = ssub.s32 %s2817_s17, %s4305_s26  ;;  %s2118_s6 = sadd.s32 4294967295, %s2117_s22 }
  0x49   : > { %4224 = sst [smem:[#allocation37_spill]] %s3021_s7  ;;  %s3024_s8 = sor.u32 %s50_s20, %s3021_s7 }
  0x4a   : > { %p83_p10 = scmp.gt.s32.totalorder %s2118_s6, 0  ;;  %p3029_p12 = por %p97_p9, %p4186_p2 }
  0x4b   : > { %p103_p13 = scmp.ne.s32.totalorder %s2785_s9, %s2781_s30  ;;  %s3035_s3 = sadd.s32 8, %s2115_s24 }
  0x4c   : > { %s4309_s6 = smov (!%p83_p10, %s2118_s6), 0  ;;  %4226 = sst [smem:[#allocation38_spill]] %s3035_s3 }
  0x4d   : > { %s86_s26 = ssub.s32 %s4307_s2, %s4309_s6  ;;  %p4227_p3 = scmp.eq.s32.totalorder %s2962_s19, 0 }
  0x4e   : > { %s87_s20 = sor.u32 %s86_s26, %s3021_s7  ;;  %s3045_s27 = sadd.s32 8, %s2117_s22 }
  0x4f   : > { %p3041_p5 = por %p103_p13, %p4227_p3  ;;  %p88_p1 = scmp.eq.s32.totalorder %s87_s20, 0 }
  0x50   : > { %p4185_p7 = scmp.lt.s32.totalorder %s2821_s18, 4  ;;  %s3053_s24 = sshll.u32 %s2817_s17, 5 }
  0x51   : > { %s4228_s25 = scalar_select %p3041_p5, 1, 0 }
  0x52   : > { %s3050_s30 = scalar_select %p88_p1, %s2789_s10, %s90_s14  }
  0x53   : > { %4229 = sst [smem:[#allocation39_spill]] %s4228_s25  ;;  %s369_s6 = sand.u32 1, %s2821_s18  }
  0x54   : > { %s371_s26 = sand.u32 1, %s2789_s10   ;;  %s2134_s7 = sshll.u32 %s4307_s2, 1 }
  0x55   : > { %s2131_s9 = sshll.u32 %s371_s26, 4  ;;  %s383_s28 = sadd.s32 %s2134_s7, %s3053_s24 }
  0x56   : > { %s2136_s3 = sshll.u32 %s383_s28, 7  ;;  %s373_s25 = scalar_lea.vmem [#allocation7], %s2131_s9 }
  0x57   : > { %s386_s20 = sshll.u32 %s373_s25, 4  ;;  %s4230_s1 = sld [smem:[#allocation42_spill]]  ;;  %s3063_s20 = int_to_ptr.vmem [resolvable:$true] %s386_s20 }
  0x58   : > { %p3069_p9 = pnand %p4185_p7, %p3029_p12  ;;  %s2826_s2 = smov [#allocation12]  }
  0x59   : > { %s323_s28 = sshll.u32 %s2826_s2, 4  ;;  %s3075_s0 = scalar_lea.sflag [#allocation8], %s369_s6  ;;  %s3073_s28 = int_to_ptr.vmem [resolvable:$true] %s323_s28 }
  0x5a   : > { %p2455_p13 = pneg %p3069_p9 }
  0x5d   : > { %s3061_s22 = scalar_lea.hbm %s4230_s1, %s2136_s3  ;;  %s2458_s25 = scalar_lea.hbm %s4230_s1, 8192 }
  0x5e   : > { %s2453_s3 = scalar_lea.hbm %s3061_s22, 256  ;;  %p2459_p12 = scmp.lt.u32.totalorder %s3061_s22, %s4230_s1 }
  0x5f   : > { %p2454_p10 = scmp.ne.s32.totalorder %s3061_s22, %s2453_s3  ;;  %p2460_p4 = scmp.lt.u32.totalorder %s2458_s25, %s2453_s3 }
  0x60   : > { %p2462_p7 = scmp.lt.u32.totalorder %s2453_s3, %s3061_s22 }
  0x61   : > { %p2456_p3 = pnand %p2455_p13, %p2454_p10  ;;  %p2461_p0 = por %p2460_p4, %p2459_p12 }
  0x63   : > { %p2457_p1 = pneg %p2456_p3  ;;  %p2463_p2 = por %p2462_p7, %p2461_p0 }
  0x65   : > { %p2464_p11 = pnand %p2463_p2, %p2457_p1 }
  0x67   : > { %2467 = shalt.err (!%p2464_p11)
}
  0x68   : > { %s2468_s6 = scalar_lea.vmem %s3063_s20, 256  ;;  %s2827_s26 = smov [#allocation7]  }
  0x69   : > { %p2469_p10 = scmp.ne.s32.totalorder %s3063_s20, %s2468_s6  ;;  %s2473_s2 = sshll.u32 %s2827_s26, 4  ;;  %s2474_s2 = int_to_ptr.vmem [resolvable:$false] %s2473_s2 }
  0x6a   : > { %s2475_s29 = scalar_lea.vmem %s2474_s2, 512  ;;  %p2476_p6 = scmp.lt.s32.totalorder %s3063_s20, %s2474_s2 }
  0x6b   : > { %p2471_p3 = pnand %p2469_p10, %p2455_p13  ;;  %p2477_p4 = scmp.lt.s32.totalorder %s2475_s29, %s2468_s6 }
  0x6d   : > { %p2472_p5 = pneg %p2471_p3  ;;  %p2478_p12 = por %p2477_p4, %p2476_p6 }
  0x6f   : > { %p2479_p0 = pnand %p2478_p12, %p2472_p5 }
  0x71   : > { %2482 = shalt.err (!%p2479_p0)
}
  0x72   : > { %s4190_s3 = smov 128   ;;  %s4193_s9 = smov 8  }
  0x73   : > { %2269 = dma.hbm_to_vmem [thread:$0]  (!%p3069_p9), %s3061_s22, 256, %s3063_s20, %s3075_s0, %s4190_s3, %s4190_s3, %s4193_s9  }
  0x74   : > { %s4232_s4 = sld [smem:[#allocation45_spill]] }
  0x7a   : > { %s2483_s15 = scalar_lea.hbm %s4232_s4, 16 }
  0x7b   : > { %p2484_p6 = scmp.ne.s32.totalorder %s4232_s4, %s2483_s15  ;;  %p2490_p5 = scmp.lt.u32.totalorder %s2483_s15, %s4232_s4 }
  0x7d   : > { %p2486_p2 = pnand %p2484_p6, %p2988_p8 }
  0x7f   : > { %p2487_p11 = pneg %p2486_p2 }
  0x81   : > { %p2492_p7 = pnand %p2490_p5, %p2487_p11 }
  0x83   : > { %2495 = shalt.err (!%p2492_p7)
}
  0x84   : > { %s2496_s20 = scalar_lea.vmem %s3073_s28, 16  ;;  %s2503_s22 = scalar_lea.vmem %s3073_s28, 32 }
  0x85   : > { %p2497_p9 = scmp.ne.s32.totalorder %s3073_s28, %s2496_s20  ;;  %p2504_p10 = scmp.lt.s32.totalorder %s3073_s28, %s3073_s28 }
  0x86   : > { %p2505_p3 = scmp.lt.s32.totalorder %s2503_s22, %s2496_s20 }
  0x87   : > { %p2499_p13 = pnand %p2497_p9, %p2988_p8 }
  0x88   : > { %p2506_p4 = por %p2505_p3, %p2504_p10 }
  0x89   : > { %p2500_p1 = pneg %p2499_p13 }
  0x8b   : > { %p2507_p12 = pnand %p2506_p4, %p2500_p1 }
  0x8d   : > { %2510 = shalt.err (!%p2507_p12)
}
  0x8e   : > { %p4233_p0 = scmp.ne.s32.totalorder %s4219_s23, 0  ;;  %s2830_s7 = smov [#allocation13]  }
  0x8f   : > { %s334_s15 = sshll.u32 %s2830_s7, 4  ;;  %s4234_s5 = sld [smem:[#allocation46_spill]]  ;;  %s335_s15 = int_to_ptr.vmem [resolvable:$true] %s334_s15 }
  0x90   : > { %2259 = dma.hbm_to_vmem [thread:$0]  (!%p4233_p0), %s4232_s4, 16, %s3073_s28, [#allocation11]  }
  0x95   : > { %s2511_s2 = scalar_lea.hbm %s4234_s5, 16 }
  0x96   : > { %p2512_p6 = scmp.ne.s32.totalorder %s4234_s5, %s2511_s2  ;;  %p2518_p5 = scmp.lt.u32.totalorder %s2511_s2, %s4234_s5 }
  0x98   : > { %p2514_p2 = pnand %p2512_p6, %p2988_p8 }
  0x9a   : > { %p2515_p11 = pneg %p2514_p2 }
  0x9c   : > { %p2520_p7 = pnand %p2518_p5, %p2515_p11 }
  0x9e   : > { %2523 = shalt.err (!%p2520_p7)
}
  0x9f   : > { %s2524_s28 = scalar_lea.vmem %s335_s15, 16  ;;  %s2531_s14 = scalar_lea.vmem %s335_s15, 32 }
  0xa0   : > { %p2525_p9 = scmp.ne.s32.totalorder %s335_s15, %s2524_s28  ;;  %p2532_p10 = scmp.lt.s32.totalorder %s335_s15, %s335_s15 }
  0xa1   : > { %p2533_p3 = scmp.lt.s32.totalorder %s2531_s14, %s2524_s28 }
  0xa2   : > { %p2527_p13 = pnand %p2525_p9, %p2988_p8 }
  0xa3   : > { %p2534_p4 = por %p2533_p3, %p2532_p10 }
  0xa4   : > { %p2528_p1 = pneg %p2527_p13 }
  0xa6   : > { %p2535_p12 = pnand %p2534_p4, %p2528_p1 }
  0xa8   : > { %2538 = shalt.err (!%p2535_p12)
}
  0xa9   : > { %2262 = dma.hbm_to_vmem [thread:$0]  (!%p4233_p0), %s4234_s5, 16, %s335_s15, [#allocation14]  }
  0xaa   : > { %s4192_s23 = sadd.s32 4294967294, %s2821_s18   ;;  %s54_s21 = sadd.s32 1, %s2801_s13 }
  0xab   : > { %p4235_p8 = scmp.eq.s32.totalorder %s3024_s8, 0  ;;  %p61_p6 = scmp.ne.s32.totalorder %s2801_s13, %s2797_s12 }
  0xac   : > { %p67_p2 = scmp.ne.s32.totalorder %s2797_s12, %s2793_s11  ;;  %p234_p11 = scmp.eq.s32.totalorder %s4192_s23, 3 }
  0xad   : > { %s3153_s3 = scalar_select %p4235_p8, %s2801_s13, %s54_s21  }
  0xae   : > { %s345_s6 = sand.u32 1, %s2801_s13   ;;  %p4237_p5 = scmp.eq.s32.totalorder %s2821_s18, 0 }
  0xaf   : > { %4236 = sst [smem:[#allocation40_spill]] %s3153_s3  ;;  %p4238_p9 = scmp.eq.s32.totalorder %s2962_s19, 0 }
  0xb0   : > { %p63_p7 = por %p4237_p5, %p61_p6  ;;  %p4240_p1 = scmp.eq.s32.totalorder %s2962_s19, 3 }
  0xb1   : > { %p3166_p13 = por %p4238_p9, %p67_p2  ;;  %p3176_p10 = por %p234_p11, %p67_p2 }
  0xb2   : > { %p3172_p0 = por %p4240_p1, %p61_p6  ;;  %s2126_s2 = sshll.u32 %s345_s6, 7 }
  0xb3   : > { %s4242_s8 = scalar_select %p3176_p10, 1, 0 }
  0xb4   : > { %s4241_s15 = scalar_select %p3172_p0, 1, 0 }
  0xb5   : > { %s2176_s29 = sshll.u32 %s2813_s16, 4  ;;  %s349_s22 = scalar_lea.vmem [#allocation4], %s2126_s2 }
  0xb6   : > { %s356_s20 = sadd.s32 %s2176_s29, %s3053_s24  ;;  %s359_s28 = sshll.u32 %s349_s22, 4  ;;  %s3182_s28 = int_to_ptr.vmem [resolvable:$true] %s359_s28 }
  0xb7   : > { %s2130_s14 = sshll.u32 %s356_s20, 7  ;;  %s4243_s21 = sld [smem:[#allocation41_spill]] }
  0xb8   : > { %p4244_p3 = scmp.lt.s32.totalorder %s2821_s18, 4  ;;  %s3195_s2 = scalar_lea.sflag [#allocation5], %s345_s6 }
  0xba   : > { %p3191_p4 = pnand %p4244_p3, %p63_p7 }
  0xbc   : > { %p2541_p8 = pneg %p3191_p4 }
  0xbd   : > { %s3187_s23 = scalar_lea.hbm %s4243_s21, %s2130_s14  ;;  %s2544_s14 = scalar_lea.hbm %s4243_s21, 8192 }
  0xbe   : > { %s2539_s29 = scalar_lea.hbm %s3187_s23, 2048  ;;  %p2545_p11 = scmp.lt.u32.totalorder %s3187_s23, %s4243_s21 }
  0xbf   : > { %p2540_p12 = scmp.ne.s32.totalorder %s3187_s23, %s2539_s29  ;;  %p2546_p5 = scmp.lt.u32.totalorder %s2544_s14, %s2539_s29 }
  0xc0   : > { %p2548_p9 = scmp.lt.u32.totalorder %s2539_s29, %s3187_s23 }
  0xc1   : > { %p2542_p6 = pnand %p2541_p8, %p2540_p12  ;;  %p2547_p7 = por %p2546_p5, %p2545_p11 }
  0xc3   : > { %p2543_p2 = pneg %p2542_p6  ;;  %p2549_p1 = por %p2548_p9, %p2547_p7 }
  0xc5   : > { %p2550_p3 = pnand %p2549_p1, %p2543_p2 }
  0xc7   : > { %2553 = shalt.err (!%p2550_p3)
}
  0xc8   : > { %s2554_s6 = scalar_lea.vmem %s3182_s28, 2048  ;;  %s2831_s20 = smov [#allocation4]  }
  0xc9   : > { %p2555_p12 = scmp.ne.s32.totalorder %s3182_s28, %s2554_s6  ;;  %s2559_s22 = sshll.u32 %s2831_s20, 4  ;;  %s2560_s22 = int_to_ptr.vmem [resolvable:$false] %s2559_s22 }
  0xca   : > { %s2561_s25 = scalar_lea.vmem %s2560_s22, 4096  ;;  %p2562_p0 = scmp.lt.s32.totalorder %s3182_s28, %s2560_s22 }
  0xcb   : > { %p2557_p6 = pnand %p2555_p12, %p2541_p8  ;;  %p2563_p11 = scmp.lt.s32.totalorder %s2561_s25, %s2554_s6 }
  0xcd   : > { %p2558_p10 = pneg %p2557_p6  ;;  %p2564_p5 = por %p2563_p11, %p2562_p0 }
  0xcf   : > { %p2565_p7 = pnand %p2564_p5, %p2558_p10 }
  0xd1   : > { %2568 = shalt.err (!%p2565_p7)
}
  0xd2   : > { %s4246_s29 = smov 8   ;;  %s4247_s14 = smov 128  }
  0xd3   : > { %s4248_s7 = sld [smem:[#allocation28_spill]]  ;;  %s4249_s1 = sld [smem:[#allocation38_spill]] }
  0xd4   : > { %s4250_s20 = sld [smem:[#allocation27_spill]]  ;;  %s4252_s6 = sld [smem:[#allocation37_spill]] }
  0xd5   : > { %s4251_s22 = sld [smem:[#allocation26_spill]]  ;;  %p4254_p10 = scmp.lt.s32.totalorder %s3045_s27, 15 }
  0xd6   : > { %2266 = dma.hbm_to_vmem [thread:$0]  (!%p3191_p4), %s3187_s23, 2048, %s3182_s28, %s3195_s2, %s4247_s14, %s4247_s14, %s4246_s29  }
  0xd7   : > { %s4313_s27 = smov (!%p4254_p10, %s3045_s27), 15  ;;  %p4255_p9 = scmp.eq.s32.totalorder %s2821_s18, 0 }
  0xd8   : > { %p4256_p12 = scmp.eq.s32.totalorder %s2962_s19, 0  ;;  %s4258_s3 = sld [smem:[#allocation43_spill]] }
  0xd9   : > { %s126_s9 = sadd.s32 1, %s4248_s7  ;;  %p4253_p0 = scmp.lt.s32.totalorder %s4249_s1, 15 }
  0xda   : > { %p133_p8 = scmp.ne.s32.totalorder %s4248_s7, %s4250_s20  ;;  %s398_s4 = sand.u32 1, %s4248_s7  }
  0xdb   : > { %s4311_s1 = smov (!%p4253_p0, %s4249_s1), 15  ;;  %p139_p2 = scmp.ne.s32.totalorder %s4250_s20, %s4251_s22 }
  0xdc   : > { %s122_s25 = ssub.s32 %s4311_s1, %s4313_s27  ;;  %p135_p1 = por %p133_p8, %p4255_p9 }
  0xdd   : > { %s123_s5 = sor.u32 %s122_s25, %s4252_s6  ;;  %p3243_p6 = por %p139_p2, %p4256_p12 }
  0xde   : > { %p124_p3 = scmp.eq.s32.totalorder %s123_s5, 0  ;;  %s2137_s23 = sshll.u32 %s398_s4, 4 }
  0xdf   : > { %s4257_s21 = scalar_select %p3243_p6, 1, 0 }
  0xe0   : > { %s2139_s28 = sshll.u32 %s4311_s1, 1  ;;  %s4315_s7 = smov (!%p124_p3, %s4248_s7), %s126_s9 }
  0xe1   : > { %s410_s2 = sadd.s32 %s2139_s28, %s3053_s24  ;;  %s400_s16 = scalar_lea.vmem [#allocation9], %s2137_s23 }
  0xe2   : > { %s2141_s17 = sshll.u32 %s410_s2, 7  ;;  %s413_s20 = sshll.u32 %s400_s16, 4  ;;  %s3256_s20 = int_to_ptr.vmem [resolvable:$true] %s413_s20 }
  0xe3   : > { %s3254_s6 = scalar_lea.hbm %s4258_s3, %s2141_s17  ;;  %p4259_p4 = scmp.lt.s32.totalorder %s2821_s18, 4 }
  0xe4   : > { %s2569_s4 = scalar_lea.hbm %s3254_s6, 256  ;;  %s2574_s17 = scalar_lea.hbm %s4258_s3, 8192 }
  0xe5   : > { %p3260_p11 = pnand %p4259_p4, %p135_p1  ;;  %p2570_p5 = scmp.ne.s32.totalorder %s3254_s6, %s2569_s4 }
  0xe6   : > { %p2575_p8 = scmp.lt.u32.totalorder %s3254_s6, %s4258_s3  ;;  %p2576_p2 = scmp.lt.u32.totalorder %s2574_s17, %s2569_s4 }
  0xe7   : > { %p2571_p7 = pneg %p3260_p11  ;;  %p2578_p1 = scmp.lt.u32.totalorder %s2569_s4, %s3254_s6 }
  0xe8   : > { %p2577_p9 = por %p2576_p2, %p2575_p8 }
  0xe9   : > { %p2572_p0 = pnand %p2571_p7, %p2570_p5 }
  0xea   : > { %p2579_p3 = por %p2578_p1, %p2577_p9 }
  0xeb   : > { %p2573_p10 = pneg %p2572_p0 }
  0xed   : > { %p2580_p12 = pnand %p2579_p3, %p2573_p10 }
  0xef   : > { %2583 = shalt.err (!%p2580_p12)
}
  0xf0   : > { %s2584_s25 = scalar_lea.vmem %s3256_s20, 256  ;;  %s2832_s23 = smov [#allocation9]  }
  0xf1   : > { %p2585_p4 = scmp.ne.s32.totalorder %s3256_s20, %s2584_s25  ;;  %s2589_s28 = sshll.u32 %s2832_s23, 4  ;;  %s2590_s28 = int_to_ptr.vmem [resolvable:$false] %s2589_s28 }
  0xf2   : > { %s2591_s2 = scalar_lea.vmem %s2590_s28, 512  ;;  %p2592_p6 = scmp.lt.s32.totalorder %s3256_s20, %s2590_s28 }
  0xf3   : > { %p2587_p5 = pnand %p2585_p4, %p2571_p7  ;;  %p2593_p8 = scmp.lt.s32.totalorder %s2591_s2, %s2584_s25 }
  0xf5   : > { %p2588_p0 = pneg %p2587_p5  ;;  %p2594_p2 = por %p2593_p8, %p2592_p6 }
  0xf7   : > { %p2595_p9 = pnand %p2594_p2, %p2588_p0 }
  0xf9   : > { %2598 = shalt.err (!%p2595_p9)
}
  0xfa   : > { %2272 = dma.hbm_to_vmem [thread:$0]  (!%p3260_p11), %s3254_s6, 256, %s3256_s20, %s3075_s0, %s4247_s14, %s4247_s14, %s4246_s29  }
  0xfb   : > { %s4261_s22 = sld [smem:[#allocation34_spill]] }
 0x101   : > { %p4262_p7 = scmp.ne.s32.totalorder %s4261_s22, 0 }
 0x102   : > { %s3296_s27 = sand.u32 (!%p4262_p7), 1, %s2797_s12  }
 0x103   : > { %425 = sbr.rel (%p4262_p7) target bundleno = 1014 (0x3f6), region = 44  ;;  %s2143_s4 = sshll.u32 (!%p4262_p7), %s3296_s27, 7 }
 0x104   : > { %s428_s5 = scalar_lea.sflag (!%p4262_p7), [#allocation5], %s3296_s27  ;;  %s3302_s1 = scalar_lea.vmem (!%p4262_p7), [#allocation4], %s2143_s4 }
 0x10a   : > { %2740 = dma.done.wait (%p3166_p13), %s428_s5, 2048  }
 0x10b   : > { %2742 = vsyncadd (%p3166_p13), %s428_s5, 4294965248  ;;  %s4263_s0 = sld [smem:[#allocation29_spill]]  ;;  %s4264_s29 = sld [smem:[#allocation39_spill]] }
 0x10c   : > { %s436_s14 = sand.u32 1, %s2962_s19  }
 0x10d   : > { %s437_s16 = scalar_lea.sflag [#allocation8], %s436_s14 }
 0x111   : > { %s438_s20 = sand.u32 1, %s4263_s0   ;;  %p4265_p6 = scmp.ne.s32.totalorder %s4264_s29, 0 }
 0x112   : > { %s3310_s6 = sshll.u32 %s438_s20, 4 }
 0x113   : > { %s440_s17 = scalar_lea.vmem [#allocation7], %s3310_s6 }
 0x114   : > { %2744 = dma.done.wait (%p4265_p6), %s437_s16, 256  }
 0x115   : > { %2746 = vsyncadd (%p4265_p6), %s437_s16, 4294967040  ;;  %s4266_s24 = sld [smem:[#allocation27_spill]]  ;;  %p4267_p13 = scmp.ne.s32.totalorder %s4257_s21, 0 }
 0x11b   : > { %s447_s26 = sand.u32 1, %s4266_s24  }
 0x11c   : > { %s3320_s9 = sshll.u32 %s447_s26, 4 }
 0x11d   : > { %s449_s25 = scalar_lea.vmem [#allocation9], %s3320_s9 }
 0x11e   : > { %2748 = dma.done.wait (%p4267_p13), %s437_s16, 256  }
 0x11f   : > { %2750 = vsyncadd (%p4267_p13), %s437_s16, 4294967040  ;;  %p4268_p11 = scmp.eq.s32.totalorder %s2962_s19, 0 }
 0x121   : > { %2752 = dma.done.wait (%p4268_p11), [#allocation11], 592   ;;  %p4269_p10 = pmov %p4268_p11 }
 0x123   : > { %2754 = vsyncadd (%p4269_p10), [#allocation11], 4294966704  ;;  %p4270_p1 = pmov %p4269_p10 }
 0x125   : > { %2756 = dma.done.wait (%p4270_p1), [#allocation14], 16   ;;  %p4271_p3 = pmov %p4270_p1 }
 0x126   : > { %vm692_vm0 = vcmask 57344   ;;  %v2833_v0 = vmov 0.0   ;;  %s4272_s21 = sld [smem:[#allocation30_spill]]  ;;  %v523_v1 = vld [vmem:[%s3302_s1] sm:$0xff]  ;;  %v524_v2 = vld [vmem:[%s3302_s1 + $0x8] sm:$0xff]  ;;  %v525_v7 = vld [vmem:[%s3302_s1 + $0x10] sm:$0xff] }
 0x127   : > { %2758 = vsyncadd (%p4271_p3), [#allocation14], 4294967280  ;;  %694 = vst.msk [vmem:[#allocation2 + $0x27] sm:$0x1] %vm692_vm0, %v2833_v0  ;;  %v3358_v3 = vld [vmem:[#allocation12] ss:$0 sm:$0xff] }
 0x128   : > { %693 = vst.msk [vmem:[#allocation2 + $0x7] sm:$0x1] %vm692_vm0, %v2833_v0  ;;  %695 = vst.msk [vmem:[#allocation2 + $0x47] sm:$0x1] %vm692_vm0, %v2833_v0  ;;  %v3360_v4 = vld [vmem:[#allocation13] ss:$0 sm:$0xff]  ;;  %v551_v5 = vmul.f32 %v3358_v3, %v523_v1  ;;  %v552_v6 = vmul.f32 %v3358_v3, %v524_v2  ;;  %v553_v9 = vmul.f32 %v3358_v3, %v525_v7 }
 0x129   : > { %696 = vst.msk [vmem:[#allocation2 + $0x67] sm:$0x1] %vm692_vm0, %v2833_v0  ;;  %697 = vst.msk [vmem:[#allocation2 + $0x87] sm:$0x1] %vm692_vm0, %v2833_v0  ;;  %v539_v8 = vld [vmem:[%s440_s17] sm:$0xff]  ;;  %vm669_vm1 = vcmask 64512  }
 0x12a   : > { %698 = vst.msk [vmem:[#allocation2 + $0xa7] sm:$0x1] %vm692_vm0, %v2833_v0  ;;  %699 = vst.msk [vmem:[#allocation2 + $0xc7] sm:$0x1] %vm692_vm0, %v2833_v0  ;;  %v637_v10 = vmul.f32 %v3358_v3, %v539_v8  ;;  %v526_v12 = vld [vmem:[%s3302_s1 + $0x18] sm:$0xff]  ;;  %v527_v14 = vld [vmem:[%s3302_s1 + $0x20] sm:$0xff]  ;;  %v573_v15 = vadd.f32 %v3360_v4, %v551_v5  ;;  %v574_v16 = vadd.f32 %v3360_v4, %v552_v6 }
 0x12b   : > { %700 = vst.msk [vmem:[#allocation2 + $0xe7] sm:$0x1] %vm692_vm0, %v2833_v0  ;;  %701 = vst.msk [vmem:[#allocation2 + $0x107] sm:$0x1] %vm692_vm0, %v2833_v0  ;;  %v540_v13 = vld [vmem:[%s440_s17 + $0x8] sm:$0xff]  ;;  %v554_v17 = vmul.f32 %v3358_v3, %v526_v12  ;;  %v575_v20 = vadd.f32 %v3360_v4, %v553_v9  ;;  %v555_v22 = vmul.f32 %v3358_v3, %v527_v14  ;;  %v529_v28 = vld [vmem:[%s3302_s1 + $0x30] sm:$0xff] }
 0x12c   : > { %702 = vst.msk [vmem:[#allocation2 + $0x127] sm:$0x1] %vm692_vm0, %v2833_v0  ;;  %703 = vst.msk [vmem:[#allocation2 + $0x18] sm:$0x1] %vm692_vm0, %v2833_v0  ;;  %p657_p12 = scmp.gt.s32.totalorder %s4272_s21, 0  ;;  %v638_v18 = vmul.f32 %v3358_v3, %v540_v13  ;;  %v528_v19 = vld [vmem:[%s3302_s1 + $0x28] sm:$0xff]  ;;  %v639_v21 = vadd.f32 %v3360_v4, %v637_v10  ;;  %v557_v46 = vmul.f32 %v3358_v3, %v529_v28 }
 0x12d   : > { %704 = vst.msk [vmem:[#allocation2 + $0x38] sm:$0x1] %vm692_vm0, %v2833_v0  ;;  %705 = vst.msk [vmem:[#allocation2 + $0x58] sm:$0x1] %vm692_vm0, %v2833_v0  ;;  %v556_v23 = vmul.f32 %v3358_v3, %v528_v19  ;;  %vm589_vm2 = vcmp.ge.f32.partialorder %v573_v15, 0.0  ;;  %vm590_vm3 = vcmp.ge.f32.partialorder %v574_v16, 0.0  ;;  %v576_v32 = vadd.f32 %v3360_v4, %v554_v17 }
 0x12e   : > { %706 = vst.msk [vmem:[#allocation2 + $0x78] sm:$0x1] %vm692_vm0, %v2833_v0  ;;  %707 = vst.msk [vmem:[#allocation2 + $0x98] sm:$0x1] %vm692_vm0, %v2833_v0  ;;  %s658_s23 = scalar_select %p657_p12, 1, 0  ;;  %v640_v33 = vadd.f32 %v3360_v4, %v638_v18  ;;  %v577_v38 = vadd.f32 %v3360_v4, %v555_v22  ;;  %v579_v54 = vadd.f32 %v3360_v4, %v557_v46 }
 0x12f   : > { %708 = vst.msk [vmem:[#allocation2 + $0xb8] sm:$0x1] %vm692_vm0, %v2833_v0  ;;  %709 = vst.msk [vmem:[#allocation2 + $0xd8] sm:$0x1] %vm692_vm0, %v2833_v0  ;;  %v605_v24 = vmul.f32 0.01, %v573_v15  ;;  %v578_v39 = vadd.f32 %v3360_v4, %v556_v23 }
 0x130   : > { %710 = vst.msk [vmem:[#allocation2 + $0xf8] sm:$0x1] %vm692_vm0, %v2833_v0  ;;  %711 = vst.msk [vmem:[#allocation2 + $0x118] sm:$0x1] %vm692_vm0, %v2833_v0  ;;  %s659_s28 = scvt.s32.f32 %s658_s23  ;;  %v606_v25 = vmul.f32 0.01, %v574_v16 }
 0x131   : > { %712 = vst.msk [vmem:[#allocation2 + $0x138] sm:$0x1] %vm692_vm0, %v2833_v0  ;;  %vm591_vm4 = vcmp.ge.f32.partialorder %v575_v20, 0.0  ;;  %v607_v26 = vmul.f32 0.01, %v575_v20  ;;  %vm641_vm5 = vcmp.ge.f32.partialorder %v639_v21, 0.0  ;;  %v621_v30 = vsel %vm589_vm2, %v573_v15, %v605_v24 }
 0x132   : > { %v660_v11 = vstv %s659_s28  ;;  %v643_v27 = vmul.f32 0.01, %v639_v21  ;;  %v530_v29 = vld [vmem:[%s3302_s1 + $0x38] sm:$0xff]  ;;  %v622_v31 = vsel %vm590_vm3, %v574_v16, %v606_v25  ;;  %v531_v34 = vld [vmem:[%s3302_s1 + $0x40] sm:$0xff]  ;;  %v532_v35 = vld [vmem:[%s3302_s1 + $0x48] sm:$0xff]  ;;  %673 = vst.msk [vmem:[#allocation2 + $0x28] sm:$0xff] %vm669_vm1, %v621_v30 }
 0x133   : > { %674 = vst.msk [vmem:[#allocation2 + $0x30] sm:$0xff] %vm669_vm1, %v622_v31  ;;  %v623_v36 = vsel %vm591_vm4, %v575_v20, %v607_v26  ;;  %vm592_vm6 = vcmp.ge.f32.partialorder %v576_v32, 0.0  ;;  %v608_v41 = vmul.f32 0.01, %v576_v32  ;;  %vm642_vm7 = vcmp.ge.f32.partialorder %v640_v33, 0.0  ;;  %s2834_s2 = smov 16  }
 0x134   : > { %v645_v37 = vsel %vm641_vm5, %v639_v21, %v643_v27  ;;  %675 = vst.msk [vmem:[#allocation2 + $0x48] sm:$0xff] %vm669_vm1, %v623_v36  ;;  %v644_v42 = vmul.f32 0.01, %v640_v33  ;;  %vm593_vm8 = vcmp.ge.f32.partialorder %v577_v38, 0.0  ;;  %v609_v43 = vmul.f32 0.01, %v577_v38 }
 0x135   : > { %v661_v40 = vmul.f32 %v660_v11, %v645_v37  ;;  %vm594_vm9 = vcmp.ge.f32.partialorder %v578_v39, 0.0  ;;  %v624_v44 = vsel %vm592_vm6, %v576_v32, %v608_v41  ;;  %v610_v45 = vmul.f32 0.01, %v578_v39  ;;  %s2835_s22 = smov 8   ;;  %s2836_s5 = smov 24   ;;  %v533_v16 = vld [vmem:[%s3302_s1 + $0x50] sm:$0xff] }
 0x136   : > { %v558_v47 = vmul.f32 %v3358_v3, %v530_v29  ;;  %676 = vst.msk [vmem:[#allocation2 + $0x50] sm:$0xff] %vm669_vm1, %v624_v44  ;;  %v646_v48 = vsel %vm642_vm7, %v640_v33, %v644_v42  ;;  %v625_v49 = vsel %vm593_vm8, %v577_v38, %v609_v43  ;;  %v559_v50 = vmul.f32 %v3358_v3, %v531_v34  ;;  %v534_v18 = vld [vmem:[%s3302_s1 + $0x58] sm:$0xff]  ;;  %s2837_s0 = smov 32   ;;  %v535_v38 = vld [vmem:[%s3302_s1 + $0x60] sm:$0xff]  ;;  %s2838_s29 = smov 40  }
 0x137   : > { %670 = vst.msk [vmem:[#allocation2 + $0x8] sm:$0xff] %vm669_vm1, %v661_v40  ;;  %v560_v51 = vmul.f32 %v3358_v3, %v532_v35  ;;  %v662_v52 = vmul.f32 %v660_v11, %v646_v48  ;;  %677 = vst.msk [vmem:[#allocation2 + $0x68] sm:$0xff] %vm669_vm1, %v625_v49  ;;  %v626_v53 = vsel %vm594_vm9, %v578_v39, %v610_v45  ;;  %vm595_vm10 = vcmp.ge.f32.partialorder %v579_v54, 0.0  ;;  %v536_v39 = vld [vmem:[%s3302_s1 + $0x68] sm:$0xff]  ;;  %s2839_s20 = smov 48   ;;  %s2840_s6 = smov 56  }
 0x138   : > { %v580_v55 = vadd.f32 %v3360_v4, %v558_v47  ;;  %678 = vst.msk [vmem:[#allocation2 + $0x70] sm:$0xff] %vm669_vm1, %v626_v53  ;;  %v581_v56 = vadd.f32 %v3360_v4, %v559_v50  ;;  %v611_v61 = vmul.f32 0.01, %v579_v54  ;;  %v561_v17 = vmul.f32 %v3358_v3, %v533_v16  ;;  %v2420_v50 = vld [vmem:[#allocation10] sm:$0xff]   ;;  %v2421_v53 = vld [vmem:[#allocation10 + $0x8] sm:$0xff]   ;;  %s2841_s16 = smov 64  }
 0x139   : > { %v582_v57 = vadd.f32 %v3360_v4, %v560_v51  ;;  %v747_v59 = vld [vmem:[#allocation2 + $0x28] sm:$0xff]  ;;  %671 = vst.msk [vmem:[#allocation2 + $0x10] sm:$0xff] %vm669_vm1, %v662_v52  ;;  %v562_v20 = vmul.f32 %v3358_v3, %v534_v18  ;;  %v563_v40 = vmul.f32 %v3358_v3, %v535_v38  ;;  %v564_v41 = vmul.f32 %v3358_v3, %v536_v39  ;;  %p663_p4 = scmp.lt.s32.totalorder %s4272_s21, 1  ;;  %s3854_s24 = scalar_lea.vmem [#allocation15], %s2143_s4 }
 0x13a   : > { %v3405_v58 = vld [vmem:[#allocation2 + $0x29] sm:$0xff]  ;;  %781 = vrot.lane.b32.xlu1 %v747_v59, %s2835_s22  ;;  %vm596_vm11 = vcmp.ge.f32.partialorder %v580_v55, 0.0  ;;  %v612_v63 = vmul.f32 0.01, %v580_v55  ;;  %v627_v2 = vsel %vm595_vm10, %v579_v54, %v611_v61  ;;  %vm597_vm12 = vcmp.ge.f32.partialorder %v581_v56, 0.0  ;;  %v845_v13 = vld [vmem:[#allocation2 + $0x31] sm:$0xff]  ;;  %2191 = vmatprep.subr.bf16.mxu0 %v2420_v50 }
 0x13b   : > { %v939_v60 = vld [vmem:[#allocation2 + $0x27] sm:$0xff]  ;;  %878 = vrot.lane.b32.xlu0 %v3405_v58, %s2834_s2  ;;  %v748_v0 = vld [vmem:[#allocation2 + $0x30] sm:$0xff]  ;;  %v613_v5 = vmul.f32 0.01, %v581_v56  ;;  %vm598_vm13 = vcmp.ge.f32.partialorder %v582_v57, 0.0  ;;  %679 = vst.msk [vmem:[#allocation2 + $0x88] sm:$0xff] %vm669_vm1, %v627_v2  ;;  %v583_v22 = vadd.f32 %v3360_v4, %v561_v17  ;;  %v584_v24 = vadd.f32 %v3360_v4, %v562_v20  ;;  %2217 = vmatprep.subr.bf16.mxu1 %v2420_v50 }
 0x13c   : > { %v3411_v62 = vld [vmem:[#allocation2 + $0x47] sm:$0xff]  ;;  %731 = vst.msk [vmem:[#allocation3 + $0x10] sm:$0xff] %vm669_vm1, %v939_v60  ;;  %v940_v1 = vld [vmem:[#allocation2 + $0x2f] sm:$0xff]  ;;  %v628_v6 = vsel %vm596_vm11, %v580_v55, %v612_v63  ;;  %v614_v7 = vmul.f32 0.01, %v582_v57  ;;  %v585_v42 = vadd.f32 %v3360_v4, %v563_v40  ;;  %v586_v43 = vadd.f32 %v3360_v4, %v564_v41  ;;  %2192 = vmatpush3.bf16.msra.mxu0 %v2420_v50  ;;  %v538_v63 = vld [vmem:[%s3302_s1 + $0x78] sm:$0xff] }
 0x13d   : > { %733 = vst.msk [vmem:[#allocation3 + $0x20] sm:$0xff] %vm669_vm1, %v3411_v62  ;;  %732 = vst.msk [vmem:[#allocation3 + $0x18] sm:$0xff] %vm669_vm1, %v940_v1  ;;  %v3418_v9 = vld [vmem:[#allocation2 + $0x4f] sm:$0xff]  ;;  %v629_v10 = vsel %vm597_vm12, %v581_v56, %v613_v5  ;;  %vm599_vm14 = vcmp.ge.f32.partialorder %v583_v22, 0.0  ;;  %v615_v27 = vmul.f32 0.01, %v583_v22  ;;  %2222 = vmatpush3.bf16.msra.mxu1 %v2420_v50  ;;  %2193 = vmatprep.subr.bf16.mxu0 %v2421_v53 }
 0x13e   : > { %v713_v8 = vld [vmem:[#allocation2 + $0x7] sm:$0xff]  ;;  %680 = vst.msk [vmem:[#allocation2 + $0x90] sm:$0xff] %vm669_vm1, %v628_v6  ;;  %783 = vrot.lane.b32.xlu1 %v748_v0, %s2835_s22  ;;  %681 = vst.msk [vmem:[#allocation2 + $0xa8] sm:$0xff] %vm669_vm1, %v629_v10  ;;  %v630_v12 = vsel %vm598_vm13, %v582_v57, %v614_v7  ;;  %vm600_vm15 = vcmp.ge.f32.partialorder %v584_v24, 0.0  ;;  %v616_v28 = vmul.f32 0.01, %v584_v24  ;;  %2218 = vmatprep.subr.bf16.mxu1 %v2421_v53 }
 0x13f   : > { %729 = vst.msk [vmem:[#allocation3] sm:$0xff] %vm669_vm1, %v713_v8  ;;  %971 = vrot.lane.b32.xlu0 %v939_v60, %s2836_s5  ;;  %v3424_v11 = vld [vmem:[#allocation2 + $0x67] sm:$0xff]  ;;  %734 = vst.msk [vmem:[#allocation3 + $0x28] sm:$0xff] %vm669_vm1, %v3418_v9  ;;  %v3430_v14 = vld [vmem:[#allocation2 + $0x6f] sm:$0xff]  ;;  %v631_v29 = vsel %vm599_vm14, %v583_v22, %v615_v27  ;;  %v617_v46 = vmul.f32 0.01, %v585_v42 }
 0x140   : > { %682 = vst.msk [vmem:[#allocation2 + $0xb0] sm:$0xff] %vm669_vm1, %v630_v12  ;;  %735 = vst.msk [vmem:[#allocation3 + $0x30] sm:$0xff] %vm669_vm1, %v3424_v11  ;;  %v714_v15 = vld [vmem:[#allocation2 + $0xf] sm:$0xff]  ;;  %v632_v30 = vsel %vm600_vm15, %v584_v24, %v616_v28  ;;  %v618_v47 = vmul.f32 0.01, %v586_v43  ;;  %vm601_vm2 = vcmp.ge.f32.partialorder %v585_v42, 0.0  ;;  %2194 = vmatpush3.bf16.msra.mxu0 %v2421_v53 }
 0x141   : > { %736 = vst.msk [vmem:[#allocation3 + $0x38] sm:$0xff] %vm669_vm1, %v3430_v14  ;;  %730 = vst.msk [vmem:[#allocation3 + $0x8] sm:$0xff] %vm669_vm1, %v714_v15  ;;  %v745_v26 = vld [vmem:[#allocation2 + $0x8] sm:$0xff]  ;;  %v746_v31 = vld [vmem:[#allocation2 + $0x10] sm:$0xff]  ;;  %vm602_vm3 = vcmp.ge.f32.partialorder %v586_v43, 0.0  ;;  %v633_v48 = vsel %vm601_vm2, %v585_v42, %v617_v46  ;;  %2223 = vmatpush3.bf16.msra.mxu1 %v2421_v53  ;;  %vm1607_vm4 = vcmask 1043456  }
 0x142   : > { %880 = vrot.lane.b32.xlu1 %v845_v13, %s2834_s2  ;;  %v3444_v19 = vld [vmem:[#allocation2 + $0x87] sm:$0xff]  ;;  %683 = vst.msk [vmem:[#allocation2 + $0xc8] sm:$0xff] %vm669_vm1, %v631_v29  ;;  %684 = vst.msk [vmem:[#allocation2 + $0xd0] sm:$0xff] %vm669_vm1, %v632_v30  ;;  %v843_v33 = vld [vmem:[#allocation2 + $0x11] sm:$0xff]  ;;  %v634_v49 = vsel %vm602_vm3, %v586_v43, %v618_v47  ;;  %vm825_vm9 = vcmask 130112   ;;  %vm922_vm10 = vcmask 195712  }
 0x143   : > { %975 = vrot.lane.b32.xlu0 %v3411_v62, %s2836_s5  ;;  %737 = vst.msk [vmem:[#allocation3 + $0x40] sm:$0xff] %vm669_vm1, %v3444_v19  ;;  %v842_v32 = vld [vmem:[#allocation2 + $0x9] sm:$0xff]  ;;  %v3501_v45 = vld [vmem:[#allocation2 + $0x51] sm:$0xff]  ;;  %685 = vst.msk [vmem:[#allocation2 + $0xe8] sm:$0xff] %vm669_vm1, %v633_v48  ;;  %vm1019_vm11 = vcmask 261312   ;;  %vm1116_vm12 = vcmask 326912  }
 0x144   : > { %v3482_v36 = vld [vmem:[#allocation2 + $0x48] sm:$0xff]  ;;  %v3484_v37 = vld [vmem:[#allocation2 + $0x50] sm:$0xff]  ;;  %686 = vst.msk [vmem:[#allocation2 + $0xf0] sm:$0xff] %vm669_vm1, %v634_v49  ;;  %v2423_v57 = vld [vmem:[#allocation10 + $0x18] sm:$0xff]   ;;  %vm1213_vm13 = vcmask 392512   ;;  %vm1311_vm14 = vcmask 458112  }
 0x145   : > { %v3447_v21 = vld [vmem:[#allocation2 + $0x8f] sm:$0xff]  ;;  %v3452_v23 = vld [vmem:[#allocation2 + $0xa7] sm:$0xff]  ;;  %vm1408_vm15 = vcmask 523712   ;;  %vm1505_vm2 = vcmask 589312   ;;  %vm1582_vm3 = vcmask 588800   ;;  %s4273_s4 = sld [smem:[#allocation31_spill]] }
 0x146   : > { %738 = vst.msk [vmem:[#allocation3 + $0x48] sm:$0xff] %vm669_vm1, %v3447_v21  ;;  %973 = vrot.lane.b32.xlu1 %v940_v1, %s2836_s5  ;;  %739 = vst.msk [vmem:[#allocation3 + $0x50] sm:$0xff] %vm669_vm1, %v3452_v23  ;;  %v3499_v44 = vld [vmem:[#allocation2 + $0x49] sm:$0xff]  ;;  %v1428_v61 = vld [vmem:[#allocation2 + $0x71] sm:$0xff]  ;;  %v566_v1 = vmul.f32 %v3358_v3, %v538_v63  ;;  %s2177_s26 = sshll.u32 %s4272_s21, 4  ;;  %s1858_s23 = sshll.u32 %s3854_s24, 4  ;;  %s3948_s23 = int_to_ptr.vmem [resolvable:$true] %s1858_s23 }
 0x147   : > { %1068 = vrot.lane.b32.xlu0 %v747_v59, %s2837_s0  ;;  %v3459_v25 = vld [vmem:[#allocation2 + $0xaf] sm:$0xff]  ;;  %p4275_p0 = scmp.ne.s32.totalorder %s4241_s15, 0 }
 0x148   : > { %740 = vst.msk [vmem:[#allocation3 + $0x58] sm:$0xff] %vm669_vm1, %v3459_v25  ;;  %v2422_v54 = vld [vmem:[#allocation10 + $0x10] sm:$0xff]   ;;  %v1330_v55 = vld [vmem:[#allocation2 + $0x68] sm:$0xff]  ;;  %v588_v5 = vadd.f32 %v3360_v4, %v566_v1 }
 0x149   : > { %v3472_v34 = vld [vmem:[#allocation2 + $0xc7] sm:$0xff]  ;;  %v3474_v35 = vld [vmem:[#allocation2 + $0xcf] sm:$0xff]  ;;  %2195 = vmatprep.subr.bf16.mxu0 %v2422_v54  ;;  %2219 = vmatprep.subr.bf16.mxu1 %v2422_v54 }
 0x14a   : > { %977 = vrot.lane.b32.xlu1 %v3418_v9, %s2836_s5  ;;  %741 = vst.msk [vmem:[#allocation3 + $0x60] sm:$0xff] %vm669_vm1, %v3472_v34  ;;  %742 = vst.msk [vmem:[#allocation3 + $0x68] sm:$0xff] %vm669_vm1, %v3474_v35  ;;  %v3513_v51 = vld [vmem:[#allocation2 + $0xe7] sm:$0xff]  ;;  %v1331_v56 = vld [vmem:[#allocation2 + $0x70] sm:$0xff]  ;;  %2196 = vmatpush3.bf16.msra.mxu0 %v2422_v54  ;;  %v620_v7 = vmul.f32 0.01, %v588_v5 }
 0x14b   : > { %777 = vrot.lane.b32.xlu0 %v745_v26, %s2835_s22  ;;  %v3515_v52 = vld [vmem:[#allocation2 + $0xef] sm:$0xff]  ;;  %743 = vst.msk [vmem:[#allocation3 + $0x70] sm:$0xff] %vm669_vm1, %v3513_v51  ;;  %2224 = vmatpush3.bf16.msra.mxu1 %v2422_v54  ;;  %vm604_vm6 = vcmp.ge.f32.partialorder %v588_v5, 0.0  ;;  %s2168_s9 = sshll.u32 %s4273_s4, 5 }
 0x14c   : > { %744 = vst.msk [vmem:[#allocation3 + $0x78] sm:$0xff] %vm669_vm1, %v3515_v52  ;;  %2197 = vmatprep.subr.bf16.mxu0 %v2423_v57  ;;  %2220 = vmatprep.subr.bf16.mxu1 %v2423_v57  ;;  %v1427_v60 = vld [vmem:[#allocation2 + $0x69] sm:$0xff]  ;;  %v1432_v38 = vld [vmem:[#allocation2 + $0xb1] sm:$0xff] }
 0x14d   : > { %v1042_v10 = vld [vmem:[#allocation2 + $0x88] sm:$0xff]  ;;  %v1043_v12 = vld [vmem:[#allocation2 + $0x90] sm:$0xff] }
 0x14e   : > { %1070 = vrot.lane.b32.xlu1 %v748_v0, %s2837_s0  ;;  %2198 = vmatpush3.bf16.msra.mxu0 %v2423_v57  ;;  %v542_v15 = vld [vmem:[%s449_s25 + $0x8] sm:$0xff]  ;;  %v3596_v30 = vld [vmem:[#allocation2 + $0xb0] sm:$0xff] }
 0x14f   : > { %779 = vrot.lane.b32.xlu0 %v746_v31, %s2835_s22  ;;  %2225 = vmatpush3.bf16.msra.mxu1 %v2423_v57  ;;  %v1139_v22 = vld [vmem:[#allocation2 + $0x89] sm:$0xff] }
 0x152   : > { %876 = vrot.lane.b32.xlu1 %v843_v33, %s2834_s2 }
 0x153   : > { %874 = vrot.lane.b32.xlu0 %v842_v32, %s2834_s2 }
 0x156   : > { %1074 = vrot.lane.b32.xlu1 %v3484_v37, %s2837_s0 }
 0x157   : > { %1072 = vrot.lane.b32.xlu0 %v3482_v36, %s2837_s0 }
 0x15a   : > { %1167 = vrot.lane.b32.xlu1 %v845_v13, %s2838_s29  ;;  %v541_v13 = vld [vmem:[%s449_s25] sm:$0xff]  ;;  %s1855_s25 = sadd.s32 %s2177_s26, %s2168_s9 }
 0x15b   : > { %1165 = vrot.lane.b32.xlu0 %v3405_v58, %s2838_s29  ;;  %v2424_v58 = vld [vmem:[#allocation10 + $0x20] ss:$0 sps:$4 sm:$0xff]   ;;  %s2169_s28 = sshll.u32 %s1855_s25, 7 }
 0x15c   : > { %2227 = vmatprep.subr.msk.bf16.mxu0 %vm1607_vm4, %v2424_v58  ;;  %v1609_v59 = vsel %vm1607_vm4, %v2424_v58, 0  ;;  %2228 = vmatprep.subr.msk.bf16.mxu1 %vm1607_vm4, %v2424_v58 }
 0x15d   : > { %2200 = vmatpush3.bf16.msra.mxu0 %v1609_v59  ;;  %2226 = vmatpush3.bf16.msra.mxu1 %v1609_v59  ;;  %v3662_v59 = vld [vmem:[#allocation2 + $0xc9] sm:$0xff] }
 0x15e   : > { %1171 = vrot.lane.b32.xlu1 %v3501_v45, %s2838_s29 }
 0x15f   : > { %1169 = vrot.lane.b32.xlu0 %v3499_v44, %s2838_s29 }
 0x162   : > { %1265 = vrot.lane.b32.xlu1 %v3418_v9, %s2839_s20  ;;  %v636_v9 = vsel %vm604_vm6, %v588_v5, %v620_v7 }
 0x163   : > { %1263 = vrot.lane.b32.xlu0 %v3411_v62, %s2839_s20  ;;  %v537_v62 = vld [vmem:[%s3302_s1 + $0x70] sm:$0xff]  ;;  %688 = vst.msk [vmem:[#allocation2 + $0x110] sm:$0xff] %vm669_vm1, %v636_v9  ;;  %s664_s1 = scalar_select %p663_p4, 1, 0 }
 0x164   : > { %v565_v0 = vmul.f32 %v3358_v3, %v537_v62 }
 0x165   : > { %s665_s17 = scvt.s32.f32 %s664_s1 }
 0x166   : > { %1269 = vrot.lane.b32.xlu1 %v3430_v14, %s2839_s20  ;;  %v587_v2 = vadd.f32 %v3360_v4, %v565_v0 }
 0x167   : > { %1267 = vrot.lane.b32.xlu0 %v3424_v11, %s2839_s20  ;;  %v666_v26 = vstv %s665_s17 }
 0x168   : > { %v619_v6 = vmul.f32 0.01, %v587_v2  ;;  %vm603_vm5 = vcmp.ge.f32.partialorder %v587_v2, 0.0 }
 0x16a   : > { %1362 = vrot.lane.b32.xlu1 %v3484_v37, %s2840_s6  ;;  %v635_v8 = vsel %vm603_vm5, %v587_v2, %v619_v6 }
 0x16b   : > { %1360 = vrot.lane.b32.xlu0 %v3482_v36, %s2840_s6  ;;  %687 = vst.msk [vmem:[#allocation2 + $0x108] sm:$0xff] %vm669_vm1, %v635_v8 }
 0x16e   : > { %1366 = vrot.lane.b32.xlu1 %v1331_v56, %s2840_s6 }
 0x16f   : > { %1364 = vrot.lane.b32.xlu0 %v1330_v55, %s2840_s6 }
 0x172   : > { %1459 = vrot.lane.b32.xlu1 %v3501_v45, %s2841_s16 }
 0x173   : > { %1457 = vrot.lane.b32.xlu0 %v3499_v44, %s2841_s16 }
 0x176   : > { %787 = vrot.lane.b32.xlu1 %v3484_v37, %s2835_s22  ;;  %v1431_v37 = vld [vmem:[#allocation2 + $0xa9] sm:$0xff] }
 0x177   : > { %785 = vrot.lane.b32.xlu0 %v3482_v36, %s2835_s22 }
 0x17a   : > { %1463 = vrot.lane.b32.xlu1 %v1428_v61, %s2841_s16 }
 0x17b   : > { %1461 = vrot.lane.b32.xlu0 %v1427_v60, %s2841_s16 }
 0x17e   : > { %791 = vrot.lane.b32.xlu1 %v1331_v56, %s2835_s22 }
 0x17f   : > { %789 = vrot.lane.b32.xlu0 %v1330_v55, %s2835_s22 }
 0x182   : > { %884 = vrot.lane.b32.xlu1 %v3501_v45, %s2834_s2 }
 0x183   : > { %882 = vrot.lane.b32.xlu0 %v3499_v44, %s2834_s2 }
 0x186   : > { %888 = vrot.lane.b32.xlu1 %v1428_v61, %s2834_s2 }
 0x187   : > { %886 = vrot.lane.b32.xlu0 %v1427_v60, %s2834_s2 }
 0x18a   : > { %981 = vrot.lane.b32.xlu1 %v3430_v14, %s2836_s5  ;;  %v648_v14 = vmul.f32 %v3358_v3, %v542_v15 }
 0x18b   : > { %979 = vrot.lane.b32.xlu0 %v3424_v11, %s2836_s5  ;;  %v647_v11 = vmul.f32 %v3358_v3, %v541_v13  ;;  %v1140_v3 = vld [vmem:[#allocation2 + $0x91] sm:$0xff] }
 0x18c   : > { %v650_v17 = vadd.f32 %v3360_v4, %v648_v14 }
 0x18d   : > { %v649_v16 = vadd.f32 %v3360_v4, %v647_v11  ;;  %v3594_v4 = vld [vmem:[#allocation2 + $0xa8] sm:$0xff] }
 0x18e   : > { %985 = vrot.lane.b32.xlu1 %v3447_v21, %s2836_s5  ;;  %v654_v20 = vmul.f32 0.01, %v650_v17  ;;  %vm652_vm8 = vcmp.ge.f32.partialorder %v650_v17, 0.0 }
 0x18f   : > { %983 = vrot.lane.b32.xlu0 %v3444_v19, %s2836_s5  ;;  %v653_v18 = vmul.f32 0.01, %v649_v16  ;;  %vm651_vm7 = vcmp.ge.f32.partialorder %v649_v16, 0.0 }
 0x190   : > { %v656_v27 = vsel %vm652_vm8, %v650_v17, %v654_v20  ;;  %v1435_v20 = vld [vmem:[#allocation2 + $0xe9] sm:$0xff] }
 0x191   : > { %v655_v24 = vsel %vm651_vm7, %v649_v16, %v653_v18  ;;  %v668_v29 = vmul.f32 %v666_v26, %v656_v27 }
 0x192   : > { %1078 = vrot.lane.b32.xlu1 %v1331_v56, %s2837_s0  ;;  %v667_v28 = vmul.f32 %v666_v26, %v655_v24 }
 0x193   : > { %1076 = vrot.lane.b32.xlu0 %v1330_v55, %s2837_s0  ;;  %691 = vst.msk [vmem:[#allocation2 + $0x130] sm:$0xff] %vm669_vm1, %v668_v29 }
 0x194   : > { %690 = vst.msk [vmem:[#allocation2 + $0x128] sm:$0xff] %vm669_vm1, %v667_v28 }
 0x196   : > { %1082 = vrot.lane.b32.xlu1 %v1043_v12, %s2837_s0 }
 0x197   : > { %1080 = vrot.lane.b32.xlu0 %v1042_v10, %s2837_s0 }
 0x19a   : > { %1175 = vrot.lane.b32.xlu1 %v1428_v61, %s2838_s29 }
 0x19b   : > { %1173 = vrot.lane.b32.xlu0 %v1427_v60, %s2838_s29  ;;  %v3664_v60 = vld [vmem:[#allocation2 + $0xd1] sm:$0xff] }
 0x19e   : > { %1179 = vrot.lane.b32.xlu1 %v1140_v3, %s2838_s29 }
 0x19f   : > { %1177 = vrot.lane.b32.xlu0 %v1139_v22, %s2838_s29 }
 0x1a2   : > { %1273 = vrot.lane.b32.xlu1 %v3447_v21, %s2839_s20 }
 0x1a3   : > { %1271 = vrot.lane.b32.xlu0 %v3444_v19, %s2839_s20 }
 0x1a6   : > { %1277 = vrot.lane.b32.xlu1 %v3459_v25, %s2839_s20 }
 0x1a7   : > { %1275 = vrot.lane.b32.xlu0 %v3452_v23, %s2839_s20 }
 0x1aa   : > { %1370 = vrot.lane.b32.xlu1 %v1043_v12, %s2840_s6 }
 0x1ab   : > { %1368 = vrot.lane.b32.xlu0 %v1042_v10, %s2840_s6 }
 0x1ac   : > { %v782_v31 = vpop.permute.xlu1 %781 }
 0x1ad   : > { %v879_v19 = vpop.permute.xlu0 %878  ;;  %828 = vst.msk [vmem:[#allocation3 + $0x10] sm:$0xff] %vm825_vm9, %v782_v31 }
 0x1ae   : > { %1374 = vrot.lane.b32.xlu1 %v3596_v30, %s2840_s6  ;;  %925 = vst.msk [vmem:[#allocation3 + $0x10] sm:$0xff] %vm922_vm10, %v879_v19 }
 0x1af   : > { %1372 = vrot.lane.b32.xlu0 %v3594_v4, %s2840_s6 }
 0x1b0   : > { %v784_v32 = vpop.permute.xlu1 %783 }
 0x1b1   : > { %v972_v21 = vpop.permute.xlu0 %971  ;;  %829 = vst.msk [vmem:[#allocation3 + $0x18] sm:$0xff] %vm825_vm9, %v784_v32  ;;  %v954_v32 = vld [vmem:[#allocation2 + $0x10f] sm:$0xff] }
 0x1b2   : > { %1467 = vrot.lane.b32.xlu1 %v1140_v3, %s2841_s16 }
 0x1b3   : > { %1465 = vrot.lane.b32.xlu0 %v1139_v22, %s2841_s16 }
 0x1b4   : > { %v881_v36 = vpop.permute.xlu1 %880 }
 0x1b5   : > { %v976_v33 = vpop.permute.xlu0 %975  ;;  %926 = vst.msk [vmem:[#allocation3 + $0x18] sm:$0xff] %vm922_vm10, %v881_v36 }
 0x1b6   : > { %1022 = vst.msk [vmem:[#allocation3 + $0x10] sm:$0xff] %vm1019_vm11, %v976_v33  ;;  %795 = vrot.lane.b32.xlu1 %v1043_v12, %s2835_s22 }
 0x1b7   : > { %793 = vrot.lane.b32.xlu0 %v1042_v10, %s2835_s22 }
 0x1b8   : > { %v974_v40 = vpop.permute.xlu1 %973 }
 0x1b9   : > { %v1069_v39 = vpop.permute.xlu0 %1068 }
 0x1ba   : > { %1471 = vrot.lane.b32.xlu1 %v1432_v38, %s2841_s16 }
 0x1bb   : > { %1469 = vrot.lane.b32.xlu0 %v1431_v37, %s2841_s16 }
 0x1bc   : > { %v978_v42 = vpop.permute.xlu1 %977 }
 0x1bd   : > { %v778_v41 = vpop.permute.xlu0 %777  ;;  %1023 = vst.msk [vmem:[#allocation3 + $0x18] sm:$0xff] %vm1019_vm11, %v978_v42 }
 0x1be   : > { %826 = vst.msk [vmem:[#allocation3] sm:$0xff] %vm825_vm9, %v778_v41  ;;  %799 = vrot.lane.b32.xlu1 %v3596_v30, %s2835_s22 }
 0x1bf   : > { %797 = vrot.lane.b32.xlu0 %v3594_v4, %s2835_s22 }
 0x1c0   : > { %v1071_v44 = vpop.permute.xlu1 %1070 }
 0x1c1   : > { %v780_v43 = vpop.permute.xlu0 %779 }
 0x1c2   : > { %827 = vst.msk [vmem:[#allocation3 + $0x8] sm:$0xff] %vm825_vm9, %v780_v43  ;;  %892 = vrot.lane.b32.xlu1 %v1140_v3, %s2834_s2  ;;  %v1147_v43 = vld [vmem:[#allocation2 + $0x109] sm:$0xff] }
 0x1c3   : > { %890 = vrot.lane.b32.xlu0 %v1139_v22, %s2834_s2  ;;  %v1436_v22 = vld [vmem:[#allocation2 + $0xf1] sm:$0xff] }
 0x1c4   : > { %v877_v46 = vpop.permute.xlu1 %876 }
 0x1c5   : > { %v875_v45 = vpop.permute.xlu0 %874  ;;  %924 = vst.msk [vmem:[#allocation3 + $0x8] sm:$0xff] %vm922_vm10, %v877_v46 }
 0x1c6   : > { %923 = vst.msk [vmem:[#allocation3] sm:$0xff] %vm922_vm10, %v875_v45  ;;  %896 = vrot.lane.b32.xlu1 %v1432_v38, %s2834_s2 }
 0x1c7   : > { %1020 = vst.msk [vmem:[#allocation3] sm:$0xff] %vm1019_vm11, %v972_v21  ;;  %1021 = vst.msk [vmem:[#allocation3 + $0x8] sm:$0xff] %vm1019_vm11, %v974_v40  ;;  %894 = vrot.lane.b32.xlu0 %v1431_v37, %s2834_s2  ;;  %v953_v21 = vld [vmem:[#allocation2 + $0x107] sm:$0xff] }
 0x1c8   : > { %1117 = vst.msk [vmem:[#allocation3] sm:$0xff] %vm1116_vm12, %v1069_v39  ;;  %1118 = vst.msk [vmem:[#allocation3 + $0x8] sm:$0xff] %vm1116_vm12, %v1071_v44  ;;  %v1075_v48 = vpop.permute.xlu1 %1074  ;;  %v1148_v44 = vld [vmem:[#allocation2 + $0x111] sm:$0xff] }
 0x1c9   : > { %v1073_v47 = vpop.permute.xlu0 %1072  ;;  %1120 = vst.msk [vmem:[#allocation3 + $0x18] sm:$0xff] %vm1116_vm12, %v1075_v48 }
 0x1ca   : > { %1119 = vst.msk [vmem:[#allocation3 + $0x10] sm:$0xff] %vm1116_vm12, %v1073_v47  ;;  %989 = vrot.lane.b32.xlu1 %v3459_v25, %s2836_s5  ;;  %v3650_v25 = vld [vmem:[#allocation2 + $0xd0] sm:$0xff] }
 0x1cb   : > { %987 = vrot.lane.b32.xlu0 %v3452_v23, %s2836_s5  ;;  %v3648_v23 = vld [vmem:[#allocation2 + $0xc8] sm:$0xff] }
 0x1cc   : > { %v1168_v50 = vpop.permute.xlu1 %1167 }
 0x1cd   : > { %v1166_v49 = vpop.permute.xlu0 %1165  ;;  %1215 = vst.msk [vmem:[#allocation3 + $0x8] sm:$0xff] %vm1213_vm13, %v1168_v50  ;;  %v1246_v50 = vld [vmem:[#allocation2 + $0x12f] sm:$0xff] }
 0x1ce   : > { %1214 = vst.msk [vmem:[#allocation3] sm:$0xff] %vm1213_vm13, %v1166_v49  ;;  %993 = vrot.lane.b32.xlu1 %v3474_v35, %s2836_s5  ;;  %v1245_v49 = vld [vmem:[#allocation2 + $0x127] sm:$0xff] }
 0x1cf   : > { %991 = vrot.lane.b32.xlu0 %v3472_v34, %s2836_s5 }
 0x1d0   : > { %v1172_v54 = vpop.permute.xlu1 %1171 }
 0x1d1   : > { %v1170_v53 = vpop.permute.xlu0 %1169  ;;  %1217 = vst.msk [vmem:[#allocation3 + $0x18] sm:$0xff] %vm1213_vm13, %v1172_v54 }
 0x1d2   : > { %1216 = vst.msk [vmem:[#allocation3 + $0x10] sm:$0xff] %vm1213_vm13, %v1170_v53  ;;  %1086 = vrot.lane.b32.xlu1 %v3596_v30, %s2837_s0 }
 0x1d3   : > { %1084 = vrot.lane.b32.xlu0 %v3594_v4, %s2837_s0 }
 0x1d4   : > { %v1266_v56 = vpop.permute.xlu1 %1265 }
 0x1d5   : > { %v1264_v55 = vpop.permute.xlu0 %1263  ;;  %1313 = vst.msk [vmem:[#allocation3 + $0x8] sm:$0xff] %vm1311_vm14, %v1266_v56  ;;  %v1343_v56 = vld [vmem:[#allocation2 + $0x130] sm:$0xff] }
 0x1d6   : > { %1312 = vst.msk [vmem:[#allocation3] sm:$0xff] %vm1311_vm14, %v1264_v55  ;;  %1090 = vrot.lane.b32.xlu1 %v3650_v25, %s2837_s0  ;;  %v1342_v55 = vld [vmem:[#allocation2 + $0x128] sm:$0xff] }
 0x1d7   : > { %1088 = vrot.lane.b32.xlu0 %v3648_v23, %s2837_s0 }
 0x1d8   : > { %v1270_v58 = vpop.permute.xlu1 %1269 }
 0x1d9   : > { %v1268_v57 = vpop.permute.xlu0 %1267  ;;  %1315 = vst.msk [vmem:[#allocation3 + $0x18] sm:$0xff] %vm1311_vm14, %v1270_v58 }
 0x1da   : > { %1314 = vst.msk [vmem:[#allocation3 + $0x10] sm:$0xff] %vm1311_vm14, %v1268_v57  ;;  %1183 = vrot.lane.b32.xlu1 %v1432_v38, %s2838_s29 }
 0x1db   : > { %1181 = vrot.lane.b32.xlu0 %v1431_v37, %s2838_s29 }
 0x1dc   : > { %v1363_v62 = vpop.permute.xlu1 %1362 }
 0x1dd   : > { %v1361_v61 = vpop.permute.xlu0 %1360  ;;  %1410 = vst.msk [vmem:[#allocation3 + $0x8] sm:$0xff] %vm1408_vm15, %v1363_v62 }
 0x1de   : > { %1409 = vst.msk [vmem:[#allocation3] sm:$0xff] %vm1408_vm15, %v1361_v61  ;;  %1187 = vrot.lane.b32.xlu1 %v3664_v60, %s2838_s29 }
 0x1df   : > { %1185 = vrot.lane.b32.xlu0 %v3662_v59, %s2838_s29 }
 0x1e0   : > { %v1367_v0 = vpop.permute.xlu1 %1366 }
 0x1e1   : > { %v1365_v63 = vpop.permute.xlu0 %1364  ;;  %1412 = vst.msk [vmem:[#allocation3 + $0x18] sm:$0xff] %vm1408_vm15, %v1367_v0  ;;  %v1439_v0 = vld [vmem:[#allocation2 + $0x129] sm:$0xff] }
 0x1e2   : > { %1411 = vst.msk [vmem:[#allocation3 + $0x10] sm:$0xff] %vm1408_vm15, %v1365_v63  ;;  %1281 = vrot.lane.b32.xlu1 %v3474_v35, %s2839_s20  ;;  %v3692_v35 = vld [vmem:[#allocation2 + $0xf0] sm:$0xff] }
 0x1e3   : > { %1279 = vrot.lane.b32.xlu0 %v3472_v34, %s2839_s20  ;;  %v3690_v34 = vld [vmem:[#allocation2 + $0xe8] sm:$0xff] }
 0x1e4   : > { %v1460_v2 = vpop.permute.xlu1 %1459 }
 0x1e5   : > { %v1458_v1 = vpop.permute.xlu0 %1457  ;;  %1507 = vst.msk [vmem:[#allocation3 + $0x8] sm:$0xff] %vm1505_vm2, %v1460_v2 }
 0x1e6   : > { %1506 = vst.msk [vmem:[#allocation3] sm:$0xff] %vm1505_vm2, %v1458_v1  ;;  %1285 = vrot.lane.b32.xlu1 %v3515_v52, %s2839_s20  ;;  %v1440_v1 = vld [vmem:[#allocation2 + $0x131] sm:$0xff] }
 0x1e7   : > { %1283 = vrot.lane.b32.xlu0 %v3513_v51, %s2839_s20 }
 0x1e8   : > { %v788_v6 = vpop.permute.xlu1 %787 }
 0x1e9   : > { %v786_v5 = vpop.permute.xlu0 %785  ;;  %831 = vst.msk [vmem:[#allocation3 + $0x28] sm:$0xff] %vm825_vm9, %v788_v6 }
 0x1ea   : > { %830 = vst.msk [vmem:[#allocation3 + $0x20] sm:$0xff] %vm825_vm9, %v786_v5  ;;  %1378 = vrot.lane.b32.xlu1 %v3650_v25, %s2840_s6 }
 0x1eb   : > { %1376 = vrot.lane.b32.xlu0 %v3648_v23, %s2840_s6 }
 0x1ec   : > { %v1464_v8 = vpop.permute.xlu1 %1463  ;;  %v1523_v10 = vld [vmem:[#allocation3 + $0x8] sm:$0xff] }
 0x1ed   : > { %v1462_v7 = vpop.permute.xlu0 %1461  ;;  %v1522_v9 = vld [vmem:[#allocation3] sm:$0xff]  ;;  %1509 = vst.msk [vmem:[#allocation3 + $0x18] sm:$0xff] %vm1505_vm2, %v1464_v8 }
 0x1ee   : > { %1508 = vst.msk [vmem:[#allocation3 + $0x10] sm:$0xff] %vm1505_vm2, %v1462_v7  ;;  %v1538_v12 = vpack.c.bf16 %v1523_v10, %v1522_v9  ;;  %1382 = vrot.lane.b32.xlu1 %v3692_v35, %s2840_s6 }
 0x1ef   : > { %1380 = vrot.lane.b32.xlu0 %v3690_v34, %s2840_s6 }
 0x1f0   : > { %2201 = vmatprep.mubr.msk.bf16.mxu0 %vm1582_vm3, %v1538_v12  ;;  %v792_v15 = vpop.permute.xlu1 %791 }
 0x1f1   : > { %v790_v13 = vpop.permute.xlu0 %789  ;;  %833 = vst.msk [vmem:[#allocation3 + $0x38] sm:$0xff] %vm825_vm9, %v792_v15 }
 0x1f2   : > { %832 = vst.msk [vmem:[#allocation3 + $0x30] sm:$0xff] %vm825_vm9, %v790_v13  ;;  %1475 = vrot.lane.b32.xlu1 %v3664_v60, %s2841_s16 }
 0x1f3   : > { %1473 = vrot.lane.b32.xlu0 %v3662_v59, %s2841_s16 }
 0x1f4   : > { %v885_v14 = vpop.permute.xlu1 %884  ;;  %v1525_v17 = vld [vmem:[#allocation3 + $0x18] sm:$0xff] }
 0x1f5   : > { %v883_v11 = vpop.permute.xlu0 %882  ;;  %v1524_v16 = vld [vmem:[#allocation3 + $0x10] sm:$0xff]  ;;  %928 = vst.msk [vmem:[#allocation3 + $0x28] sm:$0xff] %vm922_vm10, %v885_v14 }
 0x1f6   : > { %927 = vst.msk [vmem:[#allocation3 + $0x20] sm:$0xff] %vm922_vm10, %v883_v11  ;;  %v1539_v18 = vpack.c.bf16 %v1525_v17, %v1524_v16  ;;  %803 = vrot.lane.b32.xlu1 %v3650_v25, %s2835_s22 }
 0x1f7   : > { %801 = vrot.lane.b32.xlu0 %v3648_v23, %s2835_s22 }
 0x1f8   : > { %2202 = vmatmul.mubr.msk.bf16.vlgmr.msra.gmra.mrb[0].mxu0 %vm1582_vm3, %v1539_v18  ;;  %v889_v24 = vpop.permute.xlu1 %888 }
 0x1f9   : > { %v887_v3 = vpop.permute.xlu0 %886  ;;  %930 = vst.msk [vmem:[#allocation3 + $0x38] sm:$0xff] %vm922_vm10, %v889_v24 }
 0x1fa   : > { %929 = vst.msk [vmem:[#allocation3 + $0x30] sm:$0xff] %vm922_vm10, %v887_v3  ;;  %1479 = vrot.lane.b32.xlu1 %v1436_v22, %s2841_s16 }
 0x1fb   : > { %1477 = vrot.lane.b32.xlu0 %v1435_v20, %s2841_s16 }
 0x1fc   : > { %v982_v27 = vpop.permute.xlu1 %981 }
 0x1fd   : > { %v980_v26 = vpop.permute.xlu0 %979  ;;  %1025 = vst.msk [vmem:[#allocation3 + $0x28] sm:$0xff] %vm1019_vm11, %v982_v27 }
 0x1fe   : > { %1024 = vst.msk [vmem:[#allocation3 + $0x20] sm:$0xff] %vm1019_vm11, %v980_v26  ;;  %807 = vrot.lane.b32.xlu1 %v3692_v35, %s2835_s22 }
 0x1ff   : > { %805 = vrot.lane.b32.xlu0 %v3690_v34, %s2835_s22 }
 0x200   : > { %v986_v29 = vpop.permute.xlu1 %985 }
 0x201   : > { %v984_v28 = vpop.permute.xlu0 %983  ;;  %1027 = vst.msk [vmem:[#allocation3 + $0x38] sm:$0xff] %vm1019_vm11, %v986_v29 }
 0x202   : > { %1026 = vst.msk [vmem:[#allocation3 + $0x30] sm:$0xff] %vm1019_vm11, %v984_v28  ;;  %900 = vrot.lane.b32.xlu1 %v3664_v60, %s2834_s2 }
 0x203   : > { %898 = vrot.lane.b32.xlu0 %v3662_v59, %s2834_s2 }
 0x204   : > { %v1079_v30 = vpop.permute.xlu1 %1078 }
 0x205   : > { %v1077_v4 = vpop.permute.xlu0 %1076  ;;  %1122 = vst.msk [vmem:[#allocation3 + $0x28] sm:$0xff] %vm1116_vm12, %v1079_v30 }
 0x206   : > { %1121 = vst.msk [vmem:[#allocation3 + $0x20] sm:$0xff] %vm1116_vm12, %v1077_v4  ;;  %904 = vrot.lane.b32.xlu1 %v1436_v22, %s2834_s2 }
 0x207   : > { %902 = vrot.lane.b32.xlu0 %v1435_v20, %s2834_s2 }
 0x208   : > { %v1083_v31 = vpop.permute.xlu1 %1082 }
 0x209   : > { %v1081_v19 = vpop.permute.xlu0 %1080  ;;  %1124 = vst.msk [vmem:[#allocation3 + $0x38] sm:$0xff] %vm1116_vm12, %v1083_v31 }
 0x20a   : > { %1123 = vst.msk [vmem:[#allocation3 + $0x30] sm:$0xff] %vm1116_vm12, %v1081_v19  ;;  %997 = vrot.lane.b32.xlu1 %v3515_v52, %s2836_s5  ;;  %v1051_v52 = vld [vmem:[#allocation2 + $0x110] sm:$0xff] }
 0x20b   : > { %995 = vrot.lane.b32.xlu0 %v3513_v51, %s2836_s5  ;;  %v1050_v51 = vld [vmem:[#allocation2 + $0x108] sm:$0xff] }
 0x20c   : > { %v1176_v36 = vpop.permute.xlu1 %1175 }
 0x20d   : > { %v1174_v33 = vpop.permute.xlu0 %1173  ;;  %1219 = vst.msk [vmem:[#allocation3 + $0x28] sm:$0xff] %vm1213_vm13, %v1176_v36 }
 0x20e   : > { %1218 = vst.msk [vmem:[#allocation3 + $0x20] sm:$0xff] %vm1213_vm13, %v1174_v33  ;;  %1001 = vrot.lane.b32.xlu1 %v954_v32, %s2836_s5 }
 0x20f   : > { %999 = vrot.lane.b32.xlu0 %v953_v21, %s2836_s5 }
 0x210   : > { %v1180_v38 = vpop.permute.xlu1 %1179 }
 0x211   : > { %v1178_v37 = vpop.permute.xlu0 %1177  ;;  %1221 = vst.msk [vmem:[#allocation3 + $0x38] sm:$0xff] %vm1213_vm13, %v1180_v38 }
 0x212   : > { %1220 = vst.msk [vmem:[#allocation3 + $0x30] sm:$0xff] %vm1213_vm13, %v1178_v37  ;;  %1094 = vrot.lane.b32.xlu1 %v3692_v35, %s2837_s0 }
 0x213   : > { %1092 = vrot.lane.b32.xlu0 %v3690_v34, %s2837_s0 }
 0x214   : > { %v1274_v40 = vpop.permute.xlu1 %1273 }
 0x215   : > { %v1272_v39 = vpop.permute.xlu0 %1271  ;;  %1317 = vst.msk [vmem:[#allocation3 + $0x28] sm:$0xff] %vm1311_vm14, %v1274_v40 }
 0x216   : > { %1316 = vst.msk [vmem:[#allocation3 + $0x20] sm:$0xff] %vm1311_vm14, %v1272_v39  ;;  %1098 = vrot.lane.b32.xlu1 %v1051_v52, %s2837_s0 }
 0x217   : > { %1096 = vrot.lane.b32.xlu0 %v1050_v51, %s2837_s0  ;;  %s4274_s0 = sld [smem:[#allocation47_spill]] }
 0x218   : > { %v1278_v42 = vpop.permute.xlu1 %1277 }
 0x219   : > { %v1276_v41 = vpop.permute.xlu0 %1275  ;;  %1319 = vst.msk [vmem:[#allocation3 + $0x38] sm:$0xff] %vm1311_vm14, %v1278_v42 }
 0x21a   : > { %1318 = vst.msk [vmem:[#allocation3 + $0x30] sm:$0xff] %vm1311_vm14, %v1276_v41  ;;  %1191 = vrot.lane.b32.xlu1 %v1436_v22, %s2838_s29 }
 0x21b   : > { %1189 = vrot.lane.b32.xlu0 %v1435_v20, %s2838_s29 }
 0x21c   : > { %v1371_v46 = vpop.permute.xlu1 %1370 }
 0x21d   : > { %v1369_v45 = vpop.permute.xlu0 %1368  ;;  %1414 = vst.msk [vmem:[#allocation3 + $0x28] sm:$0xff] %vm1408_vm15, %v1371_v46 }
 0x21e   : > { %1413 = vst.msk [vmem:[#allocation3 + $0x20] sm:$0xff] %vm1408_vm15, %v1369_v45  ;;  %1195 = vrot.lane.b32.xlu1 %v1148_v44, %s2838_s29 }
 0x21f   : > { %1193 = vrot.lane.b32.xlu0 %v1147_v43, %s2838_s29  ;;  %s3960_s29 = scalar_lea.hbm %s4274_s0, %s2169_s28 }
 0x220   : > { %v1375_v48 = vpop.permute.xlu1 %1374 }
 0x221   : > { %v1373_v47 = vpop.permute.xlu0 %1372  ;;  %1416 = vst.msk [vmem:[#allocation3 + $0x38] sm:$0xff] %vm1408_vm15, %v1375_v48 }
 0x222   : > { %1415 = vst.msk [vmem:[#allocation3 + $0x30] sm:$0xff] %vm1408_vm15, %v1373_v47  ;;  %1289 = vrot.lane.b32.xlu1 %v954_v32, %s2839_s20 }
 0x223   : > { %1287 = vrot.lane.b32.xlu0 %v953_v21, %s2839_s20 }
 0x224   : > { %v1468_v54 = vpop.permute.xlu1 %1467 }
 0x225   : > { %v1466_v53 = vpop.permute.xlu0 %1465  ;;  %1511 = vst.msk [vmem:[#allocation3 + $0x28] sm:$0xff] %vm1505_vm2, %v1468_v54 }
 0x226   : > { %1510 = vst.msk [vmem:[#allocation3 + $0x20] sm:$0xff] %vm1505_vm2, %v1466_v53  ;;  %1293 = vrot.lane.b32.xlu1 %v1246_v50, %s2839_s20 }
 0x227   : > { %1291 = vrot.lane.b32.xlu0 %v1245_v49, %s2839_s20  ;;  %s1834_s20 = scalar_lea.sflag [#allocation6], %s3296_s27 }
 0x228   : > { %v796_v25 = vpop.permute.xlu1 %795 }
 0x229   : > { %v794_v23 = vpop.permute.xlu0 %793  ;;  %835 = vst.msk [vmem:[#allocation3 + $0x48] sm:$0xff] %vm825_vm9, %v796_v25 }
 0x22a   : > { %834 = vst.msk [vmem:[#allocation3 + $0x40] sm:$0xff] %vm825_vm9, %v794_v23  ;;  %1386 = vrot.lane.b32.xlu1 %v1051_v52, %s2840_s6 }
 0x22b   : > { %1384 = vrot.lane.b32.xlu0 %v1050_v51, %s2840_s6 }
 0x22c   : > { %v1472_v58 = vpop.permute.xlu1 %1471  ;;  %v1527_v60 = vld [vmem:[#allocation3 + $0x28] sm:$0xff] }
 0x22d   : > { %v1470_v57 = vpop.permute.xlu0 %1469  ;;  %v1526_v59 = vld [vmem:[#allocation3 + $0x20] sm:$0xff]  ;;  %1513 = vst.msk [vmem:[#allocation3 + $0x38] sm:$0xff] %vm1505_vm2, %v1472_v58 }
 0x22e   : > { %1512 = vst.msk [vmem:[#allocation3 + $0x30] sm:$0xff] %vm1505_vm2, %v1470_v57  ;;  %v1540_v61 = vpack.c.bf16 %v1527_v60, %v1526_v59  ;;  %1390 = vrot.lane.b32.xlu1 %v1343_v56, %s2840_s6 }
 0x22f   : > { %1388 = vrot.lane.b32.xlu0 %v1342_v55, %s2840_s6  ;;  %s2599_s6 = scalar_lea.vmem %s3948_s23, 2048 }
 0x230   : > { %2205 = vmatprep.mubr.msk.bf16.mxu0 %vm1582_vm3, %v1540_v61  ;;  %v800_v63 = vpop.permute.xlu1 %799  ;;  %p2600_p5 = scmp.ne.s32.totalorder %s3948_s23, %s2599_s6 }
 0x231   : > { %v798_v62 = vpop.permute.xlu0 %797  ;;  %837 = vst.msk [vmem:[#allocation3 + $0x58] sm:$0xff] %vm825_vm9, %v800_v63 }
 0x232   : > { %836 = vst.msk [vmem:[#allocation3 + $0x50] sm:$0xff] %vm825_vm9, %v798_v62  ;;  %1483 = vrot.lane.b32.xlu1 %v1148_v44, %s2841_s16  ;;  %p2601_p8 = pnand %p2600_p5, %p4275_p0 }
 0x233   : > { %1481 = vrot.lane.b32.xlu0 %v1147_v43, %s2841_s16 }
 0x234   : > { %v893_v5 = vpop.permute.xlu1 %892  ;;  %v1529_v34 = vld [vmem:[#allocation3 + $0x38] sm:$0xff]  ;;  %p2602_p2 = pneg %p2601_p8 }
 0x235   : > { %v891_v2 = vpop.permute.xlu0 %890  ;;  %v1528_v6 = vld [vmem:[#allocation3 + $0x30] sm:$0xff]  ;;  %932 = vst.msk [vmem:[#allocation3 + $0x48] sm:$0xff] %vm922_vm10, %v893_v5 }
 0x236   : > { %931 = vst.msk [vmem:[#allocation3 + $0x40] sm:$0xff] %vm922_vm10, %v891_v2  ;;  %v1541_v35 = vpack.c.bf16 %v1529_v34, %v1528_v6  ;;  %1487 = vrot.lane.b32.xlu1 %v1440_v1, %s2841_s16 }
 0x237   : > { %1485 = vrot.lane.b32.xlu0 %v1439_v0, %s2841_s16  ;;  %s2842_s16 = smov [#allocation15]  }
 0x238   : > { %2206 = vmatmul.mubr.msk.bf16.gmra.mrb[4].mxu0 %vm1582_vm3, %v1541_v35  ;;  %v897_v8 = vpop.permute.xlu1 %896  ;;  %s2603_s1 = sshll.u32 %s2842_s16, 4  ;;  %s2604_s1 = int_to_ptr.vmem [resolvable:$false] %s2603_s1 }
 0x239   : > { %v895_v7 = vpop.permute.xlu0 %894  ;;  %934 = vst.msk [vmem:[#allocation3 + $0x58] sm:$0xff] %vm922_vm10, %v897_v8  ;;  %s2605_s17 = scalar_lea.vmem %s2604_s1, 4096  ;;  %p2606_p9 = scmp.lt.s32.totalorder %s3948_s23, %s2604_s1 }
 0x23a   : > { %933 = vst.msk [vmem:[#allocation3 + $0x50] sm:$0xff] %vm922_vm10, %v895_v7  ;;  %p2607_p7 = scmp.lt.s32.totalorder %s2605_s17, %s2599_s6 }
 0x23c   : > { %v990_v10 = vpop.permute.xlu1 %989  ;;  %p2608_p6 = por %p2607_p7, %p2606_p9 }
 0x23d   : > { %v988_v9 = vpop.permute.xlu0 %987  ;;  %1029 = vst.msk [vmem:[#allocation3 + $0x48] sm:$0xff] %vm1019_vm11, %v990_v10 }
 0x23e   : > { %1028 = vst.msk [vmem:[#allocation3 + $0x40] sm:$0xff] %vm1019_vm11, %v988_v9  ;;  %p2609_p13 = pnand %p2608_p6, %p2602_p2 }
 0x240   : > { %v994_v13 = vpop.permute.xlu1 %993 }
 0x241   : > { %v992_v12 = vpop.permute.xlu0 %991  ;;  %1031 = vst.msk [vmem:[#allocation3 + $0x58] sm:$0xff] %vm1019_vm11, %v994_v13 }
 0x242   : > { %1030 = vst.msk [vmem:[#allocation3 + $0x50] sm:$0xff] %vm1019_vm11, %v992_v12 }
 0x244   : > { %v1087_v11 = vpop.permute.xlu1 %1086 }
 0x245   : > { %v1085_v15 = vpop.permute.xlu0 %1084  ;;  %1126 = vst.msk [vmem:[#allocation3 + $0x48] sm:$0xff] %vm1116_vm12, %v1087_v11 }
 0x246   : > { %1125 = vst.msk [vmem:[#allocation3 + $0x40] sm:$0xff] %vm1116_vm12, %v1085_v15 }
 0x248   : > { %v1091_v16 = vpop.permute.xlu1 %1090 }
 0x249   : > { %v1089_v14 = vpop.permute.xlu0 %1088  ;;  %1128 = vst.msk [vmem:[#allocation3 + $0x58] sm:$0xff] %vm1116_vm12, %v1091_v16 }
 0x24a   : > { %1127 = vst.msk [vmem:[#allocation3 + $0x50] sm:$0xff] %vm1116_vm12, %v1089_v14 }
 0x24c   : > { %v1184_v18 = vpop.permute.xlu1 %1183 }
 0x24d   : > { %v1182_v17 = vpop.permute.xlu0 %1181  ;;  %1223 = vst.msk [vmem:[#allocation3 + $0x48] sm:$0xff] %vm1213_vm13, %v1184_v18 }
 0x24e   : > { %1222 = vst.msk [vmem:[#allocation3 + $0x40] sm:$0xff] %vm1213_vm13, %v1182_v17 }
 0x250   : > { %v1188_v22 = vpop.permute.xlu1 %1187 }
 0x251   : > { %v1186_v20 = vpop.permute.xlu0 %1185  ;;  %1225 = vst.msk [vmem:[#allocation3 + $0x58] sm:$0xff] %vm1213_vm13, %v1188_v22 }
 0x252   : > { %1224 = vst.msk [vmem:[#allocation3 + $0x50] sm:$0xff] %vm1213_vm13, %v1186_v20 }
 0x254   : > { %v1282_v24 = vpop.permute.xlu1 %1281 }
 0x255   : > { %v1280_v3 = vpop.permute.xlu0 %1279  ;;  %1321 = vst.msk [vmem:[#allocation3 + $0x48] sm:$0xff] %vm1311_vm14, %v1282_v24 }
 0x256   : > { %1320 = vst.msk [vmem:[#allocation3 + $0x40] sm:$0xff] %vm1311_vm14, %v1280_v3 }
 0x258   : > { %v1286_v27 = vpop.permute.xlu1 %1285 }
 0x259   : > { %v1284_v26 = vpop.permute.xlu0 %1283  ;;  %1323 = vst.msk [vmem:[#allocation3 + $0x58] sm:$0xff] %vm1311_vm14, %v1286_v27 }
 0x25a   : > { %1322 = vst.msk [vmem:[#allocation3 + $0x50] sm:$0xff] %vm1311_vm14, %v1284_v26 }
 0x25c   : > { %v1379_v29 = vpop.permute.xlu1 %1378 }
 0x25d   : > { %v1377_v28 = vpop.permute.xlu0 %1376  ;;  %1418 = vst.msk [vmem:[#allocation3 + $0x48] sm:$0xff] %vm1408_vm15, %v1379_v29 }
 0x25e   : > { %1417 = vst.msk [vmem:[#allocation3 + $0x40] sm:$0xff] %vm1408_vm15, %v1377_v28 }
 0x260   : > { %v1383_v30 = vpop.permute.xlu1 %1382 }
 0x261   : > { %v1381_v4 = vpop.permute.xlu0 %1380  ;;  %1420 = vst.msk [vmem:[#allocation3 + $0x58] sm:$0xff] %vm1408_vm15, %v1383_v30 }
 0x262   : > { %1419 = vst.msk [vmem:[#allocation3 + $0x50] sm:$0xff] %vm1408_vm15, %v1381_v4 }
 0x264   : > { %v1476_v31 = vpop.permute.xlu1 %1475 }
 0x265   : > { %v1474_v19 = vpop.permute.xlu0 %1473  ;;  %1515 = vst.msk [vmem:[#allocation3 + $0x48] sm:$0xff] %vm1505_vm2, %v1476_v31 }
 0x266   : > { %1514 = vst.msk [vmem:[#allocation3 + $0x40] sm:$0xff] %vm1505_vm2, %v1474_v19 }
 0x268   : > { %v804_v32 = vpop.permute.xlu1 %803 }
 0x269   : > { %v802_v21 = vpop.permute.xlu0 %801  ;;  %839 = vst.msk [vmem:[#allocation3 + $0x68] sm:$0xff] %vm825_vm9, %v804_v32 }
 0x26a   : > { %838 = vst.msk [vmem:[#allocation3 + $0x60] sm:$0xff] %vm825_vm9, %v802_v21 }
 0x26c   : > { %v1480_v36 = vpop.permute.xlu1 %1479  ;;  %v1531_v38 = vld [vmem:[#allocation3 + $0x48] sm:$0xff] }
 0x26d   : > { %v1478_v33 = vpop.permute.xlu0 %1477  ;;  %v1530_v37 = vld [vmem:[#allocation3 + $0x40] sm:$0xff]  ;;  %1517 = vst.msk [vmem:[#allocation3 + $0x58] sm:$0xff] %vm1505_vm2, %v1480_v36 }
 0x26e   : > { %1516 = vst.msk [vmem:[#allocation3 + $0x50] sm:$0xff] %vm1505_vm2, %v1478_v33  ;;  %v1542_v51 = vpack.c.bf16 %v1531_v38, %v1530_v37 }
 0x270   : > { %2209 = vmatprep.mubr.msk.bf16.mxu1 %vm1582_vm3, %v1542_v51  ;;  %v808_v39 = vpop.permute.xlu1 %807 }
 0x271   : > { %v806_v52 = vpop.permute.xlu0 %805  ;;  %841 = vst.msk [vmem:[#allocation3 + $0x78] sm:$0xff] %vm825_vm9, %v808_v39 }
 0x272   : > { %840 = vst.msk [vmem:[#allocation3 + $0x70] sm:$0xff] %vm825_vm9, %v806_v52 }
 0x274   : > { %v901_v41 = vpop.permute.xlu1 %900  ;;  %v1533_v43 = vld [vmem:[#allocation3 + $0x58] sm:$0xff] }
 0x275   : > { %v899_v40 = vpop.permute.xlu0 %898  ;;  %v1532_v42 = vld [vmem:[#allocation3 + $0x50] sm:$0xff]  ;;  %936 = vst.msk [vmem:[#allocation3 + $0x68] sm:$0xff] %vm922_vm10, %v901_v41 }
 0x276   : > { %935 = vst.msk [vmem:[#allocation3 + $0x60] sm:$0xff] %vm922_vm10, %v899_v40  ;;  %v1543_v44 = vpack.c.bf16 %v1533_v43, %v1532_v42 }
 0x278   : > { %2210 = vmatmul.mubr.msk.bf16.vlgmr.msra.gmra.mrb[0].mxu1 %vm1582_vm3, %v1543_v44  ;;  %v905_v46 = vpop.permute.xlu1 %904 }
 0x279   : > { %v903_v45 = vpop.permute.xlu0 %902  ;;  %938 = vst.msk [vmem:[#allocation3 + $0x78] sm:$0xff] %vm922_vm10, %v905_v46 }
 0x27a   : > { %937 = vst.msk [vmem:[#allocation3 + $0x70] sm:$0xff] %vm922_vm10, %v903_v45 }
 0x27c   : > { %v998_v48 = vpop.permute.xlu1 %997 }
 0x27d   : > { %v996_v47 = vpop.permute.xlu0 %995  ;;  %1033 = vst.msk [vmem:[#allocation3 + $0x68] sm:$0xff] %vm1019_vm11, %v998_v48 }
 0x27e   : > { %1032 = vst.msk [vmem:[#allocation3 + $0x60] sm:$0xff] %vm1019_vm11, %v996_v47 }
 0x280   : > { %v1002_v50 = vpop.permute.xlu1 %1001 }
 0x281   : > { %v1000_v49 = vpop.permute.xlu0 %999  ;;  %1035 = vst.msk [vmem:[#allocation3 + $0x78] sm:$0xff] %vm1019_vm11, %v1002_v50 }
 0x282   : > { %1034 = vst.msk [vmem:[#allocation3 + $0x70] sm:$0xff] %vm1019_vm11, %v1000_v49 }
 0x284   : > { %v1095_v54 = vpop.permute.xlu1 %1094 }
 0x285   : > { %v1093_v53 = vpop.permute.xlu0 %1092  ;;  %1130 = vst.msk [vmem:[#allocation3 + $0x68] sm:$0xff] %vm1116_vm12, %v1095_v54 }
 0x286   : > { %1129 = vst.msk [vmem:[#allocation3 + $0x60] sm:$0xff] %vm1116_vm12, %v1093_v53 }
 0x288   : > { %v1099_v25 = vpop.permute.xlu1 %1098 }
 0x289   : > { %v1097_v23 = vpop.permute.xlu0 %1096  ;;  %1132 = vst.msk [vmem:[#allocation3 + $0x78] sm:$0xff] %vm1116_vm12, %v1099_v25 }
 0x28a   : > { %1131 = vst.msk [vmem:[#allocation3 + $0x70] sm:$0xff] %vm1116_vm12, %v1097_v23 }
 0x28c   : > { %v1192_v56 = vpop.permute.xlu1 %1191 }
 0x28d   : > { %v1190_v55 = vpop.permute.xlu0 %1189  ;;  %1227 = vst.msk [vmem:[#allocation3 + $0x68] sm:$0xff] %vm1213_vm13, %v1192_v56 }
 0x28e   : > { %1226 = vst.msk [vmem:[#allocation3 + $0x60] sm:$0xff] %vm1213_vm13, %v1190_v55 }
 0x290   : > { %v1196_v58 = vpop.permute.xlu1 %1195 }
 0x291   : > { %v1194_v57 = vpop.permute.xlu0 %1193  ;;  %1229 = vst.msk [vmem:[#allocation3 + $0x78] sm:$0xff] %vm1213_vm13, %v1196_v58 }
 0x292   : > { %1228 = vst.msk [vmem:[#allocation3 + $0x70] sm:$0xff] %vm1213_vm13, %v1194_v57 }
 0x294   : > { %v1290_v60 = vpop.permute.xlu1 %1289 }
 0x295   : > { %v1288_v59 = vpop.permute.xlu0 %1287  ;;  %1325 = vst.msk [vmem:[#allocation3 + $0x68] sm:$0xff] %vm1311_vm14, %v1290_v60 }
 0x296   : > { %1324 = vst.msk [vmem:[#allocation3 + $0x60] sm:$0xff] %vm1311_vm14, %v1288_v59 }
 0x298   : > { %v1294_v62 = vpop.permute.xlu1 %1293 }
 0x299   : > { %v1292_v61 = vpop.permute.xlu0 %1291  ;;  %1327 = vst.msk [vmem:[#allocation3 + $0x78] sm:$0xff] %vm1311_vm14, %v1294_v62 }
 0x29a   : > { %1326 = vst.msk [vmem:[#allocation3 + $0x70] sm:$0xff] %vm1311_vm14, %v1292_v61 }
 0x29c   : > { %v1387_v0 = vpop.permute.xlu1 %1386 }
 0x29d   : > { %v1385_v63 = vpop.permute.xlu0 %1384  ;;  %1422 = vst.msk [vmem:[#allocation3 + $0x68] sm:$0xff] %vm1408_vm15, %v1387_v0 }
 0x29e   : > { %1421 = vst.msk [vmem:[#allocation3 + $0x60] sm:$0xff] %vm1408_vm15, %v1385_v63 }
 0x2a0   : > { %v1391_v2 = vpop.permute.xlu1 %1390 }
 0x2a1   : > { %v1389_v1 = vpop.permute.xlu0 %1388  ;;  %1424 = vst.msk [vmem:[#allocation3 + $0x78] sm:$0xff] %vm1408_vm15, %v1391_v2 }
 0x2a2   : > { %1423 = vst.msk [vmem:[#allocation3 + $0x70] sm:$0xff] %vm1408_vm15, %v1389_v1 }
 0x2a4   : > { %v1484_v6 = vpop.permute.xlu1 %1483 }
 0x2a5   : > { %v1482_v5 = vpop.permute.xlu0 %1481  ;;  %1519 = vst.msk [vmem:[#allocation3 + $0x68] sm:$0xff] %vm1505_vm2, %v1484_v6 }
 0x2a6   : > { %1518 = vst.msk [vmem:[#allocation3 + $0x60] sm:$0xff] %vm1505_vm2, %v1482_v5 }
 0x2a8   : > { %v1488_v35 = vpop.permute.xlu1 %1487 }
 0x2a9   : > { %v1486_v34 = vpop.permute.xlu0 %1485  ;;  %1521 = vst.msk [vmem:[#allocation3 + $0x78] sm:$0xff] %vm1505_vm2, %v1488_v35 }
 0x2aa   : > { %1520 = vst.msk [vmem:[#allocation3 + $0x70] sm:$0xff] %vm1505_vm2, %v1486_v34 }
 0x2ac   : > { %v1535_v8 = vld [vmem:[#allocation3 + $0x68] sm:$0xff] }
 0x2ad   : > { %v1534_v7 = vld [vmem:[#allocation3 + $0x60] sm:$0xff] }
 0x2ae   : > { %v1544_v9 = vpack.c.bf16 %v1535_v8, %v1534_v7 }
 0x2b0   : > { %2213 = vmatprep.mubr.msk.bf16.mxu1 %vm1582_vm3, %v1544_v9  ;;  %v1537_v12 = vld [vmem:[#allocation3 + $0x78] sm:$0xff] }
 0x2b1   : > { %v1536_v10 = vld [vmem:[#allocation3 + $0x70] sm:$0xff] }
 0x2b2   : > { %v1545_v13 = vpack.c.bf16 %v1537_v12, %v1536_v10 }
 0x2b4   : > { %2214 = vmatmul.mubr.msk.bf16.gmra.mrb[4].mxu1 %vm1582_vm3, %v1545_v13 }
 0x2cb   : > { %v3850_v15 = vpop.f32.mrb[0].mxu0 }
 0x2cc   : > { %1710 = vst.msk [vmem:[%s3854_s24 + $0x10] sm:$0xff] %vm669_vm1, %v3850_v15  ;;  %v3859_v11 = vpop.f32.mrb[1].mxu0  ;;  %v1727_v22 = vsel %vm669_vm1, %v3850_v15, 0.0 }
 0x2cd   : > { %1708 = vst.msk [vmem:[%s3854_s24] sm:$0xff] %vm669_vm1, %v3859_v11  ;;  %v3864_v14 = vpop.f32.mrb[2].mxu0  ;;  %v1724_v17 = vsel %vm669_vm1, %v3859_v11, 0.0 }
 0x2ce   : > { %1711 = vst.msk [vmem:[%s3854_s24 + $0x18] sm:$0xff] %vm669_vm1, %v3864_v14  ;;  %v3869_v16 = vpop.f32.mrb[3].mxu0  ;;  %v1729_v24 = vsel %vm669_vm1, %v3864_v14, 0.0 }
 0x2cf   : > { %1709 = vst.msk [vmem:[%s3854_s24 + $0x8] sm:$0xff] %vm669_vm1, %v3869_v16  ;;  %v1725_v18 = vsel %vm669_vm1, %v3869_v16, 0.0 }
 0x2d0   : > { %v1726_v20 = vadd.f32 %v1725_v18, %v1724_v17 }
 0x2d2   : > { %v1728_v3 = vadd.f32 %v1727_v22, %v1726_v20 }
 0x2d4   : > { %v1730_v26 = vadd.f32 %v1729_v24, %v1728_v3 }
 0x30b   : > { %v3882_v27 = vpop.f32.mrb[4].mxu0 }
 0x30c   : > { %1714 = vst.msk [vmem:[%s3854_s24 + $0x30] sm:$0xff] %vm669_vm1, %v3882_v27  ;;  %v3887_v28 = vpop.f32.mrb[5].mxu0  ;;  %v1735_v32 = vsel %vm669_vm1, %v3882_v27, 0.0 }
 0x30d   : > { %1712 = vst.msk [vmem:[%s3854_s24 + $0x20] sm:$0xff] %vm669_vm1, %v3887_v28  ;;  %v1731_v29 = vsel %vm669_vm1, %v3887_v28, 0.0  ;;  %v3894_v4 = vpop.f32.mrb[6].mxu0 }
 0x30e   : > { %v1732_v30 = vadd.f32 %v1731_v29, %v1730_v26  ;;  %1715 = vst.msk [vmem:[%s3854_s24 + $0x38] sm:$0xff] %vm669_vm1, %v3894_v4  ;;  %v3899_v19 = vpop.f32.mrb[7].mxu0  ;;  %v1737_v36 = vsel %vm669_vm1, %v3894_v4, 0.0 }
 0x30f   : > { %1713 = vst.msk [vmem:[%s3854_s24 + $0x28] sm:$0xff] %vm669_vm1, %v3899_v19  ;;  %v1733_v31 = vsel %vm669_vm1, %v3899_v19, 0.0 }
 0x310   : > { %v1734_v21 = vadd.f32 %v1733_v31, %v1732_v30 }
 0x312   : > { %v1736_v33 = vadd.f32 %v1735_v32, %v1734_v21 }
 0x314   : > { %v1738_v37 = vadd.f32 %v1737_v36, %v1736_v33 }
 0x34b   : > { %v3910_v38 = vpop.f32.mrb[0].mxu1 }
 0x34c   : > { %1718 = vst.msk [vmem:[%s3854_s24 + $0x50] sm:$0xff] %vm669_vm1, %v3910_v38  ;;  %v3915_v51 = vpop.f32.mrb[1].mxu1  ;;  %v1743_v44 = vsel %vm669_vm1, %v3910_v38, 0.0 }
 0x34d   : > { %1716 = vst.msk [vmem:[%s3854_s24 + $0x40] sm:$0xff] %vm669_vm1, %v3915_v51  ;;  %v1739_v52 = vsel %vm669_vm1, %v3915_v51, 0.0  ;;  %v3922_v39 = vpop.f32.mrb[2].mxu1 }
 0x34e   : > { %v1740_v40 = vadd.f32 %v1739_v52, %v1738_v37  ;;  %1719 = vst.msk [vmem:[%s3854_s24 + $0x58] sm:$0xff] %vm669_vm1, %v3922_v39  ;;  %v3927_v41 = vpop.f32.mrb[3].mxu1  ;;  %v1745_v46 = vsel %vm669_vm1, %v3922_v39, 0.0 }
 0x34f   : > { %1717 = vst.msk [vmem:[%s3854_s24 + $0x48] sm:$0xff] %vm669_vm1, %v3927_v41  ;;  %v1741_v42 = vsel %vm669_vm1, %v3927_v41, 0.0 }
 0x350   : > { %v1742_v43 = vadd.f32 %v1741_v42, %v1740_v40 }
 0x352   : > { %v1744_v45 = vadd.f32 %v1743_v44, %v1742_v43 }
 0x354   : > { %v1746_v47 = vadd.f32 %v1745_v46, %v1744_v45 }
 0x387   : > { %v3941_v48 = vpop.f32.mrb[4].mxu1 }
 0x388   : > { %1722 = vst.msk [vmem:[%s3854_s24 + $0x70] sm:$0xff] %vm669_vm1, %v3941_v48  ;;  %v3946_v49 = vpop.f32.mrb[5].mxu1 }
 0x389   : > { %1720 = vst.msk [vmem:[%s3854_s24 + $0x60] sm:$0xff] %vm669_vm1, %v3946_v49  ;;  %v1747_v50 = vsel %vm669_vm1, %v3946_v49, 0.0  ;;  %v3955_v53 = vpop.f32.mrb[6].mxu1 }
 0x38a   : > { %v1748_v54 = vadd.f32 %v1747_v50, %v1746_v47  ;;  %1723 = vst.msk [vmem:[%s3854_s24 + $0x78] sm:$0xff] %vm669_vm1, %v3955_v53  ;;  %v3965_v23 = vpop.f32.mrb[7].mxu1 }
 0x38b   : > { %1721 = vst.msk [vmem:[%s3854_s24 + $0x68] sm:$0xff] %vm669_vm1, %v3965_v23  ;;  %v1749_v25 = vsel %vm669_vm1, %v3965_v23, 0.0 }
 0x38c   : > { %v1750_v55 = vadd.f32 %v1749_v25, %v1748_v54 }
 0x38d   : > { %2612 = shalt.err (!%p2609_p13)
}
 0x38e   : > { %s2613_s24 = scalar_lea.hbm %s3960_s29, 2048  ;;  %s2617_s25 = scalar_lea.hbm %s4274_s0, 8192 }
 0x38f   : > { %p2614_p11 = scmp.ne.s32.totalorder %s3960_s29, %s2613_s24  ;;  %p2618_p3 = scmp.lt.u32.totalorder %s3960_s29, %s4274_s0 }
 0x390   : > { %p2619_p12 = scmp.lt.u32.totalorder %s2617_s25, %s2613_s24  ;;  %p2621_p5 = scmp.lt.u32.totalorder %s2613_s24, %s3960_s29 }
 0x391   : > { %p2615_p10 = pnand %p2614_p11, %p4275_p0 }
 0x392   : > { %p2620_p4 = por %p2619_p12, %p2618_p3 }
 0x393   : > { %p2616_p1 = pneg %p2615_p10 }
 0x394   : > { %p2622_p8 = por %p2621_p5, %p2620_p4 }
 0x396   : > { %p2623_p2 = pnand %p2622_p8, %p2616_p1 }
 0x398   : > { %2626 = shalt.err (!%p2623_p2)
}
 0x399   : > { %s2843_s5 = smov 128   ;;  %v1751_v56 = vsel %vm669_vm1, %v3941_v48, 0.0  ;;  %v1753_v58 = vsel %vm669_vm1, %v3955_v53, 0.0  ;;  %s2170_s6 = sshll.u32 %s4273_s4, 1 }
 0x39a   : > { %2247 = dma.vmem_to_hbm [thread:$0]  (%p4275_p0), %s3948_s23, 2048, %s3960_s29, %s1834_s20, %s2843_s5, %s2843_s5, %s2835_s22   ;;  %v1752_v57 = vadd.f32 %v1751_v56, %v1750_v55 }
 0x39b   : > { %s4003_s16 = sadd.s32 %s4272_s21, %s2170_s6  ;;  %s505_s23 = scalar_lea.vmem [#allocation16], %s3296_s27 }
 0x39c   : > { %v1754_v59 = vadd.f32 %v1753_v58, %v1752_v57  ;;  %s2171_s22 = sshll.u32 %s4003_s16, 4  ;;  %s1876_s29 = sshll.u32 %s505_s23, 4  ;;  %s4014_s29 = int_to_ptr.vmem [resolvable:$true] %s1876_s29 }
 0x39d   : > { %s4276_s17 = sld [smem:[#allocation48_spill]]  ;;  %s4019_s21 = scalar_lea.sflag [#allocation17], %s436_s14 }
 0x39e   : > { %v1755_v60 = vrot.slane %v1754_v59, 4  ;;  %s2627_s4 = scalar_lea.vmem %s4014_s29, 16  ;;  %s2844_s9 = smov [#allocation16]  }
 0x39f   : > { %p2628_p9 = scmp.ne.s32.totalorder %s4014_s29, %s2627_s4  ;;  %s2631_s25 = sshll.u32 %s2844_s9, 4  ;;  %s2632_s25 = int_to_ptr.vmem [resolvable:$false] %s2631_s25 }
 0x3a0   : > { %v1756_v61 = vadd.f32 %v1755_v60, %v1754_v59  ;;  %s2633_s28 = scalar_lea.vmem %s2632_s25, 32  ;;  %p2634_p13 = scmp.lt.s32.totalorder %s4014_s29, %s2632_s25 }
 0x3a1   : > { %p2629_p7 = pnand %p2628_p9, %p4275_p0  ;;  %p2635_p11 = scmp.lt.s32.totalorder %s2633_s28, %s2627_s4 }
 0x3a2   : > { %v1757_v62 = vrot.slane %v1756_v61, 2 }
 0x3a3   : > { %s4277_s24 = smov %s4276_s17  ;;  %s4012_s26 = scalar_lea.hbm %s4276_s17, %s2171_s22 }
 0x3a4   : > { %v1758_v63 = vadd.f32 %v1757_v62, %v1756_v61  ;;  %p2630_p6 = pneg %p2629_p7  ;;  %p2636_p10 = por %p2635_p11, %p2634_p13 }
 0x3a6   : > { %v1759_v0 = vrot.slane %v1758_v63, 1  ;;  %p2637_p1 = pnand %p2636_p10, %p2630_p6 }
 0x3a8   : > { %v1760_v1 = vadd.f32 %v1759_v0, %v1758_v63 }
 0x3aa   : > { %v1761_v2 = vmul.f32 0.0078125, %v1760_v1  ;;  %1831 = vst.msk [vmem:[%s505_s23] sm:$0x1] %vm692_vm0, %v1760_v1 }
 0x3ab   : > { %2640 = shalt.err (!%p2637_p1)
}
 0x3ac   : > { %s2641_s19 = scalar_lea.hbm %s4012_s26, 16  ;;  %s2645_s5 = scalar_lea.hbm %s4277_s24, 64 }
 0x3ad   : > { %p2642_p3 = scmp.ne.s32.totalorder %s4012_s26, %s2641_s19  ;;  %p2646_p5 = scmp.lt.u32.totalorder %s4012_s26, %s4277_s24 }
 0x3ae   : > { %p2647_p8 = scmp.lt.u32.totalorder %s2645_s5, %s2641_s19  ;;  %p2649_p9 = scmp.lt.u32.totalorder %s2641_s19, %s4012_s26 }
 0x3af   : > { %p2643_p12 = pnand %p2642_p3, %p4275_p0 }
 0x3b0   : > { %p2648_p2 = por %p2647_p8, %p2646_p5 }
 0x3b1   : > { %p2644_p4 = pneg %p2643_p12 }
 0x3b2   : > { %p2650_p7 = por %p2649_p9, %p2648_p2 }
 0x3b4   : > { %p2651_p6 = pnand %p2650_p7, %p2644_p4 }
 0x3b6   : > { %2654 = shalt.err (!%p2651_p6)
}
 0x3b7   : > { %2248 = dma.vmem_to_hbm [thread:$0]  (%p4275_p0), %s4014_s29, 16, %s4012_s26, %s4019_s21   ;;  %v1762_v5 = vsub.f32 %v3859_v11, %v1761_v2  ;;  %v1763_v6 = vsub.f32 %v3869_v16, %v1761_v2  ;;  %v1764_v34 = vsub.f32 %v3850_v15, %v1761_v2  ;;  %v1765_v35 = vsub.f32 %v3864_v14, %v1761_v2 }
 0x3b8   : > { %v1766_v7 = vsub.f32 %v3887_v28, %v1761_v2  ;;  %v1767_v8 = vsub.f32 %v3899_v19, %v1761_v2  ;;  %v1768_v9 = vsub.f32 %v3882_v27, %v1761_v2  ;;  %v1769_v10 = vsub.f32 %v3894_v4, %v1761_v2  ;;  %s511_s29 = scalar_lea.vmem [#allocation18], %s3296_s27  ;;  %s4278_s26 = sld [smem:[#allocation49_spill]] }
 0x3b9   : > { %v1770_v12 = vsub.f32 %v3915_v51, %v1761_v2  ;;  %v1771_v13 = vsub.f32 %v3927_v41, %v1761_v2  ;;  %v1772_v11 = vsub.f32 %v3910_v38, %v1761_v2  ;;  %v1773_v16 = vsub.f32 %v3922_v39, %v1761_v2  ;;  %s1891_s20 = sshll.u32 %s511_s29, 4  ;;  %s2845_s25 = smov [#allocation18]   ;;  %s1892_s20 = int_to_ptr.vmem [resolvable:$true] %s1891_s20 }
 0x3ba   : > { %v1774_v15 = vsub.f32 %v3946_v49, %v1761_v2  ;;  %v1775_v14 = vsub.f32 %v3965_v23, %v1761_v2  ;;  %v1776_v17 = vsub.f32 %v3941_v48, %v1761_v2  ;;  %v1777_v18 = vsub.f32 %v3955_v53, %v1761_v2  ;;  %s2655_s9 = scalar_lea.vmem %s1892_s20, 16  ;;  %s2659_s28 = sshll.u32 %s2845_s25, 4  ;;  %s2660_s28 = int_to_ptr.vmem [resolvable:$false] %s2659_s28 }
 0x3bb   : > { %v1778_v20 = vmul.f32 %v1762_v5, %v1762_v5  ;;  %v1779_v22 = vmul.f32 %v1763_v6, %v1763_v6  ;;  %v1780_v3 = vmul.f32 %v1764_v34, %v1764_v34  ;;  %v1781_v24 = vmul.f32 %v1765_v35, %v1765_v35  ;;  %p2656_p13 = scmp.ne.s32.totalorder %s1892_s20, %s2655_s9  ;;  %s2661_s27 = scalar_lea.vmem %s2660_s28, 32 }
 0x3bc   : > { %v1782_v29 = vmul.f32 %v1766_v7, %v1766_v7  ;;  %v1783_v19 = vmul.f32 %v1767_v8, %v1767_v8  ;;  %v1784_v32 = vmul.f32 %v1768_v9, %v1768_v9  ;;  %v1785_v37 = vmul.f32 %v1769_v10, %v1769_v10  ;;  %p2662_p1 = scmp.lt.s32.totalorder %s1892_s20, %s2660_s28  ;;  %p2663_p3 = scmp.lt.s32.totalorder %s2661_s27, %s2655_s9 }
 0x3bd   : > { %v1794_v26 = vsel %vm669_vm1, %v1778_v20, 0.0  ;;  %v1795_v27 = vsel %vm669_vm1, %v1779_v22, 0.0  ;;  %v1797_v4 = vsel %vm669_vm1, %v1780_v3, 0.0  ;;  %v1799_v31 = vsel %vm669_vm1, %v1781_v24, 0.0  ;;  %p2657_p11 = pnand %p2656_p13, %p4275_p0 }
 0x3be   : > { %v1796_v28 = vadd.f32 %v1795_v27, %v1794_v26  ;;  %v1801_v33 = vsel %vm669_vm1, %v1782_v29, 0.0  ;;  %v1803_v38 = vsel %vm669_vm1, %v1783_v19, 0.0  ;;  %v1786_v52 = vmul.f32 %v1770_v12, %v1770_v12  ;;  %s4081_s4 = scalar_lea.hbm %s4278_s26, %s2171_s22  ;;  %p2664_p12 = por %p2663_p3, %p2662_p1 }
 0x3bf   : > { %v1805_v39 = vsel %vm669_vm1, %v1784_v32, 0.0  ;;  %v1787_v41 = vmul.f32 %v1771_v13, %v1771_v13  ;;  %v1807_v42 = vsel %vm669_vm1, %v1785_v37, 0.0  ;;  %v1788_v44 = vmul.f32 %v1772_v11, %v1772_v11  ;;  %p2658_p10 = pneg %p2657_p11 }
 0x3c0   : > { %v1798_v30 = vadd.f32 %v1797_v4, %v1796_v28  ;;  %v1809_v45 = vsel %vm669_vm1, %v1786_v52, 0.0  ;;  %v1789_v47 = vmul.f32 %v1773_v16, %v1773_v16  ;;  %v1790_v50 = vmul.f32 %v1774_v15, %v1774_v15 }
 0x3c1   : > { %v1811_v48 = vsel %vm669_vm1, %v1787_v41, 0.0  ;;  %v1813_v53 = vsel %vm669_vm1, %v1788_v44, 0.0  ;;  %v1791_v23 = vmul.f32 %v1775_v14, %v1775_v14  ;;  %v1792_v56 = vmul.f32 %v1776_v17, %v1776_v17  ;;  %p2665_p4 = pnand %p2664_p12, %p2658_p10 }
 0x3c2   : > { %v1800_v21 = vadd.f32 %v1799_v31, %v1798_v30  ;;  %v1815_v25 = vsel %vm669_vm1, %v1789_v47, 0.0  ;;  %v1817_v57 = vsel %vm669_vm1, %v1790_v50, 0.0  ;;  %v1793_v59 = vmul.f32 %v1777_v18, %v1777_v18 }
 0x3c3   : > { %v1819_v60 = vsel %vm669_vm1, %v1791_v23, 0.0  ;;  %v1821_v62 = vsel %vm669_vm1, %v1792_v56, 0.0 }
 0x3c4   : > { %v1802_v36 = vadd.f32 %v1801_v33, %v1800_v21  ;;  %v1823_v0 = vsel %vm669_vm1, %v1793_v59, 0.0 }
 0x3c6   : > { %v1804_v51 = vadd.f32 %v1803_v38, %v1802_v36 }
 0x3c8   : > { %v1806_v40 = vadd.f32 %v1805_v39, %v1804_v51 }
 0x3ca   : > { %v1808_v43 = vadd.f32 %v1807_v42, %v1806_v40 }
 0x3cc   : > { %v1810_v46 = vadd.f32 %v1809_v45, %v1808_v43 }
 0x3ce   : > { %v1812_v49 = vadd.f32 %v1811_v48, %v1810_v46 }
 0x3d0   : > { %v1814_v54 = vadd.f32 %v1813_v53, %v1812_v49 }
 0x3d2   : > { %v1816_v55 = vadd.f32 %v1815_v25, %v1814_v54 }
 0x3d4   : > { %v1818_v58 = vadd.f32 %v1817_v57, %v1816_v55 }
 0x3d6   : > { %v1820_v61 = vadd.f32 %v1819_v60, %v1818_v58 }
 0x3d8   : > { %v1822_v63 = vadd.f32 %v1821_v62, %v1820_v61 }
 0x3da   : > { %v1824_v1 = vadd.f32 %v1823_v0, %v1822_v63 }
 0x3dc   : > { %v1825_v2 = vrot.slane %v1824_v1, 4 }
 0x3de   : > { %v1826_v5 = vadd.f32 %v1825_v2, %v1824_v1 }
 0x3e0   : > { %v1827_v6 = vrot.slane %v1826_v5, 2 }
 0x3e2   : > { %v1828_v34 = vadd.f32 %v1827_v6, %v1826_v5 }
 0x3e4   : > { %v1829_v35 = vrot.slane %v1828_v34, 1 }
 0x3e6   : > { %v1830_v7 = vadd.f32 %v1829_v35, %v1828_v34 }
 0x3e8   : > { %1832 = vst.msk [vmem:[%s511_s29] sm:$0x1] %vm692_vm0, %v1830_v7 }
 0x3e9   : > { %2668 = shalt.err (!%p2665_p4)
}
 0x3ea   : > { %s2669_s16 = scalar_lea.hbm %s4081_s4, 16  ;;  %s2673_s14 = scalar_lea.hbm %s4278_s26, 64 }
 0x3eb   : > { %p2670_p5 = scmp.ne.s32.totalorder %s4081_s4, %s2669_s16  ;;  %p2674_p9 = scmp.lt.u32.totalorder %s4081_s4, %s4278_s26 }
 0x3ec   : > { %p2675_p7 = scmp.lt.u32.totalorder %s2673_s14, %s2669_s16  ;;  %p2677_p13 = scmp.lt.u32.totalorder %s2669_s16, %s4081_s4 }
 0x3ed   : > { %p2671_p8 = pnand %p2670_p5, %p4275_p0 }
 0x3ee   : > { %p2676_p6 = por %p2675_p7, %p2674_p9 }
 0x3ef   : > { %p2672_p2 = pneg %p2671_p8 }
 0x3f0   : > { %p2678_p11 = por %p2677_p13, %p2676_p6 }
 0x3f2   : > { %p2679_p10 = pnand %p2678_p11, %p2672_p2 }
 0x3f4   : > { %2682 = shalt.err (!%p2679_p10)
}
 0x3f5   : > { %2249 = dma.vmem_to_hbm [thread:$0]  (%p4275_p0), %s1892_s20, 16, %s4081_s4, %s4019_s21  }
 0x3f6 PF: > { %p2290_p1 = scmp.ge.s32.totalorder %s2821_s18, 2  ;;  %s1903_s6 = sand.u32 1, %s2793_s11  }
 0x3f7   : > { %p4279_p3 = scmp.ne.s32.totalorder %s4242_s8, 0  ;;  %s1904_s23 = scalar_lea.sflag [#allocation6], %s1903_s6 }
 0x3f9   : > { %p2274_p12 = pnand %p2290_p1, %p4279_p3 }
 0x3fb   : > { %2760 = dma.done.wait (!%p2274_p12), %s1904_s23, 2048  }
 0x3fc   : > { %2762 = vsyncadd (!%p2274_p12), %s1904_s23, 4294965248  ;;  %s4280_s29 = sadd.s32 4294967294, %s2821_s18  }
 0x3fd   : > { %s1912_s1 = sand.u32 1, %s4280_s29  }
 0x3fe   : > { %s1913_s17 = scalar_lea.sflag [#allocation17], %s1912_s1 }
 0x3ff   : > { %2764 = dma.done.wait (!%p2274_p12), %s1913_s17, 32  }
 0x400   : > { %2766 = vsyncadd (!%p2274_p12), %s1913_s17, 4294967264  ;;  %s33_s18 = sadd.s32 1, %s2821_s18   ;;  %s4282_s27 = sld [smem:[#allocation27_spill]] }
 0x401   : > { %p4109_p0 = scmp.ge.s32.totalorder %s33_s18, 6   ;;  %s4283_s28 = sld [smem:[#allocation28_spill]] }
 0x402   : > { %s4284_s11 = sld [smem:[#allocation29_spill]]  ;;  %s4285_s8 = smov %s3050_s30 }
 0x403   : > { %s4286_s21 = sld [smem:[#allocation40_spill]]  ;;  %s4287_s14 = sld [smem:[#allocation32_spill]] }
 0x404   : > { %s4288_s20 = sld [smem:[#allocation33_spill]]  ;;  %s4289_s16 = sld [smem:[#allocation35_spill]] }
 0x405   : > { %s4290_s17 = sld [smem:[#allocation36_spill]]  ;;  %s4292_s29 = smov %s4315_s7 }
 0x406   : > { %s4294_s9 = smov %s2789_s10  ;;  %s4295_s10 = smov %s4285_s8 }
 0x407   :  { %32 = sbr.rel (!%p4109_p0) target bundleno = 26 (0x1a), region = 160 }
 0x408   : > { %s4293_s30 = smov %s4284_s11  ;;  %s4296_s11 = smov %s2797_s12 }
 0x409   : > { %s4297_s12 = smov %s2801_s13  ;;  %s4298_s13 = smov %s4286_s21 }
 0x40a   : > { %s4299_s15 = smov %s4288_s20 }
 0x40e   :  { %1925 = vsyncpa [#allocation5], 1 }
 0x40f   :  { %1927 = vsyncpa [#allocation5 + $0x1], 1 }
 0x410   :  { %1928 = vsyncpa [#allocation8], 1 }
 0x411   :  { %1930 = vsyncpa [#allocation8 + $0x1], 1 }
 0x412   :  { %1931 = vsyncpa [#allocation11], 1 }
 0x413   :  { %1932 = vsyncpa [#allocation14], 1 }
 0x414   :  { %1933 = vsyncpa [#allocation6], 1 }
 0x415   :  { %1935 = vsyncpa [#allocation6 + $0x1], 1 }
 0x416   :  { %1936 = vsyncpa [#allocation17], 1 }
 0x417   :  { %1938 = vsyncpa [#allocation17 + $0x1], 1 }

</bundles_post_ra>
